<compile_context>
chip_gen: v7x
topology: tpu7x:2x2x1
jax: 0.10.0
libtpu: 0.0.40
codegen_flags: <defaults>
</compile_context>

<pallas_src>
import math
from functools import partial

import jax
import jax.numpy as jnp
from jax import lax
from jax.experimental import pallas as pl
from jax.experimental.pallas import tpu as pltpu

# ----------------------------- model config (small) -------------------------
B = 2            # batch
C = 3            # image channels
IMG = 16         # image size (H = W)
PS = 4           # patch size
DIM = 32         # model dim
DEPTH = 2        # transformer depth
HEADS = 4        # attention heads
DH = 16          # dim per head
INNER = HEADS * DH   # 64
MLP = 64         # feed-forward hidden dim
NCLS = 10        # num classes

P = (IMG // PS) * (IMG // PS)        # num patches = 16
PD = PS * PS * 5 * C                 # SPT patch dim = 240
N = P + 1                            # real sequence length (with cls) = 17
NPAD = 32                            # padded sequence length (bf16 aligned)
EPS = 1e-5
NEG = -1e30                          # finite mask value (kernel)
NEG_MAX = -jnp.finfo(jnp.float32).max  # PyTorch-faithful value (reference)


def _num_batch_blocks():
    """2 on v7x (split batch across the 2 TensorCores), 1 elsewhere."""
    try:
        kind = jax.devices()[0].device_kind.lower()
    except Exception:
        return 1
    if ("v7" in kind) or ("7x" in kind) or ("tpu7" in kind):
        return 2 if (B % 2 == 0) else 1
    return 1


NB = _num_batch_blocks()     # grid size over batch
BBLK = B // NB               # images per grid step
ZB = HEADS * BBLK            # attention batch (head-major) per grid step


# ----------------------------- JAX glue: SPT rearrange ----------------------
def spt_tokens(img):
    """img: (B, C, H, W) NCHW -> (B, P, PD) shifted-patch tokens (pre-LN)."""
    z_col = jnp.zeros_like(img[:, :, :, :1])
    z_row = jnp.zeros_like(img[:, :, :1, :])
    sh_right = jnp.concatenate([z_col, img[:, :, :, :-1]], axis=3)   # F.pad (1,-1,0,0)
    sh_left = jnp.concatenate([img[:, :, :, 1:], z_col], axis=3)     # F.pad (-1,1,0,0)
    sh_down = jnp.concatenate([z_row, img[:, :, :-1, :]], axis=2)    # F.pad (0,0,1,-1)
    sh_up = jnp.concatenate([img[:, :, 1:, :], z_row], axis=2)       # F.pad (0,0,-1,1)
    x = jnp.concatenate([img, sh_right, sh_left, sh_down, sh_up], axis=1)  # (B,5C,H,W)
    b, c5, h, w = x.shape
    hh, ww = h // PS, w // PS
    # rearrange 'b c (h p1) (w p2) -> b (h w) (p1 p2 c)'
    x = x.reshape(b, c5, hh, PS, ww, PS)
    x = x.transpose(0, 2, 4, 3, 5, 1)              # b, h, w, p1, p2, c
    return x.reshape(b, hh * ww, PS * PS * c5)


# ----------------------------- shared math helpers --------------------------
def _layernorm(x, g, b):
    mu = jnp.mean(x, axis=-1, keepdims=True)
    var = jnp.mean((x - mu) ** 2, axis=-1, keepdims=True)
    return (x - mu) * lax.rsqrt(var + EPS) * g + b


def _gelu_exact(x):   # reference: matches torch.nn.GELU() (erf form)
    return 0.5 * x * (1.0 + lax.erf(x / math.sqrt(2.0)))


def _gelu_tanh(x):    # kernel: tanh approximation (goes to the EUP)
    c = math.sqrt(2.0 / math.pi)
    return 0.5 * x * (1.0 + jnp.tanh(c * (x + 0.044715 * x * x * x)))


# ----------------------------- Pallas kernel --------------------------------
def vit_kernel(patches_ref,      # (BBLK, NPAD, PD)   f32   zero-padded rows >= P
               seq_ref,          # (3, NPAD, DIM)     f32   [rowmask, cls+pos+pb, poolmask/N]
               pln_ref,          # (2, PD)            f32   patch LN [gamma; beta]
               pw_ref,           # (PD, DIM)          bf16  patch Linear weight
               wqkvz_ref,        # (DEPTH, ZB, DIM, 3*DH) bf16  per-(head,img) fused QKV (temp folded)
               woz_ref,          # (DEPTH, ZB, DH, DIM)   bf16  per-(head,img) output proj rows
               w1_ref,           # (DEPTH, DIM, MLP)  bf16
               w2_ref,           # (DEPTH, MLP, DIM)  bf16
               vecs_ref,         # (DEPTH, 6, DIM)    f32   [aln_g, aln_b, bo, fln_g, fln_b, b2]
               b1_ref,           # (DEPTH, 1, MLP)    f32
               head_ref,         # (3, DIM)           f32   [hln_g, hln_b, hb(padded)]
               hw_ref,           # (DIM, NCLS)        bf16
               out_ref):         # (BBLK, 1, NCLS)    f32
    bf16 = jnp.bfloat16
    f32 = jnp.float32
    bn = BBLK * NPAD

    # ---- SPT patch embedding: LayerNorm(patch_dim) + Linear (pb folded) ----
    pat = patches_ref[...].reshape(bn, PD)
    tok = _layernorm(pat, pln_ref[0:1], pln_ref[1:2])
    tok = jnp.dot(tok.astype(bf16), pw_ref[...], preferred_element_type=f32)
    tok = tok.reshape(BBLK, NPAD, DIM)
    # rowmask zeroes padded-row junk; clspos adds patch bias + pos emb + cls.
    x = tok * seq_ref[0] + seq_ref[1]
    x = x.reshape(bn, DIM)                                           # f32

    # ---- loop-invariant additive attention mask (LSA diag + padded keys) ----
    ri = lax.broadcasted_iota(jnp.int32, (NPAD, NPAD), 0)
    ci = lax.broadcasted_iota(jnp.int32, (NPAD, NPAD), 1)
    mask_add = jnp.where(jnp.logical_or(ri == ci, ci >= N), NEG, 0.0).astype(f32)
    mask_add = jnp.broadcast_to(mask_add[None], (ZB, NPAD, NPAD))

    for l in range(DEPTH):
        vd = vecs_ref[l]                                             # (6, DIM)

        # ----------------- LSA block (+ residual) -----------------
        xn = _layernorm(x, vd[0:1], vd[1:2]).astype(bf16)            # (bn, DIM)
        # replicate tokens across heads: z = h * BBLK + b (head-major)
        xn3 = xn.reshape(BBLK, NPAD, DIM)
        xz = jnp.broadcast_to(xn3[None], (HEADS, BBLK, NPAD, DIM)).reshape(ZB, NPAD, DIM)
        qkv = jnp.einsum('znd,zdf->znf', xz, wqkvz_ref[l],
                         preferred_element_type=f32)                 # (ZB, NPAD, 3*DH)
        qkv = qkv.astype(bf16)
        q = qkv[..., 0:DH]            # exp(temperature) pre-folded into Wq
        k = qkv[..., DH:2 * DH]
        v = qkv[..., 2 * DH:3 * DH]
        dots = jnp.einsum('znd,zmd->znm', q, k,
                          preferred_element_type=f32)                # (ZB, NPAD, NPAD)
        dots = dots + mask_add
        dots = dots - jnp.max(dots, axis=-1, keepdims=True)
        e = jnp.exp(dots)
        attn = e * pl.reciprocal(jnp.sum(e, axis=-1, keepdims=True), approx=True)
        ov = jnp.einsum('znm,zmd->znd', attn.astype(bf16), v,
                        preferred_element_type=f32)                  # (ZB, NPAD, DH)
        proj = jnp.einsum('znd,zdf->znf', ov.astype(bf16), woz_ref[l],
                          preferred_element_type=f32)                # (ZB, NPAD, DIM)
        attn_out = proj.reshape(HEADS, BBLK, NPAD, DIM).sum(axis=0).reshape(bn, DIM)
        x = attn_out + vd[2:3] + x

        # ----------------- FeedForward block (+ residual) ---------
        xn = _layernorm(x, vd[3:4], vd[4:5])
        hdd = jnp.dot(xn.astype(bf16), w1_ref[l],
                      preferred_element_type=f32) + b1_ref[l]
        hdd = _gelu_tanh(hdd)
        x = jnp.dot(hdd.astype(bf16), w2_ref[l],
                    preferred_element_type=f32) + vd[5:6] + x

    # ---- masked mean pool over the N real tokens + MLP head ------------------
    x = x.reshape(BBLK, NPAD, DIM)
    pooled = jnp.sum(x * seq_ref[2], axis=1)                          # (BBLK, DIM)
    pooled = _layernorm(pooled, head_ref[0:1], head_ref[1:2])
    logits = jnp.dot(pooled.astype(bf16), hw_ref[...],
                     preferred_element_type=f32) + head_ref[2:3, 0:NCLS]
    out_ref[...] = logits.reshape(BBLK, 1, NCLS)


# ----------------------------- wrapper ---------------------------------------
def _const_spec(shape):
    n = len(shape)
    return pl.BlockSpec(shape, lambda b, _n=n: (0,) * _n)


@jax.jit
def vit_forward(img, params):
    p = params
    bf16 = jnp.bfloat16
    f32 = jnp.float32

    # ----- JAX glue: SPT shift + patch rearrange, zero-padded to NPAD rows ---
    patches = spt_tokens(img)                                         # (B, P, PD)
    patches = jnp.concatenate(
        [patches, jnp.zeros((B, NPAD - P, PD), f32)], axis=1)         # (B, NPAD, PD)

    # ----- packed sequence constants: rowmask, cls+pos+pb, pool weights ------
    rows = jnp.arange(NPAD)[:, None]
    rowmask = jnp.broadcast_to((rows < P).astype(f32), (NPAD, DIM))
    clspos = jnp.zeros((NPAD, DIM), f32)
    clspos = clspos.at[:P].set(p["pos"][1:N] + p["pb"])               # patch rows
    clspos = clspos.at[P].set(p["pos"][0] + p["cls"][0])              # cls row
    poolw = jnp.broadcast_to(jnp.where(rows < N, 1.0 / N, 0.0).astype(f32), (NPAD, DIM))
    seq_const = jnp.stack([rowmask, clspos, poolw], axis=0)           # (3, NPAD, DIM)

    # ----- patch-embedding params --------------------------------------------
    pln = jnp.concatenate([p["pln_g"], p["pln_b"]], axis=0)           # (2, PD)
    pw = p["pw"].astype(bf16)

    # ----- per-(head, image) replicated attention weights (no in-kernel transpose)
    wq_s = p["wq"] * jnp.exp(p["temp"])[:, :, None]                   # temp folded into q
    wq4 = wq_s.reshape(DEPTH, DIM, HEADS, DH)
    wk4 = p["wk"].reshape(DEPTH, DIM, HEADS, DH)
    wv4 = p["wv"].reshape(DEPTH, DIM, HEADS, DH)
    wqkv_h = jnp.concatenate([wq4, wk4, wv4], axis=-1)                # (DEPTH, DIM, HEADS, 3*DH)
    wqkv_h = jnp.transpose(wqkv_h, (0, 2, 1, 3))                      # (DEPTH, HEADS, DIM, 3*DH)
    wqkvz = jnp.broadcast_to(wqkv_h[:, :, None],
                             (DEPTH, HEADS, BBLK, DIM, 3 * DH))
    wqkvz = wqkvz.reshape(DEPTH, ZB, DIM, 3 * DH).astype(bf16)

    wo4 = p["wo"].reshape(DEPTH, HEADS, DH, DIM)
    woz = jnp.broadcast_to(wo4[:, :, None], (DEPTH, HEADS, BBLK, DH, DIM))
    woz = woz.reshape(DEPTH, ZB, DH, DIM).astype(bf16)

    # ----- packed per-layer vectors / weights ---------------------------------
    vecs_dim = jnp.stack([p["aln_g"], p["aln_b"], p["bo"],
                          p["fln_g"], p["fln_b"], p["b2"]], axis=1)   # (DEPTH, 6, DIM)
    b1 = p["b1"].reshape(DEPTH, 1, MLP)
    w1 = p["w1"].astype(bf16)
    w2 = p["w2"].astype(bf16)

    # ----- packed head params --------------------------------------------------
    hb_pad = jnp.zeros((1, DIM), f32).at[:, :NCLS].set(p["hb"])
    head_vecs = jnp.concatenate([p["hln_g"], p["hln_b"], hb_pad], axis=0)  # (3, DIM)
    hw = p["hw"].astype(bf16)

    args = (patches, seq_const, pln, pw, wqkvz, woz, w1, w2,
            vecs_dim, b1, head_vecs, hw)

    in_specs = [
        pl.BlockSpec((BBLK, NPAD, PD), lambda b: (b, 0, 0)),          # patches (split on batch)
        _const_spec((3, NPAD, DIM)),                                  # seq_const
        _const_spec((2, PD)),                                         # pln
        _const_spec((PD, DIM)),                                       # pw
        _const_spec((DEPTH, ZB, DIM, 3 * DH)),                        # wqkvz
        _const_spec((DEPTH, ZB, DH, DIM)),                            # woz
        _const_spec((DEPTH, DIM, MLP)),                               # w1
        _const_spec((DEPTH, MLP, DIM)),                               # w2
        _const_spec((DEPTH, 6, DIM)),                                 # vecs_dim
        _const_spec((DEPTH, 1, MLP)),                                 # b1
        _const_spec((3, DIM)),                                        # head_vecs
        _const_spec((DIM, NCLS)),                                     # hw
    ]
    out_specs = pl.BlockSpec((BBLK, 1, NCLS), lambda b: (b, 0, 0))

    out = pl.pallas_call(
        vit_kernel,
        out_shape=jax.ShapeDtypeStruct((B, 1, NCLS), jnp.float32),
        grid=(NB,),
        in_specs=in_specs,
        out_specs=out_specs,
        compiler_params=pltpu.CompilerParams(
            dimension_semantics=("parallel",)),
    )(*args)
    return out.reshape(B, NCLS)


# ----------------------------- pure-JAX reference ----------------------------
def reference(img, p):
    hp = partial(jnp.einsum, precision=lax.Precision.HIGHEST)
    tok = spt_tokens(img)
    tok = _layernorm(tok, p["pln_g"][0], p["pln_b"][0])
    tok = hp("bpi,ij->bpj", tok, p["pw"]) + p["pb"][0]
    cls = jnp.broadcast_to(p["cls"][None], (B, 1, DIM))
    x = jnp.concatenate([cls, tok], axis=1) + p["pos"][None]
    diag = jnp.eye(N, dtype=bool)
    for l in range(DEPTH):
        xn = _layernorm(x, p["aln_g"][l], p["aln_b"][l])
        q = hp("bni,ij->bnj", xn, p["wq"][l]).reshape(B, N, HEADS, DH).transpose(0, 2, 1, 3)
        k = hp("bni,ij->bnj", xn, p["wk"][l]).reshape(B, N, HEADS, DH).transpose(0, 2, 1, 3)
        v = hp("bni,ij->bnj", xn, p["wv"][l]).reshape(B, N, HEADS, DH).transpose(0, 2, 1, 3)
        dots = hp("bhpd,bhqd->bhpq", q, k) * jnp.exp(p["temp"][l, 0])
        dots = jnp.where(diag, NEG_MAX, dots)
        attn = jax.nn.softmax(dots, axis=-1)
        o = hp("bhpq,bhqd->bhpd", attn, v).transpose(0, 2, 1, 3).reshape(B, N, INNER)
        x = hp("bni,ij->bnj", o, p["wo"][l]) + p["bo"][l] + x
        xn = _layernorm(x, p["fln_g"][l], p["fln_b"][l])
        h = _gelu_exact(hp("bni,ij->bnj", xn, p["w1"][l]) + p["b1"][l])
        x = hp("bni,ij->bnj", h, p["w2"][l]) + p["b2"][l] + x
    pooled = x.mean(axis=1)
    pooled = _layernorm(pooled, p["hln_g"][0], p["hln_b"][0])
    return hp("bi,ij->bj", pooled, p["hw"]) + p["hb"]


# ----------------------------- param init ------------------------------------
def init_params(key):
    ks = jax.random.split(key, 16)
    rnd = lambda k, shape, s=0.02: (s * jax.random.normal(k, shape)).astype(jnp.float32)
    return {
        "pln_g": jnp.ones((1, PD), jnp.float32),
        "pln_b": jnp.zeros((1, PD), jnp.float32),
        "pw": rnd(ks[0], (PD, DIM)),
        "pb": jnp.zeros((1, DIM), jnp.float32),
        "cls": jax.random.normal(ks[1], (1, DIM)).astype(jnp.float32),
        "pos": jax.random.normal(ks[2], (N, DIM)).astype(jnp.float32),
        "aln_g": jnp.ones((DEPTH, DIM), jnp.float32),
        "aln_b": jnp.zeros((DEPTH, DIM), jnp.float32),
        "wq": rnd(ks[3], (DEPTH, DIM, INNER)),
        "wk": rnd(ks[4], (DEPTH, DIM, INNER)),
        "wv": rnd(ks[5], (DEPTH, DIM, INNER)),
        "wo": rnd(ks[6], (DEPTH, INNER, DIM)),
        "bo": jnp.zeros((DEPTH, DIM), jnp.float32),
        "temp": jnp.full((DEPTH, 1), math.log(DH ** -0.5), jnp.float32),
        "fln_g": jnp.ones((DEPTH, DIM), jnp.float32),
        "fln_b": jnp.zeros((DEPTH, DIM), jnp.float32),
        "w1": rnd(ks[7], (DEPTH, DIM, MLP)),
        "b1": jnp.zeros((DEPTH, MLP), jnp.float32),
        "w2": rnd(ks[8], (DEPTH, MLP, DIM)),
        "b2": jnp.zeros((DEPTH, DIM), jnp.float32),
        "hln_g": jnp.ones((1, DIM), jnp.float32),
        "hln_b": jnp.zeros((1, DIM), jnp.float32),
        "hw": rnd(ks[9], (DIM, NCLS)),
        "hb": jnp.zeros((1, NCLS), jnp.float32),
    }


# ----------------------------- main -------------------------------------------
if __name__ == "__main__":
    # TODO(synk): nn.Dropout layers are inference no-ops (p effectively 0) and
    #             are intentionally omitted from the kernel.
    key = jax.random.PRNGKey(0)
    kimg, kparams = jax.random.split(key)
    img = jax.random.normal(kimg, (B, C, IMG, IMG), dtype=jnp.float32)  # NCHW
    params = init_params(kparams)

    out = vit_forward(img, params)
    out = jax.block_until_ready(out)
    assert out.shape == (B, NCLS)
    assert bool(jnp.all(jnp.isfinite(out)))

    ref = reference(img, params)
    assert bool(jnp.allclose(out, ref, rtol=2e-2, atol=2e-2)), (
        "Pallas output does not match JAX reference")

    print("KERNEL_OK")
</pallas_src>

<mosaic_0001>
module attributes {stable_mosaic.version = 11 : i64} {
  func.func @vit_kernel(%arg0: i32, %arg1: memref<2x32x240xf32, #tpu.memory_space<vmem>>, %arg2: memref<3x32x32xf32, #tpu.memory_space<vmem>>, %arg3: memref<2x240xf32, #tpu.memory_space<vmem>>, %arg4: memref<240x32xbf16, #tpu.memory_space<vmem>>, %arg5: memref<2x8x32x48xbf16, #tpu.memory_space<vmem>>, %arg6: memref<2x8x16x32xbf16, #tpu.memory_space<vmem>>, %arg7: memref<2x32x64xbf16, #tpu.memory_space<vmem>>, %arg8: memref<2x64x32xbf16, #tpu.memory_space<vmem>>, %arg9: memref<2x6x32xf32, #tpu.memory_space<vmem>>, %arg10: memref<2x1x64xf32, #tpu.memory_space<vmem>>, %arg11: memref<3x32xf32, #tpu.memory_space<vmem>>, %arg12: memref<32x10xbf16, #tpu.memory_space<vmem>>, %arg13: memref<2x1x10xf32, #tpu.memory_space<vmem>>) attributes {dimension_semantics = [#tpu.dimension_semantics<parallel>], iteration_bounds = array<i64: 1>, scalar_prefetch = 0 : i64, scratch_operands = 0 : i64, tpu.core_type = #tpu.core_type<tc>, window_params = [{transform_indices = @transform_0, window_bounds = array<i64: 2, 32, 240>}, {pipeline_mode = #tpu.pipeline_mode<synchronous>, transform_indices = @transform_1, window_bounds = array<i64: 3, 32, 32>}, {pipeline_mode = #tpu.pipeline_mode<synchronous>, transform_indices = @transform_2, window_bounds = array<i64: 2, 240>}, {pipeline_mode = #tpu.pipeline_mode<synchronous>, transform_indices = @transform_3, window_bounds = array<i64: 240, 32>}, {pipeline_mode = #tpu.pipeline_mode<synchronous>, transform_indices = @transform_4, window_bounds = array<i64: 2, 8, 32, 48>}, {pipeline_mode = #tpu.pipeline_mode<synchronous>, transform_indices = @transform_5, window_bounds = array<i64: 2, 8, 16, 32>}, {pipeline_mode = #tpu.pipeline_mode<synchronous>, transform_indices = @transform_6, window_bounds = array<i64: 2, 32, 64>}, {pipeline_mode = #tpu.pipeline_mode<synchronous>, transform_indices = @transform_7, window_bounds = array<i64: 2, 64, 32>}, {pipeline_mode = #tpu.pipeline_mode<synchronous>, transform_indices = @transform_8, window_bounds = array<i64: 2, 6, 32>}, {pipeline_mode = #tpu.pipeline_mode<synchronous>, transform_indices = @transform_9, window_bounds = array<i64: 2, 1, 64>}, {pipeline_mode = #tpu.pipeline_mode<synchronous>, transform_indices = @transform_10, window_bounds = array<i64: 3, 32>}, {pipeline_mode = #tpu.pipeline_mode<synchronous>, transform_indices = @transform_11, window_bounds = array<i64: 32, 10>}, {transform_indices = @transform_12, window_bounds = array<i64: 2, 1, 10>}]} {
    %c0 = arith.constant 0 : index
    %c0_0 = arith.constant 0 : index
    %c0_1 = arith.constant 0 : index
    %0 = vector.load %arg1[%c0, %c0_0, %c0_1] : memref<2x32x240xf32, #tpu.memory_space<vmem>>, vector<2x32x240xf32>
    %1 = vector.shape_cast %0 : vector<2x32x240xf32> to vector<64x240xf32>
    %c0_2 = arith.constant 0 : index
    %c0_3 = arith.constant 0 : index
    %2 = vector.load %arg3[%c0_2, %c0_3] : memref<2x240xf32, #tpu.memory_space<vmem>>, vector<1x240xf32>
    %c1 = arith.constant 1 : index
    %c0_4 = arith.constant 0 : index
    %3 = vector.load %arg3[%c1, %c0_4] : memref<2x240xf32, #tpu.memory_space<vmem>>, vector<1x240xf32>
    %cst = arith.constant dense<0.000000e+00> : vector<64xf32>
    %4 = vector.multi_reduction <add>, %1, %cst [1] : vector<64x240xf32> to vector<64xf32>
    %5 = vector.shape_cast %4 : vector<64xf32> to vector<64x1xf32>
    %cst_5 = arith.constant 2.400000e+02 : f32
    %6 = vector.broadcast %cst_5 : f32 to vector<64x1xf32>
    %7 = arith.divf %5, %6 : vector<64x1xf32>
    %8 = vector.broadcast %7 : vector<64x1xf32> to vector<64x240xf32>
    %9 = arith.subf %1, %8 : vector<64x240xf32>
    %10 = arith.mulf %9, %9 : vector<64x240xf32>
    %cst_6 = arith.constant dense<0.000000e+00> : vector<64xf32>
    %11 = vector.multi_reduction <add>, %10, %cst_6 [1] : vector<64x240xf32> to vector<64xf32>
    %12 = vector.shape_cast %11 : vector<64xf32> to vector<64x1xf32>
    %cst_7 = arith.constant 2.400000e+02 : f32
    %13 = vector.broadcast %cst_7 : f32 to vector<64x1xf32>
    %14 = arith.divf %12, %13 : vector<64x1xf32>
    %15 = vector.broadcast %7 : vector<64x1xf32> to vector<64x240xf32>
    %16 = arith.subf %1, %15 : vector<64x240xf32>
    %cst_8 = arith.constant 9.99999974E-6 : f32
    %17 = vector.broadcast %cst_8 : f32 to vector<64x1xf32>
    %18 = arith.addf %14, %17 : vector<64x1xf32>
    %19 = math.rsqrt %18 : vector<64x1xf32>
    %20 = vector.broadcast %19 : vector<64x1xf32> to vector<64x240xf32>
    %21 = arith.mulf %16, %20 : vector<64x240xf32>
    %22 = vector.broadcast %2 : vector<1x240xf32> to vector<64x240xf32>
    %23 = arith.mulf %21, %22 : vector<64x240xf32>
    %24 = vector.broadcast %3 : vector<1x240xf32> to vector<64x240xf32>
    %25 = arith.addf %23, %24 : vector<64x240xf32>
    %26 = arith.truncf %25 : vector<64x240xf32> to vector<64x240xbf16>
    %c0_9 = arith.constant 0 : index
    %c0_10 = arith.constant 0 : index
    %27 = vector.load %arg4[%c0_9, %c0_10] : memref<240x32xbf16, #tpu.memory_space<vmem>>, vector<240x32xbf16>
    %cst_11 = arith.constant dense<0.000000e+00> : vector<64x32xf32>
    %28 = tpu.matmul %26, %27, %cst_11 {dimension_numbers = #tpu.dot_dimension_numbers<[1], [0], [0], [1], [0, 0, 1, 1], [], []>} : vector<64x240xbf16>, vector<240x32xbf16>, vector<64x32xf32> -> vector<64x32xf32>
    %29 = vector.shape_cast %28 : vector<64x32xf32> to vector<2x32x32xf32>
    %c0_12 = arith.constant 0 : index
    %c0_13 = arith.constant 0 : index
    %c0_14 = arith.constant 0 : index
    %30 = vector.load %arg2[%c0_12, %c0_13, %c0_14] : memref<3x32x32xf32, #tpu.memory_space<vmem>>, vector<1x32x32xf32>
    %31 = vector.shape_cast %30 : vector<1x32x32xf32> to vector<32x32xf32>
    %32 = vector.shape_cast %31 : vector<32x32xf32> to vector<1x32x32xf32>
    %33 = vector.broadcast %32 : vector<1x32x32xf32> to vector<2x32x32xf32>
    %34 = arith.mulf %29, %33 : vector<2x32x32xf32>
    %c1_15 = arith.constant 1 : index
    %c0_16 = arith.constant 0 : index
    %c0_17 = arith.constant 0 : index
    %35 = vector.load %arg2[%c1_15, %c0_16, %c0_17] : memref<3x32x32xf32, #tpu.memory_space<vmem>>, vector<1x32x32xf32>
    %36 = vector.shape_cast %35 : vector<1x32x32xf32> to vector<32x32xf32>
    %37 = vector.shape_cast %36 : vector<32x32xf32> to vector<1x32x32xf32>
    %38 = vector.broadcast %37 : vector<1x32x32xf32> to vector<2x32x32xf32>
    %39 = arith.addf %34, %38 : vector<2x32x32xf32>
    %40 = vector.shape_cast %39 : vector<2x32x32xf32> to vector<64x32xf32>
    %41 = tpu.iota {dimensions = array<i32: 0>} : vector<32x32xi32>
    %42 = tpu.iota {dimensions = array<i32: 1>} : vector<32x32xi32>
    %43 = arith.cmpi eq, %41, %42 : vector<32x32xi32>
    %c17_i32 = arith.constant 17 : i32
    %44 = vector.broadcast %c17_i32 : i32 to vector<32x32xi32>
    %45 = arith.cmpi sge, %42, %44 : vector<32x32xi32>
    %46 = arith.ori %43, %45 : vector<32x32xi1>
    %cst_18 = arith.constant -1.000000e+30 : f32
    %cst_19 = arith.constant 0.000000e+00 : f32
    %47 = vector.broadcast %cst_18 : f32 to vector<32x32xf32>
    %48 = vector.broadcast %cst_19 : f32 to vector<32x32xf32>
    %49 = arith.select %46, %47, %48 : vector<32x32xi1>, vector<32x32xf32>
    %50 = vector.shape_cast %49 : vector<32x32xf32> to vector<1x32x32xf32>
    %51 = vector.shape_cast %50 : vector<1x32x32xf32> to vector<1x32x32xf32>
    %52 = vector.broadcast %51 : vector<1x32x32xf32> to vector<8x32x32xf32>
    %c0_20 = arith.constant 0 : index
    %c0_21 = arith.constant 0 : index
    %c0_22 = arith.constant 0 : index
    %53 = vector.load %arg9[%c0_20, %c0_21, %c0_22] : memref<2x6x32xf32, #tpu.memory_space<vmem>>, vector<1x6x32xf32>
    %54 = vector.shape_cast %53 : vector<1x6x32xf32> to vector<6x32xf32>
    %55 = vector.extract_strided_slice %54 {offsets = [0, 0], sizes = [1, 32], strides = [1, 1]} : vector<6x32xf32> to vector<1x32xf32>
    %56 = vector.extract_strided_slice %54 {offsets = [1, 0], sizes = [1, 32], strides = [1, 1]} : vector<6x32xf32> to vector<1x32xf32>
    %cst_23 = arith.constant dense<0.000000e+00> : vector<64xf32>
    %57 = vector.multi_reduction <add>, %40, %cst_23 [1] : vector<64x32xf32> to vector<64xf32>
    %58 = vector.shape_cast %57 : vector<64xf32> to vector<64x1xf32>
    %cst_24 = arith.constant 3.200000e+01 : f32
    %59 = vector.broadcast %cst_24 : f32 to vector<64x1xf32>
    %60 = arith.divf %58, %59 : vector<64x1xf32>
    %61 = vector.broadcast %60 : vector<64x1xf32> to vector<64x32xf32>
    %62 = arith.subf %40, %61 : vector<64x32xf32>
    %63 = arith.mulf %62, %62 : vector<64x32xf32>
    %cst_25 = arith.constant dense<0.000000e+00> : vector<64xf32>
    %64 = vector.multi_reduction <add>, %63, %cst_25 [1] : vector<64x32xf32> to vector<64xf32>
    %65 = vector.shape_cast %64 : vector<64xf32> to vector<64x1xf32>
    %cst_26 = arith.constant 3.200000e+01 : f32
    %66 = vector.broadcast %cst_26 : f32 to vector<64x1xf32>
    %67 = arith.divf %65, %66 : vector<64x1xf32>
    %68 = vector.broadcast %60 : vector<64x1xf32> to vector<64x32xf32>
    %69 = arith.subf %40, %68 : vector<64x32xf32>
    %cst_27 = arith.constant 9.99999974E-6 : f32
    %70 = vector.broadcast %cst_27 : f32 to vector<64x1xf32>
    %71 = arith.addf %67, %70 : vector<64x1xf32>
    %72 = math.rsqrt %71 : vector<64x1xf32>
    %73 = vector.broadcast %72 : vector<64x1xf32> to vector<64x32xf32>
    %74 = arith.mulf %69, %73 : vector<64x32xf32>
    %75 = vector.broadcast %55 : vector<1x32xf32> to vector<64x32xf32>
    %76 = arith.mulf %74, %75 : vector<64x32xf32>
    %77 = vector.broadcast %56 : vector<1x32xf32> to vector<64x32xf32>
    %78 = arith.addf %76, %77 : vector<64x32xf32>
    %79 = arith.truncf %78 : vector<64x32xf32> to vector<64x32xbf16>
    %80 = vector.shape_cast %79 : vector<64x32xbf16> to vector<2x32x32xbf16>
    %81 = vector.shape_cast %80 : vector<2x32x32xbf16> to vector<1x2x32x32xbf16>
    %82 = vector.shape_cast %81 : vector<1x2x32x32xbf16> to vector<1x2x32x32xbf16>
    %83 = vector.broadcast %82 : vector<1x2x32x32xbf16> to vector<4x2x32x32xbf16>
    %84 = vector.shape_cast %83 : vector<4x2x32x32xbf16> to vector<8x32x32xbf16>
    %c0_28 = arith.constant 0 : index
    %c0_29 = arith.constant 0 : index
    %c0_30 = arith.constant 0 : index
    %c0_31 = arith.constant 0 : index
    %85 = vector.load %arg5[%c0_28, %c0_29, %c0_30, %c0_31] : memref<2x8x32x48xbf16, #tpu.memory_space<vmem>>, vector<1x8x32x48xbf16>
    %86 = vector.shape_cast %85 : vector<1x8x32x48xbf16> to vector<8x32x48xbf16>
    "tpu.trace_start"() <{level = 10 : i32, message = "znd,zdf->znf"}> : () -> ()
    %cst_32 = arith.constant dense<0.000000e+00> : vector<8x32x48xf32>
    %87 = tpu.matmul %84, %86, %cst_32 {dimension_numbers = #tpu.dot_dimension_numbers<[2], [1], [1], [2], [0, 0, 0, 1, 1, 2], [0], [0]>} : vector<8x32x32xbf16>, vector<8x32x48xbf16>, vector<8x32x48xf32> -> vector<8x32x48xf32>
    "tpu.trace_stop"() : () -> ()
    %88 = arith.truncf %87 : vector<8x32x48xf32> to vector<8x32x48xbf16>
    %89 = vector.extract_strided_slice %88 {offsets = [0, 0, 0], sizes = [8, 32, 16], strides = [1, 1, 1]} : vector<8x32x48xbf16> to vector<8x32x16xbf16>
    %90 = vector.extract_strided_slice %88 {offsets = [0, 0, 16], sizes = [8, 32, 16], strides = [1, 1, 1]} : vector<8x32x48xbf16> to vector<8x32x16xbf16>
    %91 = vector.extract_strided_slice %88 {offsets = [0, 0, 32], sizes = [8, 32, 16], strides = [1, 1, 1]} : vector<8x32x48xbf16> to vector<8x32x16xbf16>
    "tpu.trace_start"() <{level = 10 : i32, message = "znd,zmd->znm"}> : () -> ()
    %cst_33 = arith.constant dense<0.000000e+00> : vector<8x32x32xf32>
    %92 = tpu.matmul %89, %90, %cst_33 {dimension_numbers = #tpu.dot_dimension_numbers<[2], [2], [1], [1], [0, 0, 0, 1, 1, 1], [0], [0]>} : vector<8x32x16xbf16>, vector<8x32x16xbf16>, vector<8x32x32xf32> -> vector<8x32x32xf32>
    "tpu.trace_stop"() : () -> ()
    %93 = arith.addf %92, %52 : vector<8x32x32xf32>
    %cst_34 = arith.constant dense<0xFF800000> : vector<8x32xf32>
    %94 = vector.multi_reduction <maximumf>, %93, %cst_34 [2] : vector<8x32x32xf32> to vector<8x32xf32>
    %95 = vector.shape_cast %94 : vector<8x32xf32> to vector<8x32x1xf32>
    %96 = vector.broadcast %95 : vector<8x32x1xf32> to vector<8x32x32xf32>
    %97 = arith.subf %93, %96 : vector<8x32x32xf32>
    %98 = math.exp %97 : vector<8x32x32xf32>
    %cst_35 = arith.constant dense<0.000000e+00> : vector<8x32xf32>
    %99 = vector.multi_reduction <add>, %98, %cst_35 [2] : vector<8x32x32xf32> to vector<8x32xf32>
    %100 = vector.shape_cast %99 : vector<8x32xf32> to vector<8x32x1xf32>
    %101 = tpu.reciprocal %100 {approx = true} : vector<8x32x1xf32> -> vector<8x32x1xf32>
    %102 = vector.broadcast %101 : vector<8x32x1xf32> to vector<8x32x32xf32>
    %103 = arith.mulf %98, %102 : vector<8x32x32xf32>
    %104 = arith.truncf %103 : vector<8x32x32xf32> to vector<8x32x32xbf16>
    "tpu.trace_start"() <{level = 10 : i32, message = "znm,zmd->znd"}> : () -> ()
    %cst_36 = arith.constant dense<0.000000e+00> : vector<8x32x16xf32>
    %105 = tpu.matmul %104, %91, %cst_36 {dimension_numbers = #tpu.dot_dimension_numbers<[2], [1], [1], [2], [0, 0, 0, 1, 1, 2], [0], [0]>} : vector<8x32x32xbf16>, vector<8x32x16xbf16>, vector<8x32x16xf32> -> vector<8x32x16xf32>
    "tpu.trace_stop"() : () -> ()
    %106 = arith.truncf %105 : vector<8x32x16xf32> to vector<8x32x16xbf16>
    %c0_37 = arith.constant 0 : index
    %c0_38 = arith.constant 0 : index
    %c0_39 = arith.constant 0 : index
    %c0_40 = arith.constant 0 : index
    %107 = vector.load %arg6[%c0_37, %c0_38, %c0_39, %c0_40] : memref<2x8x16x32xbf16, #tpu.memory_space<vmem>>, vector<1x8x16x32xbf16>
    %108 = vector.shape_cast %107 : vector<1x8x16x32xbf16> to vector<8x16x32xbf16>
    "tpu.trace_start"() <{level = 10 : i32, message = "znd,zdf->znf"}> : () -> ()
    %cst_41 = arith.constant dense<0.000000e+00> : vector<8x32x32xf32>
    %109 = tpu.matmul %106, %108, %cst_41 {dimension_numbers = #tpu.dot_dimension_numbers<[2], [1], [1], [2], [0, 0, 0, 1, 1, 2], [0], [0]>} : vector<8x32x16xbf16>, vector<8x16x32xbf16>, vector<8x32x32xf32> -> vector<8x32x32xf32>
    "tpu.trace_stop"() : () -> ()
    %110 = vector.shape_cast %109 : vector<8x32x32xf32> to vector<4x2x32x32xf32>
    %cst_42 = arith.constant dense<0.000000e+00> : vector<2x32x32xf32>
    %111 = vector.multi_reduction <add>, %110, %cst_42 [0] : vector<4x2x32x32xf32> to vector<2x32x32xf32>
    %112 = vector.shape_cast %111 : vector<2x32x32xf32> to vector<64x32xf32>
    %113 = vector.extract_strided_slice %54 {offsets = [2, 0], sizes = [1, 32], strides = [1, 1]} : vector<6x32xf32> to vector<1x32xf32>
    %114 = vector.broadcast %113 : vector<1x32xf32> to vector<64x32xf32>
    %115 = arith.addf %112, %114 : vector<64x32xf32>
    %116 = arith.addf %115, %40 : vector<64x32xf32>
    %117 = vector.extract_strided_slice %54 {offsets = [3, 0], sizes = [1, 32], strides = [1, 1]} : vector<6x32xf32> to vector<1x32xf32>
    %118 = vector.extract_strided_slice %54 {offsets = [4, 0], sizes = [1, 32], strides = [1, 1]} : vector<6x32xf32> to vector<1x32xf32>
    %cst_43 = arith.constant dense<0.000000e+00> : vector<64xf32>
    %119 = vector.multi_reduction <add>, %116, %cst_43 [1] : vector<64x32xf32> to vector<64xf32>
    %120 = vector.shape_cast %119 : vector<64xf32> to vector<64x1xf32>
    %cst_44 = arith.constant 3.200000e+01 : f32
    %121 = vector.broadcast %cst_44 : f32 to vector<64x1xf32>
    %122 = arith.divf %120, %121 : vector<64x1xf32>
    %123 = vector.broadcast %122 : vector<64x1xf32> to vector<64x32xf32>
    %124 = arith.subf %116, %123 : vector<64x32xf32>
    %125 = arith.mulf %124, %124 : vector<64x32xf32>
    %cst_45 = arith.constant dense<0.000000e+00> : vector<64xf32>
    %126 = vector.multi_reduction <add>, %125, %cst_45 [1] : vector<64x32xf32> to vector<64xf32>
    %127 = vector.shape_cast %126 : vector<64xf32> to vector<64x1xf32>
    %cst_46 = arith.constant 3.200000e+01 : f32
    %128 = vector.broadcast %cst_46 : f32 to vector<64x1xf32>
    %129 = arith.divf %127, %128 : vector<64x1xf32>
    %130 = vector.broadcast %122 : vector<64x1xf32> to vector<64x32xf32>
    %131 = arith.subf %116, %130 : vector<64x32xf32>
    %cst_47 = arith.constant 9.99999974E-6 : f32
    %132 = vector.broadcast %cst_47 : f32 to vector<64x1xf32>
    %133 = arith.addf %129, %132 : vector<64x1xf32>
    %134 = math.rsqrt %133 : vector<64x1xf32>
    %135 = vector.broadcast %134 : vector<64x1xf32> to vector<64x32xf32>
    %136 = arith.mulf %131, %135 : vector<64x32xf32>
    %137 = vector.broadcast %117 : vector<1x32xf32> to vector<64x32xf32>
    %138 = arith.mulf %136, %137 : vector<64x32xf32>
    %139 = vector.broadcast %118 : vector<1x32xf32> to vector<64x32xf32>
    %140 = arith.addf %138, %139 : vector<64x32xf32>
    %141 = arith.truncf %140 : vector<64x32xf32> to vector<64x32xbf16>
    %c0_48 = arith.constant 0 : index
    %c0_49 = arith.constant 0 : index
    %c0_50 = arith.constant 0 : index
    %142 = vector.load %arg7[%c0_48, %c0_49, %c0_50] : memref<2x32x64xbf16, #tpu.memory_space<vmem>>, vector<1x32x64xbf16>
    %143 = vector.shape_cast %142 : vector<1x32x64xbf16> to vector<32x64xbf16>
    %cst_51 = arith.constant dense<0.000000e+00> : vector<64x64xf32>
    %144 = tpu.matmul %141, %143, %cst_51 {dimension_numbers = #tpu.dot_dimension_numbers<[1], [0], [0], [1], [0, 0, 1, 1], [], []>} : vector<64x32xbf16>, vector<32x64xbf16>, vector<64x64xf32> -> vector<64x64xf32>
    %c0_52 = arith.constant 0 : index
    %c0_53 = arith.constant 0 : index
    %c0_54 = arith.constant 0 : index
    %145 = vector.load %arg10[%c0_52, %c0_53, %c0_54] : memref<2x1x64xf32, #tpu.memory_space<vmem>>, vector<1x1x64xf32>
    %146 = vector.shape_cast %145 : vector<1x1x64xf32> to vector<1x64xf32>
    %147 = vector.broadcast %146 : vector<1x64xf32> to vector<64x64xf32>
    %148 = arith.addf %144, %147 : vector<64x64xf32>
    %cst_55 = arith.constant 5.000000e-01 : f32
    %149 = vector.broadcast %cst_55 : f32 to vector<64x64xf32>
    %150 = arith.mulf %149, %148 : vector<64x64xf32>
    %cst_56 = arith.constant 4.471500e-02 : f32
    %151 = vector.broadcast %cst_56 : f32 to vector<64x64xf32>
    %152 = arith.mulf %151, %148 : vector<64x64xf32>
    %153 = arith.mulf %152, %148 : vector<64x64xf32>
    %154 = arith.mulf %153, %148 : vector<64x64xf32>
    %155 = arith.addf %148, %154 : vector<64x64xf32>
    %cst_57 = arith.constant 0.797884583 : f32
    %156 = vector.broadcast %cst_57 : f32 to vector<64x64xf32>
    %157 = arith.mulf %156, %155 : vector<64x64xf32>
    %158 = math.tanh %157 : vector<64x64xf32>
    %cst_58 = arith.constant 1.000000e+00 : f32
    %159 = vector.broadcast %cst_58 : f32 to vector<64x64xf32>
    %160 = arith.addf %159, %158 : vector<64x64xf32>
    %161 = arith.mulf %150, %160 : vector<64x64xf32>
    %162 = arith.truncf %161 : vector<64x64xf32> to vector<64x64xbf16>
    %c0_59 = arith.constant 0 : index
    %c0_60 = arith.constant 0 : index
    %c0_61 = arith.constant 0 : index
    %163 = vector.load %arg8[%c0_59, %c0_60, %c0_61] : memref<2x64x32xbf16, #tpu.memory_space<vmem>>, vector<1x64x32xbf16>
    %164 = vector.shape_cast %163 : vector<1x64x32xbf16> to vector<64x32xbf16>
    %cst_62 = arith.constant dense<0.000000e+00> : vector<64x32xf32>
    %165 = tpu.matmul %162, %164, %cst_62 {dimension_numbers = #tpu.dot_dimension_numbers<[1], [0], [0], [1], [0, 0, 1, 1], [], []>} : vector<64x64xbf16>, vector<64x32xbf16>, vector<64x32xf32> -> vector<64x32xf32>
    %166 = vector.extract_strided_slice %54 {offsets = [5, 0], sizes = [1, 32], strides = [1, 1]} : vector<6x32xf32> to vector<1x32xf32>
    %167 = vector.broadcast %166 : vector<1x32xf32> to vector<64x32xf32>
    %168 = arith.addf %165, %167 : vector<64x32xf32>
    %169 = arith.addf %168, %116 : vector<64x32xf32>
    %c1_63 = arith.constant 1 : index
    %c0_64 = arith.constant 0 : index
    %c0_65 = arith.constant 0 : index
    %170 = vector.load %arg9[%c1_63, %c0_64, %c0_65] : memref<2x6x32xf32, #tpu.memory_space<vmem>>, vector<1x6x32xf32>
    %171 = vector.shape_cast %170 : vector<1x6x32xf32> to vector<6x32xf32>
    %172 = vector.extract_strided_slice %171 {offsets = [0, 0], sizes = [1, 32], strides = [1, 1]} : vector<6x32xf32> to vector<1x32xf32>
    %173 = vector.extract_strided_slice %171 {offsets = [1, 0], sizes = [1, 32], strides = [1, 1]} : vector<6x32xf32> to vector<1x32xf32>
    %cst_66 = arith.constant dense<0.000000e+00> : vector<64xf32>
    %174 = vector.multi_reduction <add>, %169, %cst_66 [1] : vector<64x32xf32> to vector<64xf32>
    %175 = vector.shape_cast %174 : vector<64xf32> to vector<64x1xf32>
    %cst_67 = arith.constant 3.200000e+01 : f32
    %176 = vector.broadcast %cst_67 : f32 to vector<64x1xf32>
    %177 = arith.divf %175, %176 : vector<64x1xf32>
    %178 = vector.broadcast %177 : vector<64x1xf32> to vector<64x32xf32>
    %179 = arith.subf %169, %178 : vector<64x32xf32>
    %180 = arith.mulf %179, %179 : vector<64x32xf32>
    %cst_68 = arith.constant dense<0.000000e+00> : vector<64xf32>
    %181 = vector.multi_reduction <add>, %180, %cst_68 [1] : vector<64x32xf32> to vector<64xf32>
    %182 = vector.shape_cast %181 : vector<64xf32> to vector<64x1xf32>
    %cst_69 = arith.constant 3.200000e+01 : f32
    %183 = vector.broadcast %cst_69 : f32 to vector<64x1xf32>
    %184 = arith.divf %182, %183 : vector<64x1xf32>
    %185 = vector.broadcast %177 : vector<64x1xf32> to vector<64x32xf32>
    %186 = arith.subf %169, %185 : vector<64x32xf32>
    %cst_70 = arith.constant 9.99999974E-6 : f32
    %187 = vector.broadcast %cst_70 : f32 to vector<64x1xf32>
    %188 = arith.addf %184, %187 : vector<64x1xf32>
    %189 = math.rsqrt %188 : vector<64x1xf32>
    %190 = vector.broadcast %189 : vector<64x1xf32> to vector<64x32xf32>
    %191 = arith.mulf %186, %190 : vector<64x32xf32>
    %192 = vector.broadcast %172 : vector<1x32xf32> to vector<64x32xf32>
    %193 = arith.mulf %191, %192 : vector<64x32xf32>
    %194 = vector.broadcast %173 : vector<1x32xf32> to vector<64x32xf32>
    %195 = arith.addf %193, %194 : vector<64x32xf32>
    %196 = arith.truncf %195 : vector<64x32xf32> to vector<64x32xbf16>
    %197 = vector.shape_cast %196 : vector<64x32xbf16> to vector<2x32x32xbf16>
    %198 = vector.shape_cast %197 : vector<2x32x32xbf16> to vector<1x2x32x32xbf16>
    %199 = vector.shape_cast %198 : vector<1x2x32x32xbf16> to vector<1x2x32x32xbf16>
    %200 = vector.broadcast %199 : vector<1x2x32x32xbf16> to vector<4x2x32x32xbf16>
    %201 = vector.shape_cast %200 : vector<4x2x32x32xbf16> to vector<8x32x32xbf16>
    %c1_71 = arith.constant 1 : index
    %c0_72 = arith.constant 0 : index
    %c0_73 = arith.constant 0 : index
    %c0_74 = arith.constant 0 : index
    %202 = vector.load %arg5[%c1_71, %c0_72, %c0_73, %c0_74] : memref<2x8x32x48xbf16, #tpu.memory_space<vmem>>, vector<1x8x32x48xbf16>
    %203 = vector.shape_cast %202 : vector<1x8x32x48xbf16> to vector<8x32x48xbf16>
    "tpu.trace_start"() <{level = 10 : i32, message = "znd,zdf->znf"}> : () -> ()
    %cst_75 = arith.constant dense<0.000000e+00> : vector<8x32x48xf32>
    %204 = tpu.matmul %201, %203, %cst_75 {dimension_numbers = #tpu.dot_dimension_numbers<[2], [1], [1], [2], [0, 0, 0, 1, 1, 2], [0], [0]>} : vector<8x32x32xbf16>, vector<8x32x48xbf16>, vector<8x32x48xf32> -> vector<8x32x48xf32>
    "tpu.trace_stop"() : () -> ()
    %205 = arith.truncf %204 : vector<8x32x48xf32> to vector<8x32x48xbf16>
    %206 = vector.extract_strided_slice %205 {offsets = [0, 0, 0], sizes = [8, 32, 16], strides = [1, 1, 1]} : vector<8x32x48xbf16> to vector<8x32x16xbf16>
    %207 = vector.extract_strided_slice %205 {offsets = [0, 0, 16], sizes = [8, 32, 16], strides = [1, 1, 1]} : vector<8x32x48xbf16> to vector<8x32x16xbf16>
    %208 = vector.extract_strided_slice %205 {offsets = [0, 0, 32], sizes = [8, 32, 16], strides = [1, 1, 1]} : vector<8x32x48xbf16> to vector<8x32x16xbf16>
    "tpu.trace_start"() <{level = 10 : i32, message = "znd,zmd->znm"}> : () -> ()
    %cst_76 = arith.constant dense<0.000000e+00> : vector<8x32x32xf32>
    %209 = tpu.matmul %206, %207, %cst_76 {dimension_numbers = #tpu.dot_dimension_numbers<[2], [2], [1], [1], [0, 0, 0, 1, 1, 1], [0], [0]>} : vector<8x32x16xbf16>, vector<8x32x16xbf16>, vector<8x32x32xf32> -> vector<8x32x32xf32>
    "tpu.trace_stop"() : () -> ()
    %210 = arith.addf %209, %52 : vector<8x32x32xf32>
    %cst_77 = arith.constant dense<0xFF800000> : vector<8x32xf32>
    %211 = vector.multi_reduction <maximumf>, %210, %cst_77 [2] : vector<8x32x32xf32> to vector<8x32xf32>
    %212 = vector.shape_cast %211 : vector<8x32xf32> to vector<8x32x1xf32>
    %213 = vector.broadcast %212 : vector<8x32x1xf32> to vector<8x32x32xf32>
    %214 = arith.subf %210, %213 : vector<8x32x32xf32>
    %215 = math.exp %214 : vector<8x32x32xf32>
    %cst_78 = arith.constant dense<0.000000e+00> : vector<8x32xf32>
    %216 = vector.multi_reduction <add>, %215, %cst_78 [2] : vector<8x32x32xf32> to vector<8x32xf32>
    %217 = vector.shape_cast %216 : vector<8x32xf32> to vector<8x32x1xf32>
    %218 = tpu.reciprocal %217 {approx = true} : vector<8x32x1xf32> -> vector<8x32x1xf32>
    %219 = vector.broadcast %218 : vector<8x32x1xf32> to vector<8x32x32xf32>
    %220 = arith.mulf %215, %219 : vector<8x32x32xf32>
    %221 = arith.truncf %220 : vector<8x32x32xf32> to vector<8x32x32xbf16>
    "tpu.trace_start"() <{level = 10 : i32, message = "znm,zmd->znd"}> : () -> ()
    %cst_79 = arith.constant dense<0.000000e+00> : vector<8x32x16xf32>
    %222 = tpu.matmul %221, %208, %cst_79 {dimension_numbers = #tpu.dot_dimension_numbers<[2], [1], [1], [2], [0, 0, 0, 1, 1, 2], [0], [0]>} : vector<8x32x32xbf16>, vector<8x32x16xbf16>, vector<8x32x16xf32> -> vector<8x32x16xf32>
    "tpu.trace_stop"() : () -> ()
    %223 = arith.truncf %222 : vector<8x32x16xf32> to vector<8x32x16xbf16>
    %c1_80 = arith.constant 1 : index
    %c0_81 = arith.constant 0 : index
    %c0_82 = arith.constant 0 : index
    %c0_83 = arith.constant 0 : index
    %224 = vector.load %arg6[%c1_80, %c0_81, %c0_82, %c0_83] : memref<2x8x16x32xbf16, #tpu.memory_space<vmem>>, vector<1x8x16x32xbf16>
    %225 = vector.shape_cast %224 : vector<1x8x16x32xbf16> to vector<8x16x32xbf16>
    "tpu.trace_start"() <{level = 10 : i32, message = "znd,zdf->znf"}> : () -> ()
    %cst_84 = arith.constant dense<0.000000e+00> : vector<8x32x32xf32>
    %226 = tpu.matmul %223, %225, %cst_84 {dimension_numbers = #tpu.dot_dimension_numbers<[2], [1], [1], [2], [0, 0, 0, 1, 1, 2], [0], [0]>} : vector<8x32x16xbf16>, vector<8x16x32xbf16>, vector<8x32x32xf32> -> vector<8x32x32xf32>
    "tpu.trace_stop"() : () -> ()
    %227 = vector.shape_cast %226 : vector<8x32x32xf32> to vector<4x2x32x32xf32>
    %cst_85 = arith.constant dense<0.000000e+00> : vector<2x32x32xf32>
    %228 = vector.multi_reduction <add>, %227, %cst_85 [0] : vector<4x2x32x32xf32> to vector<2x32x32xf32>
    %229 = vector.shape_cast %228 : vector<2x32x32xf32> to vector<64x32xf32>
    %230 = vector.extract_strided_slice %171 {offsets = [2, 0], sizes = [1, 32], strides = [1, 1]} : vector<6x32xf32> to vector<1x32xf32>
    %231 = vector.broadcast %230 : vector<1x32xf32> to vector<64x32xf32>
    %232 = arith.addf %229, %231 : vector<64x32xf32>
    %233 = arith.addf %232, %169 : vector<64x32xf32>
    %234 = vector.extract_strided_slice %171 {offsets = [3, 0], sizes = [1, 32], strides = [1, 1]} : vector<6x32xf32> to vector<1x32xf32>
    %235 = vector.extract_strided_slice %171 {offsets = [4, 0], sizes = [1, 32], strides = [1, 1]} : vector<6x32xf32> to vector<1x32xf32>
    %cst_86 = arith.constant dense<0.000000e+00> : vector<64xf32>
    %236 = vector.multi_reduction <add>, %233, %cst_86 [1] : vector<64x32xf32> to vector<64xf32>
    %237 = vector.shape_cast %236 : vector<64xf32> to vector<64x1xf32>
    %cst_87 = arith.constant 3.200000e+01 : f32
    %238 = vector.broadcast %cst_87 : f32 to vector<64x1xf32>
    %239 = arith.divf %237, %238 : vector<64x1xf32>
    %240 = vector.broadcast %239 : vector<64x1xf32> to vector<64x32xf32>
    %241 = arith.subf %233, %240 : vector<64x32xf32>
    %242 = arith.mulf %241, %241 : vector<64x32xf32>
    %cst_88 = arith.constant dense<0.000000e+00> : vector<64xf32>
    %243 = vector.multi_reduction <add>, %242, %cst_88 [1] : vector<64x32xf32> to vector<64xf32>
    %244 = vector.shape_cast %243 : vector<64xf32> to vector<64x1xf32>
    %cst_89 = arith.constant 3.200000e+01 : f32
    %245 = vector.broadcast %cst_89 : f32 to vector<64x1xf32>
    %246 = arith.divf %244, %245 : vector<64x1xf32>
    %247 = vector.broadcast %239 : vector<64x1xf32> to vector<64x32xf32>
    %248 = arith.subf %233, %247 : vector<64x32xf32>
    %cst_90 = arith.constant 9.99999974E-6 : f32
    %249 = vector.broadcast %cst_90 : f32 to vector<64x1xf32>
    %250 = arith.addf %246, %249 : vector<64x1xf32>
    %251 = math.rsqrt %250 : vector<64x1xf32>
    %252 = vector.broadcast %251 : vector<64x1xf32> to vector<64x32xf32>
    %253 = arith.mulf %248, %252 : vector<64x32xf32>
    %254 = vector.broadcast %234 : vector<1x32xf32> to vector<64x32xf32>
    %255 = arith.mulf %253, %254 : vector<64x32xf32>
    %256 = vector.broadcast %235 : vector<1x32xf32> to vector<64x32xf32>
    %257 = arith.addf %255, %256 : vector<64x32xf32>
    %258 = arith.truncf %257 : vector<64x32xf32> to vector<64x32xbf16>
    %c1_91 = arith.constant 1 : index
    %c0_92 = arith.constant 0 : index
    %c0_93 = arith.constant 0 : index
    %259 = vector.load %arg7[%c1_91, %c0_92, %c0_93] : memref<2x32x64xbf16, #tpu.memory_space<vmem>>, vector<1x32x64xbf16>
    %260 = vector.shape_cast %259 : vector<1x32x64xbf16> to vector<32x64xbf16>
    %cst_94 = arith.constant dense<0.000000e+00> : vector<64x64xf32>
    %261 = tpu.matmul %258, %260, %cst_94 {dimension_numbers = #tpu.dot_dimension_numbers<[1], [0], [0], [1], [0, 0, 1, 1], [], []>} : vector<64x32xbf16>, vector<32x64xbf16>, vector<64x64xf32> -> vector<64x64xf32>
    %c1_95 = arith.constant 1 : index
    %c0_96 = arith.constant 0 : index
    %c0_97 = arith.constant 0 : index
    %262 = vector.load %arg10[%c1_95, %c0_96, %c0_97] : memref<2x1x64xf32, #tpu.memory_space<vmem>>, vector<1x1x64xf32>
    %263 = vector.shape_cast %262 : vector<1x1x64xf32> to vector<1x64xf32>
    %264 = vector.broadcast %263 : vector<1x64xf32> to vector<64x64xf32>
    %265 = arith.addf %261, %264 : vector<64x64xf32>
    %cst_98 = arith.constant 5.000000e-01 : f32
    %266 = vector.broadcast %cst_98 : f32 to vector<64x64xf32>
    %267 = arith.mulf %266, %265 : vector<64x64xf32>
    %cst_99 = arith.constant 4.471500e-02 : f32
    %268 = vector.broadcast %cst_99 : f32 to vector<64x64xf32>
    %269 = arith.mulf %268, %265 : vector<64x64xf32>
    %270 = arith.mulf %269, %265 : vector<64x64xf32>
    %271 = arith.mulf %270, %265 : vector<64x64xf32>
    %272 = arith.addf %265, %271 : vector<64x64xf32>
    %cst_100 = arith.constant 0.797884583 : f32
    %273 = vector.broadcast %cst_100 : f32 to vector<64x64xf32>
    %274 = arith.mulf %273, %272 : vector<64x64xf32>
    %275 = math.tanh %274 : vector<64x64xf32>
    %cst_101 = arith.constant 1.000000e+00 : f32
    %276 = vector.broadcast %cst_101 : f32 to vector<64x64xf32>
    %277 = arith.addf %276, %275 : vector<64x64xf32>
    %278 = arith.mulf %267, %277 : vector<64x64xf32>
    %279 = arith.truncf %278 : vector<64x64xf32> to vector<64x64xbf16>
    %c1_102 = arith.constant 1 : index
    %c0_103 = arith.constant 0 : index
    %c0_104 = arith.constant 0 : index
    %280 = vector.load %arg8[%c1_102, %c0_103, %c0_104] : memref<2x64x32xbf16, #tpu.memory_space<vmem>>, vector<1x64x32xbf16>
    %281 = vector.shape_cast %280 : vector<1x64x32xbf16> to vector<64x32xbf16>
    %cst_105 = arith.constant dense<0.000000e+00> : vector<64x32xf32>
    %282 = tpu.matmul %279, %281, %cst_105 {dimension_numbers = #tpu.dot_dimension_numbers<[1], [0], [0], [1], [0, 0, 1, 1], [], []>} : vector<64x64xbf16>, vector<64x32xbf16>, vector<64x32xf32> -> vector<64x32xf32>
    %283 = vector.extract_strided_slice %171 {offsets = [5, 0], sizes = [1, 32], strides = [1, 1]} : vector<6x32xf32> to vector<1x32xf32>
    %284 = vector.broadcast %283 : vector<1x32xf32> to vector<64x32xf32>
    %285 = arith.addf %282, %284 : vector<64x32xf32>
    %286 = arith.addf %285, %233 : vector<64x32xf32>
    %287 = vector.shape_cast %286 : vector<64x32xf32> to vector<2x32x32xf32>
    %c2 = arith.constant 2 : index
    %c0_106 = arith.constant 0 : index
    %c0_107 = arith.constant 0 : index
    %288 = vector.load %arg2[%c2, %c0_106, %c0_107] : memref<3x32x32xf32, #tpu.memory_space<vmem>>, vector<1x32x32xf32>
    %289 = vector.shape_cast %288 : vector<1x32x32xf32> to vector<32x32xf32>
    %290 = vector.shape_cast %289 : vector<32x32xf32> to vector<1x32x32xf32>
    %291 = vector.broadcast %290 : vector<1x32x32xf32> to vector<2x32x32xf32>
    %292 = arith.mulf %287, %291 : vector<2x32x32xf32>
    %cst_108 = arith.constant dense<0.000000e+00> : vector<2x32xf32>
    %293 = vector.multi_reduction <add>, %292, %cst_108 [1] : vector<2x32x32xf32> to vector<2x32xf32>
    %c0_109 = arith.constant 0 : index
    %c0_110 = arith.constant 0 : index
    %294 = vector.load %arg11[%c0_109, %c0_110] : memref<3x32xf32, #tpu.memory_space<vmem>>, vector<1x32xf32>
    %c1_111 = arith.constant 1 : index
    %c0_112 = arith.constant 0 : index
    %295 = vector.load %arg11[%c1_111, %c0_112] : memref<3x32xf32, #tpu.memory_space<vmem>>, vector<1x32xf32>
    %cst_113 = arith.constant dense<0.000000e+00> : vector<2xf32>
    %296 = vector.multi_reduction <add>, %293, %cst_113 [1] : vector<2x32xf32> to vector<2xf32>
    %297 = vector.shape_cast %296 : vector<2xf32> to vector<2x1xf32>
    %cst_114 = arith.constant 3.200000e+01 : f32
    %298 = vector.broadcast %cst_114 : f32 to vector<2x1xf32>
    %299 = arith.divf %297, %298 : vector<2x1xf32>
    %300 = vector.broadcast %299 : vector<2x1xf32> to vector<2x32xf32>
    %301 = arith.subf %293, %300 : vector<2x32xf32>
    %302 = arith.mulf %301, %301 : vector<2x32xf32>
    %cst_115 = arith.constant dense<0.000000e+00> : vector<2xf32>
    %303 = vector.multi_reduction <add>, %302, %cst_115 [1] : vector<2x32xf32> to vector<2xf32>
    %304 = vector.shape_cast %303 : vector<2xf32> to vector<2x1xf32>
    %cst_116 = arith.constant 3.200000e+01 : f32
    %305 = vector.broadcast %cst_116 : f32 to vector<2x1xf32>
    %306 = arith.divf %304, %305 : vector<2x1xf32>
    %307 = vector.broadcast %299 : vector<2x1xf32> to vector<2x32xf32>
    %308 = arith.subf %293, %307 : vector<2x32xf32>
    %cst_117 = arith.constant 9.99999974E-6 : f32
    %309 = vector.broadcast %cst_117 : f32 to vector<2x1xf32>
    %310 = arith.addf %306, %309 : vector<2x1xf32>
    %311 = math.rsqrt %310 : vector<2x1xf32>
    %312 = vector.broadcast %311 : vector<2x1xf32> to vector<2x32xf32>
    %313 = arith.mulf %308, %312 : vector<2x32xf32>
    %314 = vector.broadcast %294 : vector<1x32xf32> to vector<2x32xf32>
    %315 = arith.mulf %313, %314 : vector<2x32xf32>
    %316 = vector.broadcast %295 : vector<1x32xf32> to vector<2x32xf32>
    %317 = arith.addf %315, %316 : vector<2x32xf32>
    %318 = arith.truncf %317 : vector<2x32xf32> to vector<2x32xbf16>
    %c0_118 = arith.constant 0 : index
    %c0_119 = arith.constant 0 : index
    %319 = vector.load %arg12[%c0_118, %c0_119] : memref<32x10xbf16, #tpu.memory_space<vmem>>, vector<32x10xbf16>
    %cst_120 = arith.constant dense<0.000000e+00> : vector<2x10xf32>
    %320 = tpu.matmul %318, %319, %cst_120 {dimension_numbers = #tpu.dot_dimension_numbers<[1], [0], [0], [1], [0, 0, 1, 1], [], []>} : vector<2x32xbf16>, vector<32x10xbf16>, vector<2x10xf32> -> vector<2x10xf32>
    %c2_121 = arith.constant 2 : index
    %c0_122 = arith.constant 0 : index
    %321 = vector.load %arg11[%c2_121, %c0_122] : memref<3x32xf32, #tpu.memory_space<vmem>>, vector<1x10xf32>
    %322 = vector.broadcast %321 : vector<1x10xf32> to vector<2x10xf32>
    %323 = arith.addf %320, %322 : vector<2x10xf32>
    %324 = vector.shape_cast %323 : vector<2x10xf32> to vector<2x1x10xf32>
    %c0_123 = arith.constant 0 : index
    %c0_124 = arith.constant 0 : index
    %c0_125 = arith.constant 0 : index
    %325 = vector.load %arg13[%c0_123, %c0_124, %c0_125] : memref<2x1x10xf32, #tpu.memory_space<vmem>>, vector<2x1x10xf32>
    tpu.vector_store %arg13[%c0_123, %c0_124, %c0_125], %324 {strides = array<i32>} : memref<2x1x10xf32, #tpu.memory_space<vmem>>, vector<2x1x10xf32>,
    return
  }
  func.func @transform_0(%arg0: i32) -> (i32, i32, i32) {
    %c0_i32 = arith.constant 0 : i32
    %c0_i32_0 = arith.constant 0 : i32
    %c0_i32_1 = arith.constant 0 : i32
    return %arg0, %c0_i32, %c0_i32_0 : i32, i32, i32
  }
  func.func @transform_1(%arg0: i32) -> (i32, i32, i32) {
    %c0_i32 = arith.constant 0 : i32
    %c0_i32_0 = arith.constant 0 : i32
    %c0_i32_1 = arith.constant 0 : i32
    %c0_i32_2 = arith.constant 0 : i32
    return %c0_i32, %c0_i32_0, %c0_i32_1 : i32, i32, i32
  }
  func.func @transform_2(%arg0: i32) -> (i32, i32) {
    %c0_i32 = arith.constant 0 : i32
    %c0_i32_0 = arith.constant 0 : i32
    %c0_i32_1 = arith.constant 0 : i32
    return %c0_i32, %c0_i32_0 : i32, i32
  }
  func.func @transform_3(%arg0: i32) -> (i32, i32) {
    %c0_i32 = arith.constant 0 : i32
    %c0_i32_0 = arith.constant 0 : i32
    %c0_i32_1 = arith.constant 0 : i32
    return %c0_i32, %c0_i32_0 : i32, i32
  }
  func.func @transform_4(%arg0: i32) -> (i32, i32, i32, i32) {
    %c0_i32 = arith.constant 0 : i32
    %c0_i32_0 = arith.constant 0 : i32
    %c0_i32_1 = arith.constant 0 : i32
    %c0_i32_2 = arith.constant 0 : i32
    %c0_i32_3 = arith.constant 0 : i32
    return %c0_i32, %c0_i32_0, %c0_i32_1, %c0_i32_2 : i32, i32, i32, i32
  }
  func.func @transform_5(%arg0: i32) -> (i32, i32, i32, i32) {
    %c0_i32 = arith.constant 0 : i32
    %c0_i32_0 = arith.constant 0 : i32
    %c0_i32_1 = arith.constant 0 : i32
    %c0_i32_2 = arith.constant 0 : i32
    %c0_i32_3 = arith.constant 0 : i32
    return %c0_i32, %c0_i32_0, %c0_i32_1, %c0_i32_2 : i32, i32, i32, i32
  }
  func.func @transform_6(%arg0: i32) -> (i32, i32, i32) {
    %c0_i32 = arith.constant 0 : i32
    %c0_i32_0 = arith.constant 0 : i32
    %c0_i32_1 = arith.constant 0 : i32
    %c0_i32_2 = arith.constant 0 : i32
    return %c0_i32, %c0_i32_0, %c0_i32_1 : i32, i32, i32
  }
  func.func @transform_7(%arg0: i32) -> (i32, i32, i32) {
    %c0_i32 = arith.constant 0 : i32
    %c0_i32_0 = arith.constant 0 : i32
    %c0_i32_1 = arith.constant 0 : i32
    %c0_i32_2 = arith.constant 0 : i32
    return %c0_i32, %c0_i32_0, %c0_i32_1 : i32, i32, i32
  }
  func.func @transform_8(%arg0: i32) -> (i32, i32, i32) {
    %c0_i32 = arith.constant 0 : i32
    %c0_i32_0 = arith.constant 0 : i32
    %c0_i32_1 = arith.constant 0 : i32
    %c0_i32_2 = arith.constant 0 : i32
    return %c0_i32, %c0_i32_0, %c0_i32_1 : i32, i32, i32
  }
  func.func @transform_9(%arg0: i32) -> (i32, i32, i32) {
    %c0_i32 = arith.constant 0 : i32
    %c0_i32_0 = arith.constant 0 : i32
    %c0_i32_1 = arith.constant 0 : i32
    %c0_i32_2 = arith.constant 0 : i32
    return %c0_i32, %c0_i32_0, %c0_i32_1 : i32, i32, i32
  }
  func.func @transform_10(%arg0: i32) -> (i32, i32) {
    %c0_i32 = arith.constant 0 : i32
    %c0_i32_0 = arith.constant 0 : i32
    %c0_i32_1 = arith.constant 0 : i32
    return %c0_i32, %c0_i32_0 : i32, i32
  }
  func.func @transform_11(%arg0: i32) -> (i32, i32) {
    %c0_i32 = arith.constant 0 : i32
    %c0_i32_0 = arith.constant 0 : i32
    %c0_i32_1 = arith.constant 0 : i32
    return %c0_i32, %c0_i32_0 : i32, i32
  }
  func.func @transform_12(%arg0: i32) -> (i32, i32, i32) {
    %c0_i32 = arith.constant 0 : i32
    %c0_i32_0 = arith.constant 0 : i32
    %c0_i32_1 = arith.constant 0 : i32
    return %arg0, %c0_i32, %c0_i32_0 : i32, i32, i32
  }
}

</mosaic_0001>

<bundles_post_ra>
// kernel: vit_forward.1
= control target key start
LH: loop header
LB: loop body
LE: loop exit
PB: predicated region body
PF: predicated region fallthrough
CT: control target
= control target key end

     0   :  { %vm62_vm0 = vcmask 916480   ;;  %v8554_v33 = vmov 0   ;;  %s11036_s0 = inlined_call_operand.vmem [shape: f32[2,32,240], index: 0, kind: input, shape index: {}]   ;;  %s11037_s1 = inlined_call_operand.vmem [shape: f32[3,32,32], index: 1, kind: input, shape index: {}]   ;;  %s11038_s2 = inlined_call_operand.vmem [shape: f32[2,240], index: 2, kind: input, shape index: {}]   ;;  %s11039_s3 = inlined_call_operand.vmem [shape: bf16[240,32], index: 3, kind: input, shape index: {}]   ;;  %s11040_s4 = inlined_call_operand.vmem [shape: bf16[2,8,32,48], index: 4, kind: input, shape index: {}]   ;;  %s11041_s5 = inlined_call_operand.vmem [shape: bf16[2,8,16,32], index: 5, kind: input, shape index: {}]   ;;  %s11042_s6 = inlined_call_operand.vmem [shape: bf16[2,32,64], index: 6, kind: input, shape index: {}]   ;;  %s11043_s7 = inlined_call_operand.vmem [shape: bf16[2,64,32], index: 7, kind: input, shape index: {}]   ;;  %s11044_s8 = inlined_call_operand.vmem [shape: f32[2,6,32], index: 8, kind: input, shape index: {}]   ;;  %s11045_s9 = inlined_call_operand.vmem [shape: f32[2,1,64], index: 9, kind: input, shape index: {}]   ;;  %s11046_s10 = inlined_call_operand.vmem [shape: f32[3,32], index: 10, kind: input, shape index: {}]   ;;  %s11047_s11 = inlined_call_operand.vmem [shape: bf16[32,10], index: 11, kind: input, shape index: {}]   ;;  %s11048_s12 = inlined_call_operand.hbm [shape: f32[2,1,10], index: 12, kind: output, shape index: {}]  }
   0x1   :  { %v8631_v0 = vld [vmem:[%s11036_s0] sm:$0xff]  ;;  %v8636_v1 = vld [vmem:[%s11036_s0 + $0x8] sm:$0xff]  ;;  %v8653_v5 = vld [vmem:[%s11036_s0 + $0x10] sm:$0xff]  ;;  %402 = vmatprep.subr.bf16.mxu0 %v8554_v33 }
   0x2   :  { %v8641_v2 = vld [vmem:[%s11036_s0 + $0x20] sm:$0xff]  ;;  %v63_v3 = vsel %vm62_vm0, %v8636_v1, 0.0  ;;  %v8648_v4 = vld [vmem:[%s11036_s0 + $0x28] sm:$0xff]  ;;  %v8658_v6 = vld [vmem:[%s11036_s0 + $0x18] sm:$0xff] }
   0x3   :  { %v64_v7 = vadd.f32 %v63_v3, %v8631_v0  ;;  %v71_v8 = vsel %vm62_vm0, %v8648_v4, 0.0  ;;  %v67_v9 = vsel %vm62_vm0, %v8658_v6, 0.0  ;;  %v8668_v10 = vld [vmem:[%s11036_s0 + $0x30] sm:$0xff]  ;;  %v8673_v11 = vld [vmem:[%s11036_s0 + $0x38] sm:$0xff]  ;;  %v8681_v14 = vld [vmem:[%s11036_s0 + $0x48] sm:$0xff] }
   0x4   :  { %v72_v12 = vadd.f32 %v71_v8, %v8641_v2  ;;  %v75_v13 = vsel %vm62_vm0, %v8673_v11, 0.0  ;;  %v8686_v15 = vld [vmem:[%s11036_s0 + $0x58] sm:$0xff]  ;;  %v68_v16 = vadd.f32 %v67_v9, %v8653_v5  ;;  %v8692_v17 = vld [vmem:[%s11036_s0 + $0x40] sm:$0xff]  ;;  %v79_v18 = vsel %vm62_vm0, %v8681_v14, 0.0  ;;  %v8699_v19 = vld [vmem:[%s11036_s0 + $0x50] sm:$0xff] }
   0x5   :  { %65 = vadd.xlane.f32.xlu0 %v64_v7  ;;  %v8704_v20 = vld [vmem:[%s11036_s0 + $0x68] sm:$0xff]  ;;  %v76_v21 = vadd.f32 %v75_v13, %v8668_v10  ;;  %v83_v22 = vsel %vm62_vm0, %v8686_v15, 0.0  ;;  %v8712_v23 = vld [vmem:[%s11036_s0 + $0x78] sm:$0xff]  ;;  %v8721_v26 = vld [vmem:[%s11036_s0 + $0x60] sm:$0xff]  ;;  %v80_v27 = vadd.f32 %v79_v18, %v8692_v17 }
   0x6   :  { %73 = vadd.xlane.f32.xlu1 %v72_v12  ;;  %v87_v24 = vsel %vm62_vm0, %v8704_v20, 0.0  ;;  %v91_v25 = vsel %vm62_vm0, %v8712_v23, 0.0  ;;  %v8727_v28 = vld [vmem:[%s11036_s0 + $0x70] sm:$0xff]  ;;  %v84_v29 = vadd.f32 %v83_v22, %v8699_v19  ;;  %v8081_v32 = vld [vmem:[%s11039_s3] sm:$0xff]   ;;  %v8082_v34 = vld [vmem:[%s11039_s3 + $0x8] sm:$0xff]  }
   0x7   :  { %v88_v30 = vadd.f32 %v87_v24, %v8721_v26  ;;  %v92_v31 = vadd.f32 %v91_v25, %v8727_v28  ;;  %403 = vmatpush1.bf16.msra.mxu0 %v8081_v32  ;;  %v8083_v35 = vld [vmem:[%s11039_s3 + $0x10] sm:$0xff]   ;;  %v8084_v36 = vld [vmem:[%s11039_s3 + $0x18] sm:$0xff]   ;;  %v8085_v37 = vld [vmem:[%s11039_s3 + $0x20] sm:$0xff]  }
   0x8   :  { %404 = vmatprep.subr.bf16.mxu0 %v8554_v33 }
   0x9   :  { %69 = vadd.xlane.f32.xlu0 %v68_v16 }
   0xa   :  { %77 = vadd.xlane.f32.xlu1 %v76_v21 }
   0xb   :  { %405 = vmatpush1.bf16.msra.mxu0 %v8082_v34 }
   0xc   :  { %406 = vmatprep.subr.bf16.mxu0 %v8554_v33 }
   0xd   :  { %81 = vadd.xlane.f32.xlu0 %v80_v27 }
   0xe   :  { %85 = vadd.xlane.f32.xlu1 %v84_v29 }
   0xf   :  { %407 = vmatpush1.bf16.msra.mxu0 %v8083_v35 }
  0x10   :  { %408 = vmatprep.subr.bf16.mxu0 %v8554_v33 }
  0x11   :  { %89 = vadd.xlane.f32.xlu0 %v88_v30 }
  0x12   :  { %93 = vadd.xlane.f32.xlu1 %v92_v31 }
  0x13   :  { %409 = vmatpush1.bf16.msra.mxu0 %v8084_v36 }
  0x14   :  { %410 = vmatprep.subr.bf16.mxu0 %v8554_v33 }
  0x15   :  { %17 = vsyncpa [#allocation3], 0  ;;  %v8086_v38 = vld [vmem:[%s11039_s3 + $0x28] sm:$0xff]   ;;  %v8087_v39 = vld [vmem:[%s11039_s3 + $0x30] sm:$0xff]   ;;  %vm513_vm1 = vcmask 261120   ;;  %vm1201_vm2 = vcmask 130048  }
  0x16   :  { %v8088_v40 = vld [vmem:[%s11039_s3 + $0x38] sm:$0xff]   ;;  %s8555_s0 = smov 112   ;;  %s8556_s19 = smov 96   ;;  %vm3528_vm12 = vcmask 523264   ;;  %vm6761_vm13 = vcmask 1041409   ;;  %vm6764_vm14 = vcmask 254976  }
  0x17   :  { %411 = vmatpush1.bf16.msra.mxu0 %v8085_v37  ;;  %vm8558_vm15 = vmmov 0   ;;  %s8560_s26 = smov [#allocation2]  }
  0x18   :  { %412 = vmatprep.subr.bf16.mxu0 %v8554_v33 }
  0x1b   :  { %413 = vmatpush1.bf16.msra.mxu0 %v8086_v38 }
  0x1c   :  { %414 = vmatprep.subr.bf16.mxu0 %v8554_v33 }
  0x1f   :  { %415 = vmatpush1.bf16.msra.mxu0 %v8087_v39 }
  0x20   :  { %416 = vmatprep.subr.bf16.mxu0 %v8554_v33 }
  0x23   :  { %417 = vmatpush1.bf16.msra.mxu0 %v8088_v40 }
  0x24   :  { %418 = vmatprep.subr.bf16.mxu0 %v8554_v33 }
  0x92   :  { %v66_v41 = vpop.xlane.xlu0 %65 }
  0x93   :  { %v96_v42 = vmul.f32 0.004166667, %v66_v41  ;;  %v74_v43 = vpop.xlane.xlu1 %73 }
  0x94   :  { %v98_v44 = vmul.f32 0.004166667, %v74_v43  ;;  %v8090_v43 = vld [vmem:[%s11039_s3 + $0x48] sm:$0xff]  }
  0x95   :  { %v8766_v45 = vsub.f32 %v8631_v0, %v96_v42  ;;  %v8769_v46 = vsub.f32 %v8636_v1, %v96_v42  ;;  %v8089_v42 = vld [vmem:[%s11039_s3 + $0x40] sm:$0xff]  }
  0x96   :  { %v8772_v47 = vsub.f32 %v8641_v2, %v98_v44  ;;  %v8775_v48 = vsub.f32 %v8648_v4, %v98_v44  ;;  %v70_v49 = vpop.xlane.xlu0 %69  ;;  %419 = vmatpush1.bf16.msra.mxu0 %v8089_v42  ;;  %v8091_v44 = vld [vmem:[%s11039_s3 + $0x50] sm:$0xff]  }
  0x97   :  { %v97_v50 = vmul.f32 0.004166667, %v70_v49  ;;  %v78_v51 = vpop.xlane.xlu1 %77  ;;  %v120_v52 = vmul.f32 %v8766_v45, %v8766_v45  ;;  %v121_v53 = vmul.f32 %v8769_v46, %v8769_v46  ;;  %420 = vmatprep.subr.bf16.mxu0 %v8554_v33  ;;  %v8092_v49 = vld [vmem:[%s11039_s3 + $0x58] sm:$0xff]  }
  0x98   :  { %v99_v54 = vmul.f32 0.004166667, %v78_v51  ;;  %v124_v55 = vmul.f32 %v8772_v47, %v8772_v47  ;;  %v125_v56 = vmul.f32 %v8775_v48, %v8775_v48  ;;  %v8094_v51 = vld [vmem:[%s11039_s3 + $0x68] sm:$0xff]  }
  0x99   :  { %v8786_v57 = vsub.f32 %v8653_v5, %v97_v50  ;;  %v8789_v58 = vsub.f32 %v8658_v6, %v97_v50  ;;  %v136_v59 = vsel %vm62_vm0, %v121_v53, 0.0  ;;  %v8093_v50 = vld [vmem:[%s11039_s3 + $0x60] sm:$0xff]  }
  0x9a   :  { %v8793_v60 = vsub.f32 %v8668_v10, %v99_v54  ;;  %v8796_v61 = vsub.f32 %v8673_v11, %v99_v54  ;;  %v82_v62 = vpop.xlane.xlu0 %81  ;;  %v137_v63 = vadd.f32 %v136_v59, %v120_v52  ;;  %v144_v0 = vsel %vm62_vm0, %v125_v56, 0.0  ;;  %421 = vmatpush1.bf16.msra.mxu0 %v8090_v43  ;;  %v8095_v52 = vld [vmem:[%s11039_s3 + $0x70] sm:$0xff]  }
  0x9b   :  { %v100_v1 = vmul.f32 0.004166667, %v82_v62  ;;  %v86_v2 = vpop.xlane.xlu1 %85  ;;  %v122_v3 = vmul.f32 %v8786_v57, %v8786_v57  ;;  %v123_v4 = vmul.f32 %v8789_v58, %v8789_v58  ;;  %v145_v6 = vadd.f32 %v144_v0, %v124_v55  ;;  %422 = vmatprep.subr.bf16.mxu0 %v8554_v33 }
  0x9c   :  { %138 = vadd.xlane.f32.xlu0 %v137_v63  ;;  %v101_v5 = vmul.f32 0.004166667, %v86_v2  ;;  %v126_v7 = vmul.f32 %v8793_v60, %v8793_v60  ;;  %v127_v8 = vmul.f32 %v8796_v61, %v8796_v61  ;;  %v209_v56 = vlaneseq }
  0x9d   :  { %v8808_v9 = vsub.f32 %v8692_v17, %v100_v1  ;;  %v8811_v10 = vsub.f32 %v8681_v14, %v100_v1  ;;  %v140_v11 = vsel %vm62_vm0, %v123_v4, 0.0 }
  0x9e   :  { %v8815_v12 = vsub.f32 %v8699_v19, %v101_v5  ;;  %v8818_v13 = vsub.f32 %v8686_v15, %v101_v5  ;;  %v90_v16 = vpop.xlane.xlu0 %89  ;;  %v141_v18 = vadd.f32 %v140_v11, %v122_v3  ;;  %v148_v21 = vsel %vm62_vm0, %v127_v8, 0.0  ;;  %423 = vmatpush1.bf16.msra.mxu0 %v8091_v44 }
  0x9f   :  { %v102_v22 = vmul.f32 0.004166667, %v90_v16  ;;  %v94_v24 = vpop.xlane.xlu1 %93  ;;  %v128_v17 = vmul.f32 %v8808_v9, %v8808_v9  ;;  %v129_v14 = vmul.f32 %v8811_v10, %v8811_v10  ;;  %v149_v19 = vadd.f32 %v148_v21, %v126_v7  ;;  %424 = vmatprep.subr.bf16.mxu0 %v8554_v33 }
  0xa0   :  { %146 = vadd.xlane.f32.xlu0 %v145_v6  ;;  %142 = vadd.xlane.f32.xlu1 %v141_v18  ;;  %v103_v25 = vmul.f32 0.004166667, %v94_v24  ;;  %v130_v15 = vmul.f32 %v8815_v12, %v8815_v12  ;;  %v131_v27 = vmul.f32 %v8818_v13, %v8818_v13  ;;  %v8881_v3 = vshrl.u32 %v209_v56, 7 }
  0xa1   :  { %v8830_v29 = vsub.f32 %v8721_v26, %v102_v22  ;;  %v8833_v30 = vsub.f32 %v8704_v20, %v102_v22  ;;  %v152_v31 = vsel %vm62_vm0, %v129_v14, 0.0  ;;  %v59_v22 = vld [vmem:[%s11038_s2] ss:$2 sm:$0x3] }
  0xa2   :  { %v8837_v32 = vsub.f32 %v8727_v28, %v103_v25  ;;  %v8840_v34 = vsub.f32 %v8712_v23, %v103_v25  ;;  %v153_v35 = vadd.f32 %v152_v31, %v128_v17  ;;  %v156_v36 = vsel %vm62_vm0, %v131_v27, 0.0  ;;  %425 = vmatpush1.bf16.msra.mxu0 %v8092_v49 }
  0xa3   :  { %v132_v37 = vmul.f32 %v8830_v29, %v8830_v29  ;;  %v133_v26 = vmul.f32 %v8833_v30, %v8833_v30  ;;  %v157_v20 = vadd.f32 %v156_v36, %v130_v15  ;;  %426 = vmatprep.subr.bf16.mxu0 %v8554_v33  ;;  %v8884_v11 = vsub.s32 0, %v8881_v3 }
  0xa4   :  { %150 = vadd.xlane.f32.xlu1 %v149_v19  ;;  %154 = vadd.xlane.f32.xlu0 %v153_v35  ;;  %v134_v38 = vmul.f32 %v8837_v32, %v8837_v32  ;;  %v135_v28 = vmul.f32 %v8840_v34, %v8840_v34  ;;  %v8887_v16 = vsub.s32 1, %v8881_v3  ;;  %v6923_v19 = vld [vmem:[%s11038_s2 + $0x1] ss:$2 sm:$0x3] }
  0xa5   :  { %v160_v23 = vsel %vm62_vm0, %v133_v26, 0.0  ;;  %11071 = vst [vmem:[#allocation5_spill] sm:$0xff] %v8884_v11  ;;  %v8896_v15 = vrot.slane %v59_v22, %v8884_v11 }
  0xa6   :  { %v161_v39 = vadd.f32 %v160_v23, %v132_v37  ;;  %v164_v40 = vsel %vm62_vm0, %v135_v28, 0.0  ;;  %427 = vmatpush1.bf16.msra.mxu0 %v8093_v50  ;;  %11072 = vst [vmem:[#allocation6_spill] sm:$0xff] %v8887_v16  ;;  %v8899_v27 = vrot.slane %v59_v22, %v8887_v16 }
  0xa7   :  { %v165_v41 = vadd.f32 %v164_v40, %v134_v38  ;;  %428 = vmatprep.subr.bf16.mxu0 %v8554_v33 }
  0xa8   :  { %158 = vadd.xlane.f32.xlu1 %v157_v20  ;;  %162 = vadd.xlane.f32.xlu0 %v161_v39  ;;  %v8904_v20 = vrot.slane %v6923_v19, %v8884_v11  ;;  %v243_v39 = vrot.slane %v6923_v19, %v8887_v16 }
  0xaa   :  { %429 = vmatpush1.bf16.msra.mxu0 %v8094_v51 }
  0xab   :  { %430 = vmatprep.subr.bf16.mxu0 %v8554_v33 }
  0xac   :  { %166 = vadd.xlane.f32.xlu1 %v165_v41 }
  0xae   :  { %431 = vmatpush1.bf16.msra.mxu0 %v8095_v52 }
 0x129   :  { %v139_v53 = vpop.xlane.xlu0 %138 }
 0x12a   :  { %v168_v54 = vmul.f32 0.004166667, %v139_v53 }
 0x12c   :  { %v176_v55 = vadd.f32 1e-05, %v168_v54 }
 0x12d   :  { %v143_v59 = vpop.xlane.xlu1 %142  ;;  %v147_v62 = vpop.xlane.xlu0 %146 }
 0x12e   :  { %8158 = vrsqrt.f32 %v176_v55  ;;  %v169_v63 = vmul.f32 0.004166667, %v143_v59  ;;  %v170_v0 = vmul.f32 0.004166667, %v147_v62 }
 0x130   :  { %v177_v1 = vadd.f32 1e-05, %v169_v63  ;;  %v178_v2 = vadd.f32 1e-05, %v170_v0 }
 0x131   :  { %v151_v4 = vpop.xlane.xlu1 %150  ;;  %v155_v5 = vpop.xlane.xlu0 %154 }
 0x132   :  { %8160 = vrsqrt.f32 %v177_v1  ;;  %v171_v6 = vmul.f32 0.004166667, %v151_v4  ;;  %v172_v33 = vmul.f32 0.004166667, %v155_v5 }
 0x133   :  { %8162 = vrsqrt.f32 %v178_v2 }
 0x134   :  { %v179_v7 = vadd.f32 1e-05, %v171_v6  ;;  %v180_v8 = vadd.f32 1e-05, %v172_v33 }
 0x135   :  { %v159_v18 = vpop.xlane.xlu1 %158  ;;  %v163_v21 = vpop.xlane.xlu0 %162 }
 0x136   :  { %8164 = vrsqrt.f32 %v179_v7  ;;  %v173_v24 = vmul.f32 0.004166667, %v159_v18  ;;  %v174_v17 = vmul.f32 0.004166667, %v163_v21 }
 0x137   :  { %8166 = vrsqrt.f32 %v180_v8 }
 0x138   :  { %v8159_v14 = vpop.eup %8158  ;;  %v181_v25 = vadd.f32 1e-05, %v173_v24  ;;  %v182_v31 = vadd.f32 1e-05, %v174_v17 }
 0x139   :  { %v167_v35 = vpop.xlane.xlu1 %166  ;;  %v193_v36 = vmul.f32 %v8159_v14, %v8769_v46  ;;  %v192_v37 = vmul.f32 %v8159_v14, %v8766_v45 }
 0x13a   :  { %8168 = vrsqrt.f32 %v181_v25  ;;  %v175_v26 = vmul.f32 0.004166667, %v167_v35 }
 0x13b   :  { %v220_v23 = vmul.f32 %v8899_v27, %v193_v36  ;;  %v219_v40 = vmul.f32 %v8896_v15, %v192_v37  ;;  %8170 = vrsqrt.f32 %v182_v31 }
 0x13c   :  { %v8161_v38 = vpop.eup %8160  ;;  %v183_v28 = vadd.f32 1e-05, %v175_v26 }
 0x13d   :  { %v8163_v41 = vpop.eup %8162  ;;  %v195_v42 = vmul.f32 %v8161_v38, %v8789_v58  ;;  %v194_v46 = vmul.f32 %v8161_v38, %v8786_v57  ;;  %v247_v50 = vadd.f32 %v243_v39, %v220_v23  ;;  %v246_v51 = vadd.f32 %v8904_v20, %v219_v40 }
 0x13e   :  { %8172 = vrsqrt.f32 %v183_v28  ;;  %v197_v45 = vmul.f32 %v8163_v41, %v8775_v48  ;;  %v196_v48 = vmul.f32 %v8163_v41, %v8772_v47 }
 0x13f   :  { %v222_v43 = vmul.f32 %v8899_v27, %v195_v42  ;;  %v221_v44 = vmul.f32 %v8896_v15, %v194_v46  ;;  %v6943_v46 = vld [vmem:[%s11037_s1 + $0x20] sm:$0xff] }
 0x140   :  { %v8165_v49 = vpop.eup %8164  ;;  %v224_v52 = vmul.f32 %v8899_v27, %v197_v45 }
 0x141   :  { %v8167_v53 = vpop.eup %8166  ;;  %v249_v54 = vadd.f32 %v243_v39, %v222_v43  ;;  %v248_v55 = vadd.f32 %v8904_v20, %v221_v44  ;;  %v199_v58 = vmul.f32 %v8165_v49, %v8796_v61  ;;  %v198_v57 = vmul.f32 %v8165_v49, %v8793_v60 }
 0x142   :  { %v201_v0 = vmul.f32 %v8167_v53, %v8811_v10  ;;  %v251_v4 = vadd.f32 %v243_v39, %v224_v52  ;;  %v223_v60 = vmul.f32 %v8896_v15, %v196_v48  ;;  %v200_v24 = vmul.f32 %v8167_v53, %v8808_v9  ;;  %v470_v48 = vld [vmem:[%s11037_s1 + $0x18] sm:$0xff] }
 0x143   :  { %v263_v59 = vpack.c.bf16 %v249_v54, %v247_v50  ;;  %v262_v62 = vpack.c.bf16 %v248_v55, %v246_v51  ;;  %v226_v63 = vmul.f32 %v8899_v27, %v199_v58  ;;  %v225_v2 = vmul.f32 %v8896_v15, %v198_v57  ;;  %v469_v54 = vld [vmem:[%s11037_s1 + $0x10] sm:$0xff] }
 0x144   :  { %v8169_v1 = vpop.eup %8168  ;;  %v228_v33 = vmul.f32 %v8899_v27, %v201_v0  ;;  %v6945_v57 = vld [vmem:[%s11037_s1 + $0x30] sm:$0xff]  ;;  %v6946_v0 = vld [vmem:[%s11037_s1 + $0x38] sm:$0xff] }
 0x145   :  { %6939 = vmatprep.mubr.msk.bf16.mxu0 %vm62_vm0, %v263_v59  ;;  %v253_v5 = vadd.f32 %v243_v39, %v226_v63  ;;  %v203_v6 = vmul.f32 %v8169_v1, %v8818_v13  ;;  %v8171_v61 = vpop.eup %8170  ;;  %v252_v10 = vadd.f32 %v8904_v20, %v225_v2  ;;  %v202_v18 = vmul.f32 %v8169_v1, %v8815_v12 }
 0x146   :  { %435 = vmatmul.mubr.bf16.vlgmr.msra.gmra.mrb[0].mxu0 %v262_v62  ;;  %v250_v13 = vadd.f32 %v8904_v20, %v223_v60  ;;  %v255_v17 = vadd.f32 %v243_v39, %v228_v33  ;;  %v205_v14 = vmul.f32 %v8171_v61, %v8833_v30  ;;  %v227_v12 = vmul.f32 %v8896_v15, %v200_v24 }
 0x147   :  { %v265_v47 = vpack.c.bf16 %v253_v5, %v251_v4  ;;  %v230_v7 = vmul.f32 %v8899_v27, %v203_v6  ;;  %v229_v19 = vmul.f32 %v8896_v15, %v202_v18  ;;  %v204_v26 = vmul.f32 %v8171_v61, %v8830_v29  ;;  %v467_v29 = vld [vmem:[%s11037_s1] sm:$0xff] }
 0x148   :  { %v8173_v8 = vpop.eup %8172  ;;  %v264_v25 = vpack.c.bf16 %v252_v10, %v250_v13  ;;  %v254_v30 = vadd.f32 %v8904_v20, %v227_v12 }
 0x149   :  { %6940 = vmatprep.mubr.msk.bf16.mxu0 %vm62_vm0, %v265_v47  ;;  %v257_v21 = vadd.f32 %v243_v39, %v230_v7  ;;  %v207_v22 = vmul.f32 %v8173_v8, %v8840_v34  ;;  %v232_v34 = vmul.f32 %v8899_v27, %v205_v14  ;;  %v256_v36 = vadd.f32 %v8904_v20, %v229_v19 }
 0x14a   :  { %v206_v9 = vmul.f32 %v8173_v8, %v8837_v32  ;;  %v231_v41 = vmul.f32 %v8896_v15, %v204_v26 }
 0x14b   :  { %v267_v31 = vpack.c.bf16 %v257_v21, %v255_v17  ;;  %v234_v35 = vmul.f32 %v8899_v27, %v207_v22  ;;  %v259_v38 = vadd.f32 %v243_v39, %v232_v34  ;;  %v266_v28 = vpack.c.bf16 %v256_v36, %v254_v30 }
 0x14c   :  { %v233_v23 = vmul.f32 %v8896_v15, %v206_v9  ;;  %v258_v42 = vadd.f32 %v8904_v20, %v231_v41  ;;  %v468_v15 = vld [vmem:[%s11037_s1 + $0x8] sm:$0xff] }
 0x14d   :  { %v261_v37 = vadd.f32 %v243_v39, %v234_v35 }
 0x14e   :  { %443 = vmatmul.mubr.bf16.gmra.mrb[4].mxu0 %v264_v25  ;;  %v260_v27 = vadd.f32 %v8904_v20, %v233_v23  ;;  %v6944_v20 = vld [vmem:[%s11037_s1 + $0x28] sm:$0xff] }
 0x14f   :  { %6941 = vmatprep.mubr.msk.bf16.mxu0 %vm62_vm0, %v267_v31  ;;  %v269_v40 = vpack.c.bf16 %v261_v37, %v259_v38 }
 0x150   :  { %v268_v32 = vpack.c.bf16 %v260_v27, %v258_v42 }
 0x156   :  { %451 = vmatmul.mubr.bf16.gmra.mrb[8].mxu0 %v266_v28 }
 0x157   :  { %6942 = vmatprep.mubr.msk.bf16.mxu0 %vm62_vm0, %v269_v40  ;;  %vm6904_vm0 = vcmask 73728  }
 0x15e   :  { %459 = vmatmul.mubr.bf16.gmra.mrb[12].mxu0 %v268_v32 }
 0x219   :  { %v436_v39 = vpop.f32.mrb[0].mxu0 }
 0x21a   :  { %v471_v45 = vmul.f32 %v467_v29, %v436_v39  ;;  %v438_v43 = vpop.f32.mrb[1].mxu0 }
 0x21b   :  { %v439_v44 = vpop.f32.mrb[2].mxu0 }
 0x21c   :  { %v8961_v49 = vadd.f32 %v6943_v46, %v471_v45  ;;  %v472_v50 = vmul.f32 %v468_v15, %v439_v44  ;;  %v441_v51 = vpop.f32.mrb[3].mxu0 }
 0x21e   :  { %v8963_v52 = vadd.f32 %v6944_v20, %v472_v50  ;;  %v514_v53 = vsel %vm513_vm1, %v8961_v49, 0.0 }
 0x21f   :  { %515 = vadd.xlane.f32.xlu0 %v514_v53 }
 0x220   :  { %v517_v55 = vsel %vm513_vm1, %v8963_v52, 0.0 }
 0x221   :  { %518 = vadd.xlane.f32.xlu1 %v517_v55  ;;  %v444_v58 = vpop.f32.mrb[4].mxu0 }
 0x222   :  { %v473_v59 = vmul.f32 %v469_v54, %v444_v58  ;;  %v446_v62 = vpop.f32.mrb[5].mxu0 }
 0x223   :  { %v447_v63 = vpop.f32.mrb[6].mxu0 }
 0x224   :  { %v8981_v1 = vadd.f32 %v6945_v57, %v473_v59  ;;  %v474_v2 = vmul.f32 %v470_v48, %v447_v63  ;;  %v449_v4 = vpop.f32.mrb[7].mxu0 }
 0x226   :  { %v8983_v5 = vadd.f32 %v6946_v0, %v474_v2  ;;  %v520_v6 = vsel %vm513_vm1, %v8981_v1, 0.0 }
 0x227   :  { %521 = vadd.xlane.f32.xlu0 %v520_v6 }
 0x228   :  { %v523_v60 = vsel %vm513_vm1, %v8983_v5, 0.0 }
 0x229   :  { %524 = vadd.xlane.f32.xlu1 %v523_v60  ;;  %v452_v61 = vpop.f32.mrb[8].mxu0 }
 0x22a   :  { %v475_v47 = vmul.f32 %v467_v29, %v452_v61  ;;  %v454_v33 = vpop.f32.mrb[9].mxu0 }
 0x22b   :  { %v455_v7 = vpop.f32.mrb[10].mxu0 }
 0x22c   :  { %v8989_v8 = vadd.f32 %v6943_v46, %v475_v47  ;;  %v476_v10 = vmul.f32 %v468_v15, %v455_v7  ;;  %v457_v18 = vpop.f32.mrb[11].mxu0 }
 0x22d   :  { %v8097_v18 = vld [vmem:[%s11040_s4 + $0x8] sm:$0xff]  }
 0x22e   :  { %11073 = vst [vmem:[#allocation7_spill] sm:$0xff] %v8989_v8  ;;  %v8991_v21 = vadd.f32 %v6944_v20, %v476_v10  ;;  %v526_v22 = vsel %vm513_vm1, %v8989_v8, 0.0  ;;  %v8096_v10 = vld [vmem:[%s11040_s4] sm:$0xff]  }
 0x22f   :  { %527 = vadd.xlane.f32.xlu0 %v526_v22  ;;  %7496 = vmatprep.subr.bf16.mxu1 %v8096_v10  ;;  %v9062_v22 = vld [vmem:[%s11040_s4 + $0x10] sm:$0xff]  }
 0x230   :  { %v529_v13 = vsel %vm513_vm1, %v8991_v21, 0.0  ;;  %7497 = vmatpush3.bf16.msra.mxu1 %v8096_v10 }
 0x231   :  { %530 = vadd.xlane.f32.xlu1 %v529_v13  ;;  %v460_v24 = vpop.f32.mrb[12].mxu0  ;;  %7498 = vmatprep.subr.bf16.mxu1 %v8097_v18 }
 0x232   :  { %v477_v17 = vmul.f32 %v469_v54, %v460_v24  ;;  %v462_v14 = vpop.f32.mrb[13].mxu0 }
 0x233   :  { %v463_v25 = vpop.f32.mrb[14].mxu0 }
 0x234   :  { %v8997_v19 = vadd.f32 %v6945_v57, %v477_v17  ;;  %v478_v31 = vmul.f32 %v470_v48, %v463_v25  ;;  %v465_v35 = vpop.f32.mrb[15].mxu0  ;;  %7499 = vmatpush3.bf16.msra.mxu1 %v8097_v18 }
 0x235   :  { %7504 = vmatprep.subr.bf16.mxu1 %v9062_v22 }
 0x236   :  { %11074 = vst [vmem:[#allocation8_spill] sm:$0xff] %v8997_v19  ;;  %v8999_v12 = vadd.f32 %v6946_v0, %v478_v31  ;;  %v532_v34 = vsel %vm513_vm1, %v8997_v19, 0.0 }
 0x237   :  { %533 = vadd.xlane.f32.xlu0 %v532_v34 }
 0x238   :  { %v535_v36 = vsel %vm513_vm1, %v8999_v12, 0.0 }
 0x239   :  { %536 = vadd.xlane.f32.xlu1 %v535_v36 }
 0x2ac   :  { %v516_v9 = vpop.xlane.xlu0 %515 }
 0x2ad   :  { %v539_v37 = vmul.f32 0.03125, %v516_v9 }
 0x2ae   :  { %v519_v30 = vpop.xlane.xlu1 %518 }
 0x2af   :  { %v9006_v26 = vsub.f32 %v8961_v49, %v539_v37  ;;  %v540_v38 = vmul.f32 0.03125, %v519_v30  ;;  %v512_v30 = vld [vmem:[%s11044_s8] sm:$0x3f] }
 0x2b1   :  { %v9009_v28 = vsub.f32 %v8963_v52, %v540_v38  ;;  %v555_v23 = vmul.f32 %v9006_v26, %v9006_v26 }
 0x2b3   :  { %v563_v40 = vsel %vm513_vm1, %v555_v23, 0.0  ;;  %v556_v41 = vmul.f32 %v9009_v28, %v9009_v28  ;;  %v622_v23 = vrot.slane %v512_v30, %v8884_v11 }
 0x2b4   :  { %564 = vadd.xlane.f32.xlu0 %v563_v40  ;;  %v522_v27 = vpop.xlane.xlu0 %521 }
 0x2b5   :  { %v541_v42 = vmul.f32 0.03125, %v522_v27  ;;  %v566_v32 = vsel %vm513_vm1, %v556_v41, 0.0 }
 0x2b6   :  { %v525_v29 = vpop.xlane.xlu1 %524  ;;  %567 = vadd.xlane.f32.xlu1 %v566_v32 }
 0x2b7   :  { %v9018_v39 = vsub.f32 %v8981_v1, %v541_v42  ;;  %v542_v46 = vmul.f32 0.03125, %v525_v29 }
 0x2b9   :  { %v9021_v15 = vsub.f32 %v8983_v5, %v542_v46  ;;  %v557_v45 = vmul.f32 %v9018_v39, %v9018_v39 }
 0x2bb   :  { %v569_v43 = vsel %vm513_vm1, %v557_v45, 0.0  ;;  %v558_v44 = vmul.f32 %v9021_v15, %v9021_v15 }
 0x2bc   :  { %570 = vadd.xlane.f32.xlu0 %v569_v43  ;;  %v528_v20 = vpop.xlane.xlu0 %527  ;;  %v634_v43 = vrot.slane %v512_v30, %v8887_v16 }
 0x2bd   :  { %v543_v50 = vmul.f32 0.03125, %v528_v20  ;;  %v572_v51 = vsel %vm513_vm1, %v558_v44, 0.0 }
 0x2be   :  { %v531_v53 = vpop.xlane.xlu1 %530  ;;  %573 = vadd.xlane.f32.xlu1 %v572_v51 }
 0x2bf   :  { %v9030_v54 = vsub.f32 %v8989_v8, %v543_v50  ;;  %v544_v55 = vmul.f32 0.03125, %v531_v53 }
 0x2c1   :  { %v9033_v58 = vsub.f32 %v8991_v21, %v544_v55  ;;  %v559_v57 = vmul.f32 %v9030_v54, %v9030_v54 }
 0x2c3   :  { %v575_v48 = vsel %vm513_vm1, %v559_v57, 0.0  ;;  %v560_v59 = vmul.f32 %v9033_v58, %v9033_v58 }
 0x2c4   :  { %576 = vadd.xlane.f32.xlu0 %v575_v48  ;;  %v534_v62 = vpop.xlane.xlu0 %533 }
 0x2c5   :  { %v545_v63 = vmul.f32 0.03125, %v534_v62  ;;  %v578_v0 = vsel %vm513_vm1, %v560_v59, 0.0 }
 0x2c6   :  { %579 = vadd.xlane.f32.xlu1 %v578_v0  ;;  %v537_v2 = vpop.xlane.xlu1 %536 }
 0x2c7   :  { %v9042_v4 = vsub.f32 %v8997_v19, %v545_v63  ;;  %v546_v6 = vmul.f32 0.03125, %v537_v2 }
 0x2c9   :  { %v9045_v60 = vsub.f32 %v8999_v12, %v546_v6  ;;  %v561_v61 = vmul.f32 %v9042_v4, %v9042_v4 }
 0x2cb   :  { %v581_v47 = vsel %vm513_vm1, %v561_v61, 0.0  ;;  %v562_v33 = vmul.f32 %v9045_v60, %v9045_v60 }
 0x2cc   :  { %582 = vadd.xlane.f32.xlu0 %v581_v47 }
 0x2cd   :  { %v584_v7 = vsel %vm513_vm1, %v562_v33, 0.0 }
 0x2ce   :  { %585 = vadd.xlane.f32.xlu1 %v584_v7 }
 0x341   :  { %v565_v13 = vpop.xlane.xlu0 %564 }
 0x342   :  { %v587_v24 = vmul.f32 0.03125, %v565_v13 }
 0x343   :  { %v568_v17 = vpop.xlane.xlu1 %567 }
 0x344   :  { %v595_v14 = vadd.f32 1e-05, %v587_v24  ;;  %v588_v25 = vmul.f32 0.03125, %v568_v17  ;;  %v8099_v24 = vld [vmem:[%s11040_s4 + $0x18] sm:$0xff]  }
 0x346   :  { %8174 = vrsqrt.f32 %v595_v14  ;;  %v596_v31 = vadd.f32 1e-05, %v588_v25 }
 0x348   :  { %8176 = vrsqrt.f32 %v596_v31  ;;  %v8100_v31 = vld [vmem:[%s11040_s4 + $0x20] sm:$0xff]  }
 0x349   :  { %v571_v35 = vpop.xlane.xlu0 %570 }
 0x34a   :  { %v589_v34 = vmul.f32 0.03125, %v571_v35 }
 0x34b   :  { %v574_v36 = vpop.xlane.xlu1 %573 }
 0x34c   :  { %v597_v9 = vadd.f32 1e-05, %v589_v34  ;;  %v590_v37 = vmul.f32 0.03125, %v574_v36 }
 0x34e   :  { %8178 = vrsqrt.f32 %v597_v9  ;;  %v598_v38 = vadd.f32 1e-05, %v590_v37 }
 0x350   :  { %v8175_v40 = vpop.eup %8174  ;;  %8180 = vrsqrt.f32 %v598_v38 }
 0x351   :  { %v577_v41 = vpop.xlane.xlu0 %576  ;;  %v611_v27 = vmul.f32 %v8175_v40, %v9006_v26 }
 0x352   :  { %v8177_v42 = vpop.eup %8176  ;;  %v591_v32 = vmul.f32 0.03125, %v577_v41 }
 0x353   :  { %v580_v29 = vpop.xlane.xlu1 %579  ;;  %v612_v46 = vmul.f32 %v8177_v42, %v9009_v28  ;;  %v623_v45 = vmul.f32 %v622_v23, %v611_v27  ;;  %v8101_v27 = vld [vmem:[%s11040_s4 + $0x28] sm:$0xff]  }
 0x354   :  { %v599_v44 = vadd.f32 1e-05, %v591_v32  ;;  %v592_v20 = vmul.f32 0.03125, %v580_v29  ;;  %v8105_v42 = vld [vmem:[%s11040_s4 + $0x48] sm:$0xff]   ;;  %v8106_v32 = vld [vmem:[%s11040_s4 + $0x50] sm:$0xff]   ;;  %v8107_v29 = vld [vmem:[%s11040_s4 + $0x58] sm:$0xff]  }
 0x355   :  { %v624_v50 = vmul.f32 %v622_v23, %v612_v46  ;;  %v635_v53 = vadd.f32 %v634_v43, %v623_v45  ;;  %v8108_v46 = vld [vmem:[%s11040_s4 + $0x60] sm:$0xff]   ;;  %v8109_v45 = vld [vmem:[%s11040_s4 + $0x68] sm:$0xff]  }
 0x356   :  { %8182 = vrsqrt.f32 %v599_v44  ;;  %v600_v51 = vadd.f32 1e-05, %v592_v20  ;;  %v8111_v44 = vld [vmem:[%s11040_s4 + $0x78] sm:$0xff]  }
 0x357   :  { %v636_v55 = vadd.f32 %v634_v43, %v624_v50 }
 0x358   :  { %v8179_v57 = vpop.eup %8178  ;;  %8184 = vrsqrt.f32 %v600_v51 }
 0x359   :  { %v583_v48 = vpop.xlane.xlu0 %582  ;;  %v9072_v59 = vpack.c.bf16 %v636_v55, %v635_v53  ;;  %v613_v26 = vmul.f32 %v8179_v57, %v9018_v39 }
 0x35a   :  { %v8181_v62 = vpop.eup %8180  ;;  %v593_v63 = vmul.f32 0.03125, %v583_v48 }
 0x35b   :  { %v586_v28 = vpop.xlane.xlu1 %585  ;;  %7500 = vmatprep.mubr.msk.bf16.mxu1 %vm513_vm1, %v9072_v59  ;;  %v614_v0 = vmul.f32 %v8181_v62, %v9021_v15  ;;  %v625_v2 = vmul.f32 %v622_v23, %v613_v26 }
 0x35c   :  { %v601_v6 = vadd.f32 1e-05, %v593_v63  ;;  %v594_v61 = vmul.f32 0.03125, %v586_v28 }
 0x35d   :  { %v626_v47 = vmul.f32 %v622_v23, %v614_v0  ;;  %v637_v7 = vadd.f32 %v634_v43, %v625_v2 }
 0x35e   :  { %8186 = vrsqrt.f32 %v601_v6  ;;  %v602_v33 = vadd.f32 1e-05, %v594_v61 }
 0x35f   :  { %v638_v10 = vadd.f32 %v634_v43, %v626_v47 }
 0x360   :  { %v8183_v18 = vpop.eup %8182  ;;  %8188 = vrsqrt.f32 %v602_v33 }
 0x361   :  { %v9078_v13 = vpack.c.bf16 %v638_v10, %v637_v7  ;;  %v615_v39 = vmul.f32 %v8183_v18, %v9030_v54 }
 0x362   :  { %v8185_v17 = vpop.eup %8184 }
 0x363   :  { %7501 = vmatmul.mubr.msk.bf16.vlgmr.msra.gmra.mrb[0].mxu1 %vm513_vm1, %v9078_v13  ;;  %v616_v15 = vmul.f32 %v8185_v17, %v9033_v58  ;;  %v627_v14 = vmul.f32 %v622_v23, %v615_v39 }
 0x364   :  { %7505 = vmatpush3.bf16.msra.mxu1 %v9062_v22 }
 0x365   :  { %v628_v25 = vmul.f32 %v622_v23, %v616_v15  ;;  %7506 = vmatprep.subr.bf16.mxu1 %v8099_v24  ;;  %v639_v54 = vadd.f32 %v634_v43, %v627_v14 }
 0x367   :  { %v640_v35 = vadd.f32 %v634_v43, %v628_v25 }
 0x368   :  { %v8187_v34 = vpop.eup %8186  ;;  %7507 = vmatpush3.bf16.msra.mxu1 %v8099_v24 }
 0x369   :  { %v617_v36 = vmul.f32 %v8187_v34, %v9042_v4  ;;  %v645_v9 = vpack.c.bf16 %v640_v35, %v639_v54  ;;  %7512 = vmatprep.subr.bf16.mxu1 %v8100_v31  ;;  %v8102_v4 = vld [vmem:[%s11040_s4 + $0x30] sm:$0xff]  }
 0x36a   :  { %v8189_v37 = vpop.eup %8188 }
 0x36b   :  { %v629_v30 = vmul.f32 %v622_v23, %v617_v36  ;;  %v618_v58 = vmul.f32 %v8189_v37, %v9045_v60  ;;  %7508 = vmatprep.mubr.msk.bf16.mxu1 %vm513_vm1, %v645_v9  ;;  %v8103_v60 = vld [vmem:[%s11040_s4 + $0x38] sm:$0xff]  }
 0x36d   :  { %v630_v22 = vmul.f32 %v622_v23, %v618_v58  ;;  %v641_v38 = vadd.f32 %v634_v43, %v629_v30  ;;  %v8104_v23 = vld [vmem:[%s11040_s4 + $0x40] sm:$0xff]  }
 0x36f   :  { %v642_v40 = vadd.f32 %v634_v43, %v630_v22  ;;  %v8110_v43 = vld [vmem:[%s11040_s4 + $0x70] sm:$0xff]  }
 0x371   :  { %v646_v41 = vpack.c.bf16 %v642_v40, %v641_v38 }
 0x373   :  { %7509 = vmatmul.mubr.msk.bf16.vlgmr.msra.gmra.mrb[4].mxu1 %vm513_vm1, %v646_v41 }
 0x374   :  { %7513 = vmatpush3.bf16.msra.mxu1 %v8100_v31  ;;  %7516 = vmatprep.mubr.msk.bf16.mxu1 %vm513_vm1, %v9072_v59 }
 0x375   :  { %7514 = vmatprep.subr.bf16.mxu1 %v8101_v27 }
 0x378   :  { %7515 = vmatpush3.bf16.msra.mxu1 %v8101_v27 }
 0x379   :  { %7520 = vmatprep.subr.bf16.mxu1 %v8102_v4 }
 0x37b   :  { %7517 = vmatmul.mubr.msk.bf16.vlgmr.msra.gmra.mrb[8].mxu1 %vm513_vm1, %v9078_v13 }
 0x37c   :  { %7521 = vmatpush3.bf16.msra.mxu1 %v8102_v4  ;;  %7524 = vmatprep.mubr.msk.bf16.mxu1 %vm513_vm1, %v645_v9 }
 0x37d   :  { %7522 = vmatprep.subr.bf16.mxu1 %v8103_v60 }
 0x380   :  { %7523 = vmatpush3.bf16.msra.mxu1 %v8103_v60 }
 0x381   :  { %7528 = vmatprep.subr.bf16.mxu1 %v8104_v23 }
 0x383   :  { %7525 = vmatmul.mubr.msk.bf16.vlgmr.msra.gmra.mrb[12].mxu1 %vm513_vm1, %v646_v41 }
 0x384   :  { %7529 = vmatpush3.bf16.msra.mxu1 %v8104_v23  ;;  %7532 = vmatprep.mubr.msk.bf16.mxu1 %vm513_vm1, %v9072_v59 }
 0x385   :  { %7530 = vmatprep.subr.bf16.mxu1 %v8105_v42 }
 0x388   :  { %7531 = vmatpush3.bf16.msra.mxu1 %v8105_v42 }
 0x389   :  { %7536 = vmatprep.subr.bf16.mxu1 %v8106_v32 }
 0x38b   :  { %7533 = vmatmul.mubr.msk.bf16.vlgmr.msra.gmra.mrb[16].mxu1 %vm513_vm1, %v9078_v13 }
 0x38c   :  { %7537 = vmatpush3.bf16.msra.mxu1 %v8106_v32  ;;  %7540 = vmatprep.mubr.msk.bf16.mxu1 %vm513_vm1, %v645_v9 }
 0x38d   :  { %7538 = vmatprep.subr.bf16.mxu1 %v8107_v29 }
 0x390   :  { %7539 = vmatpush3.bf16.msra.mxu1 %v8107_v29 }
 0x391   :  { %7544 = vmatprep.subr.bf16.mxu1 %v8108_v46 }
 0x393   :  { %7541 = vmatmul.mubr.msk.bf16.vlgmr.msra.gmra.mrb[20].mxu1 %vm513_vm1, %v646_v41 }
 0x394   :  { %7545 = vmatpush3.bf16.msra.mxu1 %v8108_v46  ;;  %7548 = vmatprep.mubr.msk.bf16.mxu1 %vm513_vm1, %v9072_v59 }
 0x395   :  { %7546 = vmatprep.subr.bf16.mxu1 %v8109_v45 }
 0x398   :  { %7547 = vmatpush3.bf16.msra.mxu1 %v8109_v45 }
 0x399   :  { %7552 = vmatprep.subr.bf16.mxu1 %v8110_v43 }
 0x39b   :  { %7549 = vmatmul.mubr.msk.bf16.vlgmr.msra.gmra.mrb[24].mxu1 %vm513_vm1, %v9078_v13 }
 0x39c   :  { %7553 = vmatpush3.bf16.msra.mxu1 %v8110_v43  ;;  %7556 = vmatprep.mubr.msk.bf16.mxu1 %vm513_vm1, %v645_v9 }
 0x39d   :  { %7554 = vmatprep.subr.bf16.mxu1 %v8111_v44 }
 0x3a0   :  { %7555 = vmatpush3.bf16.msra.mxu1 %v8111_v44 }
 0x3a3   :  { %7557 = vmatmul.mubr.msk.bf16.vlgmr.msra.gmra.mrb[28].mxu1 %vm513_vm1, %v646_v41 }
 0x436   :  { %v7502_v20 = vpop.f32.mrb[0].mxu1 }
 0x437   :  { %v731_v50 = vpop.f32.mrb[1].mxu1 }
 0x438   :  { %v7503_v51 = vpop.f32.mrb[2].mxu1 }
 0x439   :  { %v9146_v53 = vpack.c.bf16 %v7503_v51, %v7502_v20  ;;  %v734_v55 = vpop.f32.mrb[3].mxu1 }
 0x43a   :  { %v9148_v57 = vpack.c.bf16 %v734_v55, %v731_v50 }
 0x43b   :  { %1199 = vrot.lane.b32.xlu1 %v9146_v53, %s8555_s0 }
 0x43c   :  { %1197 = vrot.lane.b32.xlu0 %v9148_v57, %s8555_s0  ;;  %7564 = vmatprep.mubr.msk.bf16.mxu1 %vm1201_vm2, %v9148_v57 }
 0x446   :  { %v7510_v48 = vpop.f32.mrb[4].mxu1 }
 0x447   :  { %v798_v59 = vpop.f32.mrb[5].mxu1 }
 0x448   :  { %v7511_v26 = vpop.f32.mrb[6].mxu1 }
 0x449   :  { %v9156_v62 = vpack.c.bf16 %v7511_v26, %v7510_v48  ;;  %v801_v63 = vpop.f32.mrb[7].mxu1 }
 0x44a   :  { %v1181_v28 = vpack.c.bf16 %v801_v63, %v798_v59 }
 0x44c   :  { %1265 = vrot.lane.b32.xlu1 %v1181_v28, %s8555_s0  ;;  %7572 = vmatprep.mubr.msk.bf16.mxu0 %vm1201_vm2, %v1181_v28 }
 0x44e   :  { %v7518_v0 = vpop.f32.mrb[8].mxu1 }
 0x44f   :  { %v859_v2 = vpop.f32.mrb[9].mxu1 }
 0x450   :  { %1267 = vrot.lane.b32.xlu1 %v9156_v62, %s8555_s0  ;;  %v7519_v6 = vpop.f32.mrb[10].mxu1 }
 0x451   :  { %v9162_v61 = vpack.c.bf16 %v7519_v6, %v7518_v0  ;;  %v862_v47 = vpop.f32.mrb[11].mxu1 }
 0x452   :  { %v9164_v33 = vpack.c.bf16 %v862_v47, %v859_v2 }
 0x454   :  { %1334 = vrot.lane.b32.xlu1 %v9162_v61, %s8555_s0  ;;  %1332 = vrot.lane.b32.xlu0 %v9164_v33, %s8555_s0 }
 0x456   :  { %v7526_v7 = vpop.f32.mrb[12].mxu1 }
 0x457   :  { %v920_v10 = vpop.f32.mrb[13].mxu1 }
 0x458   :  { %v7527_v18 = vpop.f32.mrb[14].mxu1 }
 0x459   :  { %v9170_v13 = vpack.c.bf16 %v7527_v18, %v7526_v7  ;;  %v923_v39 = vpop.f32.mrb[15].mxu1 }
 0x45a   :  { %v9172_v24 = vpack.c.bf16 %v923_v39, %v920_v10 }
 0x45b   :  { %1401 = vrot.lane.b32.xlu1 %v9170_v13, %s8555_s0 }
 0x45c   :  { %1399 = vrot.lane.b32.xlu0 %v9172_v24, %s8555_s0 }
 0x45e   :  { %v7534_v17 = vpop.f32.mrb[16].mxu1 }
 0x45f   :  { %v981_v15 = vpop.f32.mrb[17].mxu1 }
 0x460   :  { %v7535_v14 = vpop.f32.mrb[18].mxu1 }
 0x461   :  { %v9178_v25 = vpack.c.bf16 %v7535_v14, %v7534_v17  ;;  %v984_v31 = vpop.f32.mrb[19].mxu1 }
 0x462   :  { %v9180_v54 = vpack.c.bf16 %v984_v31, %v981_v15 }
 0x463   :  { %1468 = vrot.lane.b32.xlu1 %v9178_v25, %s8555_s0 }
 0x464   :  { %1466 = vrot.lane.b32.xlu0 %v9180_v54, %s8555_s0 }
 0x466   :  { %v7542_v35 = vpop.f32.mrb[20].mxu1 }
 0x467   :  { %v1042_v34 = vpop.f32.mrb[21].mxu1 }
 0x468   :  { %v7543_v36 = vpop.f32.mrb[22].mxu1 }
 0x469   :  { %v9186_v9 = vpack.c.bf16 %v7543_v36, %v7542_v35  ;;  %v1045_v37 = vpop.f32.mrb[23].mxu1 }
 0x46a   :  { %v9188_v30 = vpack.c.bf16 %v1045_v37, %v1042_v34 }
 0x46b   :  { %1535 = vrot.lane.b32.xlu1 %v9186_v9, %s8555_s0 }
 0x46c   :  { %1533 = vrot.lane.b32.xlu0 %v9188_v30, %s8555_s0 }
 0x46e   :  { %v7550_v58 = vpop.f32.mrb[24].mxu1 }
 0x46f   :  { %v1103_v22 = vpop.f32.mrb[25].mxu1 }
 0x470   :  { %v7551_v38 = vpop.f32.mrb[26].mxu1 }
 0x471   :  { %v9194_v40 = vpack.c.bf16 %v7551_v38, %v7550_v58  ;;  %v1106_v41 = vpop.f32.mrb[27].mxu1  ;;  %v495_v58 = vadd.s32 16, %v8881_v3  ;;  %v494_v38 = vadd.s32 8, %v8881_v3 }
 0x472   :  { %v9196_v27 = vpack.c.bf16 %v1106_v41, %v1103_v22  ;;  %v498_v22 = vand.u32 127, %v209_v56  ;;  %v496_v41 = vadd.s32 24, %v8881_v3 }
 0x473   :  { %1602 = vrot.lane.b32.xlu1 %v9194_v40, %s8555_s0 }
 0x474   :  { %1600 = vrot.lane.b32.xlu0 %v9196_v27, %s8555_s0  ;;  %vm501_vm3 = vcmp.eq.s32.totalorder %v495_v58, %v498_v22  ;;  %vm503_vm4 = vcmp.ge.s32.totalorder %v498_v22, 17  ;;  %vm499_vm5 = vcmp.eq.s32.totalorder %v8881_v3, %v498_v22  ;;  %vm500_vm7 = vcmp.eq.s32.totalorder %v494_v38, %v498_v22 }
 0x475   :  { %vm506_vm6 = vmor %vm501_vm3, %vm503_vm4  ;;  %vm502_vm9 = vcmp.eq.s32.totalorder %v496_v41, %v498_v22 }
 0x476   :  { %v7558_v4 = vpop.f32.mrb[28].mxu1  ;;  %vm504_vm8 = vmor %vm499_vm5, %vm503_vm4 }
 0x477   :  { %v1164_v60 = vpop.f32.mrb[29].mxu1  ;;  %vm505_vm10 = vmor %vm500_vm7, %vm503_vm4 }
 0x478   :  { %v7559_v23 = vpop.f32.mrb[30].mxu1  ;;  %vm507_vm11 = vmor %vm502_vm9, %vm503_vm4 }
 0x479   :  { %v9202_v42 = vpack.c.bf16 %v7559_v23, %v7558_v4  ;;  %v1167_v32 = vpop.f32.mrb[31].mxu1 }
 0x47a   :  { %v9204_v29 = vpack.c.bf16 %v1167_v32, %v1164_v60 }
 0x47b   :  { %1669 = vrot.lane.b32.xlu1 %v9202_v42, %s8555_s0 }
 0x47c   :  { %1667 = vrot.lane.b32.xlu0 %v9204_v29, %s8555_s0 }
 0x47f   :  { %2102 = vrot.lane.b32.xlu1 %v9146_v53, %s8556_s19 }
 0x480   :  { %2100 = vrot.lane.b32.xlu0 %v9148_v57, %s8556_s19 }
 0x483   :  { %2161 = vrot.lane.b32.xlu1 %v1181_v28, %s8556_s19 }
 0x484   :  { %2163 = vrot.lane.b32.xlu0 %v9156_v62, %s8556_s19 }
 0x487   :  { %2222 = vrot.lane.b32.xlu1 %v9164_v33, %s8556_s19 }
 0x488   :  { %2224 = vrot.lane.b32.xlu0 %v9162_v61, %s8556_s19 }
 0x48b   :  { %2283 = vrot.lane.b32.xlu1 %v9172_v24, %s8556_s19 }
 0x48c   :  { %2344 = vrot.lane.b32.xlu0 %v9180_v54, %s8556_s19 }
 0x48f   :  { %2466 = vrot.lane.b32.xlu1 %v9196_v27, %s8556_s19 }
 0x490   :  { %2285 = vrot.lane.b32.xlu0 %v9170_v13, %s8556_s19 }
 0x494   :  { %2346 = vrot.lane.b32.xlu0 %v9178_v25, %s8556_s19 }
 0x498   :  { %2405 = vrot.lane.b32.xlu0 %v9188_v30, %s8556_s19 }
 0x4ad   :  { %v1200_v43 = vpop.permute.xlu1 %1199 }
 0x4ae   :  { %v1198_v46 = vpop.permute.xlu0 %1197  ;;  %v1212_v44 = vsel %vm1201_vm2, %v1200_v43, 0 }
 0x4af   :  { %8040 = vmatprep.subr.msk.bf16.mxu1 %vm1201_vm2, %v1198_v46  ;;  %v1209_v45 = vsel %vm1201_vm2, %v1198_v46, 0 }
 0x4b0   :  { %7561 = vmatpush3.bf16.xpose.msra.mxu1 %v1209_v45 }
 0x4b1   :  { %8041 = vmatprep.subr.msk.bf16.mxu1 %vm1201_vm2, %v1200_v43 }
 0x4b8   :  { %7563 = vmatpush3.bf16.xpose.msra.mxu1 %v1212_v44 }
 0x4be   :  { %v1266_v20 = vpop.permute.xlu1 %1265 }
 0x4bf   :  { %7565 = vmatmul.mubr.msk.bf16.vlgmr.msra.gmra.mrb[32].mxu1 %vm1201_vm2, %v9146_v53  ;;  %8042 = vmatprep.subr.msk.bf16.mxu0 %vm1201_vm2, %v1266_v20  ;;  %v1276_v50 = vsel %vm1201_vm2, %v1266_v20, 0 }
 0x4c0   :  { %7569 = vmatpush3.bf16.xpose.msra.mxu0 %v1276_v50  ;;  %7580 = vmatprep.mubr.msk.bf16.mxu1 %vm1201_vm2, %v9164_v33 }
 0x4c2   :  { %v1268_v51 = vpop.permute.xlu1 %1267 }
 0x4c3   :  { %8043 = vmatprep.subr.msk.bf16.mxu0 %vm1201_vm2, %v1268_v51  ;;  %v1279_v57 = vsel %vm1201_vm2, %v1268_v51, 0 }
 0x4c6   :  { %v1333_v55 = vpop.permute.xlu0 %1332  ;;  %v1335_v59 = vpop.permute.xlu1 %1334 }
 0x4c7   :  { %8044 = vmatprep.subr.msk.bf16.mxu1 %vm1201_vm2, %v1333_v55  ;;  %v1343_v48 = vsel %vm1201_vm2, %v1333_v55, 0  ;;  %v1346_v26 = vsel %vm1201_vm2, %v1335_v59, 0 }
 0x4c8   :  { %7571 = vmatpush3.bf16.xpose.msra.mxu0 %v1279_v57  ;;  %7577 = vmatpush3.bf16.xpose.msra.mxu1 %v1343_v48 }
 0x4c9   :  { %8045 = vmatprep.subr.msk.bf16.mxu1 %vm1201_vm2, %v1335_v59 }
 0x4cd   :  { %v1402_v28 = vpop.permute.xlu1 %1401 }
 0x4ce   :  { %v1400_v53 = vpop.permute.xlu0 %1399 }
 0x4cf   :  { %7573 = vmatmul.mubr.msk.bf16.vlgmr.msra.gmra.mrb[16].mxu0 %vm1201_vm2, %v9156_v62  ;;  %8046 = vmatprep.subr.msk.bf16.mxu0 %vm1201_vm2, %v1400_v53  ;;  %v1410_v63 = vsel %vm1201_vm2, %v1400_v53, 0  ;;  %v1413_v62 = vsel %vm1201_vm2, %v1402_v28, 0 }
 0x4d0   :  { %7579 = vmatpush3.bf16.xpose.msra.mxu1 %v1346_v26  ;;  %7585 = vmatpush3.bf16.xpose.msra.mxu0 %v1410_v63 }
 0x4d1   :  { %7588 = vmatprep.mubr.msk.bf16.mxu0 %vm1201_vm2, %v9172_v24  ;;  %8047 = vmatprep.subr.msk.bf16.mxu0 %vm1201_vm2, %v1402_v28 }
 0x4d5   :  { %v1469_v6 = vpop.permute.xlu1 %1468 }
 0x4d6   :  { %v1467_v0 = vpop.permute.xlu0 %1466 }
 0x4d7   :  { %7581 = vmatmul.mubr.msk.bf16.vlgmr.msra.gmra.mrb[36].mxu1 %vm1201_vm2, %v9162_v61  ;;  %8048 = vmatprep.subr.msk.bf16.mxu1 %vm1201_vm2, %v1467_v0  ;;  %v1477_v2 = vsel %vm1201_vm2, %v1467_v0, 0  ;;  %v1480_v61 = vsel %vm1201_vm2, %v1469_v6, 0 }
 0x4d8   :  { %7587 = vmatpush3.bf16.xpose.msra.mxu0 %v1413_v62  ;;  %7593 = vmatpush3.bf16.xpose.msra.mxu1 %v1477_v2 }
 0x4d9   :  { %7596 = vmatprep.mubr.msk.bf16.mxu1 %vm1201_vm2, %v9180_v54  ;;  %8049 = vmatprep.subr.msk.bf16.mxu1 %vm1201_vm2, %v1469_v6 }
 0x4dd   :  { %v1536_v7 = vpop.permute.xlu1 %1535 }
 0x4de   :  { %v1534_v47 = vpop.permute.xlu0 %1533  ;;  %v1547_v18 = vsel %vm1201_vm2, %v1536_v7, 0 }
 0x4df   :  { %7589 = vmatmul.mubr.msk.bf16.vlgmr.msra.gmra.mrb[20].mxu0 %vm1201_vm2, %v9170_v13  ;;  %8050 = vmatprep.subr.msk.bf16.mxu0 %vm1201_vm2, %v1534_v47  ;;  %v1544_v33 = vsel %vm1201_vm2, %v1534_v47, 0 }
 0x4e0   :  { %7595 = vmatpush3.bf16.xpose.msra.mxu1 %v1480_v61  ;;  %7601 = vmatpush3.bf16.xpose.msra.mxu0 %v1544_v33 }
 0x4e1   :  { %7604 = vmatprep.mubr.msk.bf16.mxu0 %vm1201_vm2, %v9188_v30  ;;  %8051 = vmatprep.subr.msk.bf16.mxu0 %vm1201_vm2, %v1536_v7 }
 0x4e5   :  { %v1603_v39 = vpop.permute.xlu1 %1602 }
 0x4e6   :  { %v1601_v10 = vpop.permute.xlu0 %1600  ;;  %v1614_v15 = vsel %vm1201_vm2, %v1603_v39, 0 }
 0x4e7   :  { %7597 = vmatmul.mubr.msk.bf16.vlgmr.msra.gmra.mrb[40].mxu1 %vm1201_vm2, %v9178_v25  ;;  %8052 = vmatprep.subr.msk.bf16.mxu1 %vm1201_vm2, %v1601_v10  ;;  %v1611_v13 = vsel %vm1201_vm2, %v1601_v10, 0 }
 0x4e8   :  { %7603 = vmatpush3.bf16.xpose.msra.mxu0 %v1547_v18  ;;  %7609 = vmatpush3.bf16.xpose.msra.mxu1 %v1611_v13 }
 0x4e9   :  { %7612 = vmatprep.mubr.msk.bf16.mxu1 %vm1201_vm2, %v9196_v27  ;;  %8053 = vmatprep.subr.msk.bf16.mxu1 %vm1201_vm2, %v1603_v39  ;;  %v11049_v27 = vmov 0.0  }
 0x4ea   :  { %v9307_v4 = vsel %vm506_vm6, -1e+30, %v11049_v27  ;;  %v9310_v56 = vsel %vm504_vm8, -1e+30, %v11049_v27  ;;  %v9316_v46 = vsel %vm505_vm10, -1e+30, %v11049_v27 }
 0x4eb   :  { %11075 = vst [vmem:[#allocation9_spill] sm:$0xff] %v9307_v4  ;;  %11076 = vst [vmem:[#allocation10_spill] sm:$0xff] %v9310_v56  ;;  %v9324_v50 = vsel %vm507_vm11, -1e+30, %v11049_v27 }
 0x4ec   :  { %11077 = vst [vmem:[#allocation11_spill] sm:$0xff] %v9316_v46  ;;  %11078 = vst [vmem:[#allocation12_spill] sm:$0xff] %v9324_v50 }
 0x4ed   :  { %v1670_v24 = vpop.permute.xlu1 %1669 }
 0x4ee   :  { %v1668_v17 = vpop.permute.xlu0 %1667  ;;  %v1681_v35 = vsel %vm1201_vm2, %v1670_v24, 0 }
 0x4ef   :  { %7605 = vmatmul.mubr.msk.bf16.vlgmr.msra.gmra.mrb[24].mxu0 %vm1201_vm2, %v9186_v9  ;;  %8054 = vmatprep.subr.msk.bf16.mxu0 %vm1201_vm2, %v1668_v17  ;;  %v1678_v14 = vsel %vm1201_vm2, %v1668_v17, 0 }
 0x4f0   :  { %7611 = vmatpush3.bf16.xpose.msra.mxu1 %v1614_v15  ;;  %7617 = vmatpush3.bf16.xpose.msra.mxu0 %v1678_v14 }
 0x4f1   :  { %7620 = vmatprep.mubr.msk.bf16.mxu0 %vm1201_vm2, %v9204_v29  ;;  %v2103_v25 = vpop.permute.xlu1 %2102  ;;  %8055 = vmatprep.subr.msk.bf16.mxu0 %vm1201_vm2, %v1670_v24 }
 0x4f2   :  { %v2101_v31 = vpop.permute.xlu0 %2100 }
 0x4f3   :  { %7624 = vmatprep.subr.bf16.mxu1 %v2101_v31 }
 0x4f5   :  { %v9288_v54 = vpop.permute.xlu1 %2161 }
 0x4f6   :  { %v9293_v34 = vpop.permute.xlu0 %2163 }
 0x4f7   :  { %7613 = vmatmul.mubr.msk.bf16.vlgmr.msra.gmra.mrb[44].mxu1 %vm1201_vm2, %v9194_v40 }
 0x4f8   :  { %7619 = vmatpush3.bf16.xpose.msra.mxu0 %v1681_v35  ;;  %7625 = vmatpush3.bf16.msra.mxu1 %v2101_v31 }
 0x4f9   :  { %v2223_v36 = vpop.permute.xlu1 %2222  ;;  %7626 = vmatprep.subr.bf16.mxu1 %v2103_v25 }
 0x4fa   :  { %7640 = vmatprep.subr.bf16.mxu0 %v2223_v36  ;;  %v2225_v37 = vpop.permute.xlu0 %2224 }
 0x4fc   :  { %7627 = vmatpush3.bf16.msra.mxu1 %v2103_v25 }
 0x4fd   :  { %7632 = vmatprep.subr.bf16.mxu1 %v9288_v54 }
 0x4fe   :  { %v9298_v30 = vpop.permute.xlu0 %2344 }
 0x4ff   :  { %7621 = vmatmul.mubr.msk.bf16.vlgmr.msra.gmra.mrb[28].mxu0 %vm1201_vm2, %v9202_v42 }
 0x500   :  { %7641 = vmatpush3.bf16.msra.mxu0 %v2223_v36 }
 0x501   :  { %7642 = vmatprep.subr.bf16.mxu0 %v2225_v37 }
 0x504   :  { %7643 = vmatpush3.bf16.msra.mxu0 %v2225_v37 }
 0x505   :  { %7656 = vmatprep.subr.bf16.mxu0 %v9298_v30 }
 0x592   :  { %v7566_v60 = vpop.f32.mrb[32].mxu1 }
 0x593   :  { %v9313_v23 = vadd.f32 %v7566_v60, %v9307_v4  ;;  %v1248_v32 = vpop.f32.mrb[33].mxu1 }
 0x594   :  { %v7567_v45 = vpop.f32.mrb[34].mxu1  ;;  %v9319_v43 = vadd.f32 %v1248_v32, %v9310_v56 }
 0x595   :  { %v1251_v44 = vpop.f32.mrb[35].mxu1  ;;  %v1738_v20 = vsel %vm513_vm1, %v9313_v23, -inf  ;;  %v9332_v57 = vadd.f32 %v7567_v45, %v9324_v50 }
 0x596   :  { %v9327_v51 = vadd.f32 %v1251_v44, %v9316_v46  ;;  %1739 = vmax.xlane.f32.xlu0 %v1738_v20  ;;  %v1732_v48 = vsel %vm513_vm1, %v9319_v43, -inf }
 0x597   :  { %v1741_v59 = vsel %vm513_vm1, %v9332_v57, -inf }
 0x598   :  { %v1735_v55 = vsel %vm513_vm1, %v9327_v51, -inf }
 0x599   :  { %1736 = vmax.xlane.f32.xlu1 %v1735_v55 }
 0x59a   :  { %1733 = vmax.xlane.f32.xlu0 %v1732_v48 }
 0x59e   :  { %1742 = vmax.xlane.f32.xlu0 %v1741_v59 }
 0x5a2   :  { %v7574_v53 = vpop.f32.mrb[16].mxu0 }
 0x5a3   :  { %v9339_v26 = vadd.f32 %v7574_v53, %v9307_v4  ;;  %v1315_v63 = vpop.f32.mrb[17].mxu0 }
 0x5a4   :  { %v7575_v28 = vpop.f32.mrb[18].mxu0  ;;  %v9342_v0 = vadd.f32 %v1315_v63, %v9310_v56 }
 0x5a5   :  { %v9345_v62 = vadd.f32 %v7575_v28, %v9324_v50  ;;  %v1318_v2 = vpop.f32.mrb[19].mxu0  ;;  %v1750_v6 = vsel %vm513_vm1, %v9339_v26, -inf }
 0x5a6   :  { %1751 = vmax.xlane.f32.xlu0 %v1750_v6  ;;  %v9350_v47 = vadd.f32 %v1318_v2, %v9316_v46  ;;  %v1744_v33 = vsel %vm513_vm1, %v9342_v0, -inf }
 0x5a7   :  { %v1753_v61 = vsel %vm513_vm1, %v9345_v62, -inf }
 0x5a8   :  { %1754 = vmax.xlane.f32.xlu1 %v1753_v61  ;;  %v1747_v13 = vsel %vm513_vm1, %v9350_v47, -inf }
 0x5aa   :  { %1745 = vmax.xlane.f32.xlu0 %v1744_v33  ;;  %v7582_v7 = vpop.f32.mrb[36].mxu1 }
 0x5ab   :  { %v9357_v10 = vadd.f32 %v7582_v7, %v9307_v4  ;;  %v1382_v18 = vpop.f32.mrb[37].mxu1 }
 0x5ac   :  { %1748 = vmax.xlane.f32.xlu1 %v1747_v13  ;;  %v7583_v39 = vpop.f32.mrb[38].mxu1  ;;  %v9362_v24 = vadd.f32 %v1382_v18, %v9310_v56 }
 0x5ad   :  { %v9365_v17 = vadd.f32 %v7583_v39, %v9324_v50  ;;  %v1385_v15 = vpop.f32.mrb[39].mxu1  ;;  %v1762_v14 = vsel %vm513_vm1, %v9357_v10, -inf }
 0x5ae   :  { %1763 = vmax.xlane.f32.xlu0 %v1762_v14  ;;  %v9370_v25 = vadd.f32 %v1385_v15, %v9316_v46  ;;  %v1756_v35 = vsel %vm513_vm1, %v9362_v24, -inf }
 0x5af   :  { %v1765_v31 = vsel %vm513_vm1, %v9365_v17, -inf }
 0x5b0   :  { %1766 = vmax.xlane.f32.xlu1 %v1765_v31  ;;  %v1759_v22 = vsel %vm513_vm1, %v9370_v25, -inf }
 0x5b2   :  { %1757 = vmax.xlane.f32.xlu0 %v1756_v35  ;;  %v7590_v36 = vpop.f32.mrb[20].mxu0 }
 0x5b3   :  { %v9377_v37 = vadd.f32 %v7590_v36, %v9307_v4  ;;  %v1449_v58 = vpop.f32.mrb[21].mxu0 }
 0x5b4   :  { %1760 = vmax.xlane.f32.xlu1 %v1759_v22  ;;  %v7591_v38 = vpop.f32.mrb[22].mxu0  ;;  %v9382_v41 = vadd.f32 %v1449_v58, %v9310_v56 }
 0x5b5   :  { %v9385_v60 = vadd.f32 %v7591_v38, %v9324_v50  ;;  %v1452_v32 = vpop.f32.mrb[23].mxu0  ;;  %v1774_v45 = vsel %vm513_vm1, %v9377_v37, -inf }
 0x5b6   :  { %1775 = vmax.xlane.f32.xlu0 %v1774_v45  ;;  %v9390_v44 = vadd.f32 %v1452_v32, %v9316_v46  ;;  %v1768_v55 = vsel %vm513_vm1, %v9382_v41, -inf }
 0x5b7   :  { %v1777_v20 = vsel %vm513_vm1, %v9385_v60, -inf }
 0x5b8   :  { %1778 = vmax.xlane.f32.xlu1 %v1777_v20  ;;  %v1771_v63 = vsel %vm513_vm1, %v9390_v44, -inf }
 0x5ba   :  { %1769 = vmax.xlane.f32.xlu0 %v1768_v55  ;;  %v7598_v48 = vpop.f32.mrb[40].mxu1 }
 0x5bb   :  { %v9397_v59 = vadd.f32 %v7598_v48, %v9307_v4  ;;  %v1516_v53 = vpop.f32.mrb[41].mxu1 }
 0x5bc   :  { %1772 = vmax.xlane.f32.xlu1 %v1771_v63  ;;  %v7599_v28 = vpop.f32.mrb[42].mxu1  ;;  %v9402_v2 = vadd.f32 %v1516_v53, %v9310_v56 }
 0x5bd   :  { %v9405_v6 = vadd.f32 %v7599_v28, %v9324_v50  ;;  %v1519_v61 = vpop.f32.mrb[43].mxu1  ;;  %v1786_v33 = vsel %vm513_vm1, %v9397_v59, -inf }
 0x5be   :  { %1787 = vmax.xlane.f32.xlu0 %v1786_v33  ;;  %v9410_v7 = vadd.f32 %v1519_v61, %v9316_v46  ;;  %v1780_v13 = vsel %vm513_vm1, %v9402_v2, -inf }
 0x5bf   :  { %v1789_v18 = vsel %vm513_vm1, %v9405_v6, -inf }
 0x5c0   :  { %1790 = vmax.xlane.f32.xlu1 %v1789_v18  ;;  %v1783_v31 = vsel %vm513_vm1, %v9410_v7, -inf }
 0x5c2   :  { %1781 = vmax.xlane.f32.xlu0 %v1780_v13  ;;  %v7606_v39 = vpop.f32.mrb[24].mxu0 }
 0x5c3   :  { %v9417_v15 = vadd.f32 %v7606_v39, %v9307_v4  ;;  %v1583_v14 = vpop.f32.mrb[25].mxu0 }
 0x5c4   :  { %1784 = vmax.xlane.f32.xlu1 %v1783_v31  ;;  %v7607_v35 = vpop.f32.mrb[26].mxu0  ;;  %v9422_v36 = vadd.f32 %v1583_v14, %v9310_v56 }
 0x5c5   :  { %v9425_v58 = vadd.f32 %v7607_v35, %v9324_v50  ;;  %v1586_v22 = vpop.f32.mrb[27].mxu0  ;;  %v1798_v38 = vsel %vm513_vm1, %v9417_v15, -inf }
 0x5c6   :  { %1799 = vmax.xlane.f32.xlu0 %v1798_v38  ;;  %v9430_v32 = vadd.f32 %v1586_v22, %v9316_v46  ;;  %v1792_v20 = vsel %vm513_vm1, %v9422_v36, -inf }
 0x5c7   :  { %v1801_v45 = vsel %vm513_vm1, %v9425_v58, -inf }
 0x5c8   :  { %1802 = vmax.xlane.f32.xlu1 %v1801_v45  ;;  %v1795_v63 = vsel %vm513_vm1, %v9430_v32, -inf }
 0x5ca   :  { %1793 = vmax.xlane.f32.xlu0 %v1792_v20  ;;  %v7614_v55 = vpop.f32.mrb[44].mxu1 }
 0x5cb   :  { %v9437_v48 = vadd.f32 %v7614_v55, %v9307_v4  ;;  %v1650_v53 = vpop.f32.mrb[45].mxu1 }
 0x5cc   :  { %1796 = vmax.xlane.f32.xlu1 %v1795_v63  ;;  %v7615_v28 = vpop.f32.mrb[46].mxu1  ;;  %v9442_v61 = vadd.f32 %v1650_v53, %v9310_v56 }
 0x5cd   :  { %v9445_v33 = vadd.f32 %v7615_v28, %v9324_v50  ;;  %v1653_v18 = vpop.f32.mrb[47].mxu1  ;;  %v1810_v13 = vsel %vm513_vm1, %v9437_v48, -inf }
 0x5ce   :  { %1811 = vmax.xlane.f32.xlu0 %v1810_v13  ;;  %v9450_v39 = vadd.f32 %v1653_v18, %v9316_v46  ;;  %v1804_v31 = vsel %vm513_vm1, %v9442_v61, -inf }
 0x5cf   :  { %v1813_v14 = vsel %vm513_vm1, %v9445_v33, -inf }
 0x5d0   :  { %1814 = vmax.xlane.f32.xlu1 %v1813_v14  ;;  %v1807_v45 = vsel %vm513_vm1, %v9450_v39, -inf }
 0x5d2   :  { %1805 = vmax.xlane.f32.xlu0 %v1804_v31  ;;  %v7622_v35 = vpop.f32.mrb[28].mxu0 }
 0x5d3   :  { %v9457_v22 = vadd.f32 %v7622_v35, %v9307_v4  ;;  %v1717_v38 = vpop.f32.mrb[29].mxu0  ;;  %v9482_v35 = vpop.permute.xlu0 %2285 }
 0x5d4   :  { %1808 = vmax.xlane.f32.xlu1 %v1807_v45  ;;  %v7623_v20 = vpop.f32.mrb[30].mxu0  ;;  %v9462_v55 = vadd.f32 %v1717_v38, %v9310_v56  ;;  %v9486_v45 = vpop.permute.xlu1 %2283 }
 0x5d5   :  { %v9465_v53 = vadd.f32 %v7623_v20, %v9324_v50  ;;  %v1720_v63 = vpop.f32.mrb[31].mxu0  ;;  %v1822_v28 = vsel %vm513_vm1, %v9457_v22, -inf }
 0x5d6   :  { %1823 = vmax.xlane.f32.xlu0 %v1822_v28  ;;  %v9470_v18 = vadd.f32 %v1720_v63, %v9316_v46  ;;  %v1816_v14 = vsel %vm513_vm1, %v9462_v55, -inf }
 0x5d7   :  { %v1825_v13 = vsel %vm513_vm1, %v9465_v53, -inf  ;;  %v9484_v38 = vpop.permute.xlu0 %2346 }
 0x5d8   :  { %1826 = vmax.xlane.f32.xlu1 %v1825_v13  ;;  %v1819_v31 = vsel %vm513_vm1, %v9470_v18, -inf  ;;  %v9490_v63 = vpop.permute.xlu1 %2466 }
 0x5da   :  { %1817 = vmax.xlane.f32.xlu0 %v1816_v14 }
 0x5db   :  { %v9488_v20 = vpop.permute.xlu0 %2405 }
 0x5dc   :  { %1820 = vmax.xlane.f32.xlu1 %v1819_v31 }
 0x5ed   :  { %2468 = vrot.lane.b32.xlu1 %v9194_v40, %s8556_s19 }
 0x5f0   :  { %2407 = vrot.lane.b32.xlu0 %v9186_v9, %s8556_s19 }
 0x623   :  { %v1740_v28 = vpop.xlane.xlu0 %1739 }
 0x624   :  { %v1830_v13 = vsub.f32 %v9313_v23, %v1740_v28 }
 0x626   :  { %v1864_v14 = vmul.f32 1.442695, %v1830_v13  ;;  %v1737_v31 = vpop.xlane.xlu1 %1736 }
 0x627   :  { %v1734_v27 = vpop.xlane.xlu0 %1733  ;;  %v1829_v9 = vsub.f32 %v9327_v51, %v1737_v31 }
 0x628   :  { %8190 = vpow2.f32 %v1864_v14  ;;  %v1828_v40 = vsub.f32 %v9319_v43, %v1734_v27 }
 0x629   :  { %v1862_v4 = vmul.f32 1.442695, %v1829_v9 }
 0x62a   :  { %v1860_v50 = vmul.f32 1.442695, %v1828_v40 }
 0x62b   :  { %v1743_v46 = vpop.xlane.xlu0 %1742 }
 0x62c   :  { %8192 = vpow2.f32 %v1860_v50  ;;  %v1831_v56 = vsub.f32 %v9332_v57, %v1743_v46 }
 0x62e   :  { %v1866_v16 = vmul.f32 1.442695, %v1831_v56 }
 0x630   :  { %8194 = vpow2.f32 %v1866_v16 }
 0x631   :  { %8196 = vpow2.f32 %v1862_v4 }
 0x632   :  { %v9496_v11 = vpop.eup %8190 }
 0x633   :  { %v1752_v23 = vpop.xlane.xlu0 %1751  ;;  %v1930_v28 = vsel %vm513_vm1, %v9496_v11, 0.0 }
 0x634   :  { %v1834_v13 = vsub.f32 %v9339_v26, %v1752_v23  ;;  %1931 = vadd.xlane.f32.xlu0 %v1930_v28 }
 0x635   :  { %v1755_v27 = vpop.xlane.xlu1 %1754 }
 0x636   :  { %v9501_v43 = vpop.eup %8192  ;;  %v1872_v51 = vmul.f32 1.442695, %v1834_v13  ;;  %v1835_v50 = vsub.f32 %v9345_v62, %v1755_v27 }
 0x637   :  { %v1746_v46 = vpop.xlane.xlu0 %1745  ;;  %v1924_v16 = vsel %vm513_vm1, %v9501_v43, 0.0 }
 0x638   :  { %8198 = vpow2.f32 %v1872_v51  ;;  %v1874_v56 = vmul.f32 1.442695, %v1835_v50  ;;  %v1832_v4 = vsub.f32 %v9342_v0, %v1746_v46  ;;  %1925 = vadd.xlane.f32.xlu0 %v1924_v16 }
 0x639   :  { %v1749_v57 = vpop.xlane.xlu1 %1748 }
 0x63a   :  { %v9507_v14 = vpop.eup %8194  ;;  %8200 = vpow2.f32 %v1874_v56  ;;  %v1868_v26 = vmul.f32 1.442695, %v1832_v4  ;;  %v1833_v31 = vsub.f32 %v9350_v47, %v1749_v57 }
 0x63b   :  { %v1764_v40 = vpop.xlane.xlu0 %1763  ;;  %v1933_v62 = vsel %vm513_vm1, %v9507_v14, 0.0  ;;  %v9512_v9 = vpop.eup %8196 }
 0x63c   :  { %8202 = vpow2.f32 %v1868_v26  ;;  %v1870_v23 = vmul.f32 1.442695, %v1833_v31  ;;  %v1838_v28 = vsub.f32 %v9357_v10, %v1764_v40  ;;  %1934 = vadd.xlane.f32.xlu1 %v1933_v62  ;;  %v1927_v47 = vsel %vm513_vm1, %v9512_v9, 0.0 }
 0x63d   :  { %v1767_v0 = vpop.xlane.xlu1 %1766 }
 0x63e   :  { %8204 = vpow2.f32 %v1870_v23  ;;  %v1880_v13 = vmul.f32 1.442695, %v1838_v28  ;;  %v1839_v27 = vsub.f32 %v9365_v17, %v1767_v0 }
 0x63f   :  { %v1758_v51 = vpop.xlane.xlu0 %1757 }
 0x640   :  { %8206 = vpow2.f32 %v1880_v13  ;;  %v1882_v50 = vmul.f32 1.442695, %v1839_v27  ;;  %v1836_v46 = vsub.f32 %v9362_v24, %v1758_v51  ;;  %1928 = vadd.xlane.f32.xlu1 %v1927_v47 }
 0x641   :  { %v1761_v16 = vpop.xlane.xlu1 %1760 }
 0x642   :  { %v9519_v56 = vpop.eup %8198  ;;  %8208 = vpow2.f32 %v1882_v50  ;;  %v1876_v10 = vmul.f32 1.442695, %v1836_v46  ;;  %v1837_v4 = vsub.f32 %v9370_v25, %v1761_v16 }
 0x643   :  { %v1776_v57 = vpop.xlane.xlu0 %1775  ;;  %v1942_v17 = vsel %vm513_vm1, %v9519_v56, 0.0 }
 0x644   :  { %v9524_v26 = vpop.eup %8200  ;;  %8210 = vpow2.f32 %v1876_v10  ;;  %v1878_v31 = vmul.f32 1.442695, %v1837_v4  ;;  %v1842_v40 = vsub.f32 %v9377_v37, %v1776_v57  ;;  %1943 = vadd.xlane.f32.xlu0 %v1942_v17 }
 0x645   :  { %v1779_v24 = vpop.xlane.xlu1 %1778  ;;  %v1945_v62 = vsel %vm513_vm1, %v9524_v26, 0.0 }
 0x646   :  { %v9529_v23 = vpop.eup %8202  ;;  %8212 = vpow2.f32 %v1878_v31  ;;  %v1888_v28 = vmul.f32 1.442695, %v1842_v40  ;;  %v1843_v25 = vsub.f32 %v9385_v60, %v1779_v24  ;;  %1946 = vadd.xlane.f32.xlu1 %v1945_v62 }
 0x647   :  { %v1770_v0 = vpop.xlane.xlu0 %1769  ;;  %v1936_v13 = vsel %vm513_vm1, %v9529_v23, 0.0 }
 0x648   :  { %v9534_v27 = vpop.eup %8204  ;;  %8214 = vpow2.f32 %v1888_v28  ;;  %v1890_v37 = vmul.f32 1.442695, %v1843_v25  ;;  %v1840_v51 = vsub.f32 %v9382_v41, %v1770_v0  ;;  %1937 = vadd.xlane.f32.xlu0 %v1936_v13 }
 0x649   :  { %v1773_v47 = vpop.xlane.xlu1 %1772  ;;  %v1939_v50 = vsel %vm513_vm1, %v9534_v27, 0.0 }
 0x64a   :  { %v9539_v46 = vpop.eup %8206  ;;  %8216 = vpow2.f32 %v1890_v37  ;;  %v1884_v60 = vmul.f32 1.442695, %v1840_v51  ;;  %v1841_v16 = vsub.f32 %v9390_v44, %v1773_v47  ;;  %1940 = vadd.xlane.f32.xlu1 %v1939_v50 }
 0x64b   :  { %v1788_v10 = vpop.xlane.xlu0 %1787  ;;  %v1954_v4 = vsel %vm513_vm1, %v9539_v46, 0.0 }
 0x64c   :  { %v9544_v57 = vpop.eup %8208  ;;  %8218 = vpow2.f32 %v1884_v60  ;;  %v1886_v41 = vmul.f32 1.442695, %v1841_v16  ;;  %v1846_v17 = vsub.f32 %v9397_v59, %v1788_v10  ;;  %1955 = vadd.xlane.f32.xlu0 %v1954_v4 }
 0x64d   :  { %v1791_v31 = vpop.xlane.xlu1 %1790  ;;  %v1957_v40 = vsel %vm513_vm1, %v9544_v57, 0.0 }
 0x64e   :  { %v9549_v24 = vpop.eup %8210  ;;  %8220 = vpow2.f32 %v1886_v41  ;;  %v1896_v44 = vmul.f32 1.442695, %v1846_v17  ;;  %v1847_v62 = vsub.f32 %v9405_v6, %v1791_v31  ;;  %1958 = vadd.xlane.f32.xlu1 %v1957_v40 }
 0x64f   :  { %v1782_v28 = vpop.xlane.xlu0 %1781  ;;  %v1948_v25 = vsel %vm513_vm1, %v9549_v24, 0.0 }
 0x650   :  { %v9554_v0 = vpop.eup %8212  ;;  %8222 = vpow2.f32 %v1896_v44  ;;  %v1898_v59 = vmul.f32 1.442695, %v1847_v62  ;;  %v1844_v13 = vsub.f32 %v9402_v2, %v1782_v28  ;;  %1949 = vadd.xlane.f32.xlu0 %v1948_v25 }
 0x651   :  { %v1785_v37 = vpop.xlane.xlu1 %1784  ;;  %v1951_v51 = vsel %vm513_vm1, %v9554_v0, 0.0 }
 0x652   :  { %v9559_v47 = vpop.eup %8214  ;;  %8224 = vpow2.f32 %v1898_v59  ;;  %v1892_v6 = vmul.f32 1.442695, %v1844_v13  ;;  %v1845_v50 = vsub.f32 %v9410_v7, %v1785_v37  ;;  %1952 = vadd.xlane.f32.xlu1 %v1951_v51 }
 0x653   :  { %v1800_v60 = vpop.xlane.xlu0 %1799  ;;  %v1966_v16 = vsel %vm513_vm1, %v9559_v47, 0.0 }
 0x654   :  { %v9564_v10 = vpop.eup %8216  ;;  %8226 = vpow2.f32 %v1892_v6  ;;  %v1894_v2 = vmul.f32 1.442695, %v1845_v50  ;;  %v1850_v4 = vsub.f32 %v9417_v15, %v1800_v60  ;;  %1967 = vadd.xlane.f32.xlu0 %v1966_v16 }
 0x655   :  { %v1803_v41 = vpop.xlane.xlu1 %1802  ;;  %v1969_v17 = vsel %vm513_vm1, %v9564_v10, 0.0 }
 0x656   :  { %v9569_v31 = vpop.eup %8218  ;;  %8228 = vpow2.f32 %v1894_v2  ;;  %v1904_v7 = vmul.f32 1.442695, %v1850_v4  ;;  %1970 = vadd.xlane.f32.xlu1 %v1969_v17  ;;  %v1851_v40 = vsub.f32 %v9425_v58, %v1803_v41 }
 0x657   :  { %v1794_v44 = vpop.xlane.xlu0 %1793  ;;  %v1960_v62 = vsel %vm513_vm1, %v9569_v31, 0.0 }
 0x658   :  { %v9574_v28 = vpop.eup %8220  ;;  %8230 = vpow2.f32 %v1904_v7  ;;  %v1848_v15 = vsub.f32 %v9422_v36, %v1794_v44  ;;  %1961 = vadd.xlane.f32.xlu0 %v1960_v62  ;;  %v1906_v51 = vmul.f32 1.442695, %v1851_v40 }
 0x659   :  { %v1797_v25 = vpop.xlane.xlu1 %1796  ;;  %v1963_v59 = vsel %vm513_vm1, %v9574_v28, 0.0 }
 0x65a   :  { %v9579_v13 = vpop.eup %8222  ;;  %v1900_v37 = vmul.f32 1.442695, %v1848_v15  ;;  %1964 = vadd.xlane.f32.xlu1 %v1963_v59  ;;  %v1849_v60 = vsub.f32 %v9430_v32, %v1797_v25 }
 0x65b   :  { %v1812_v58 = vpop.xlane.xlu0 %1811  ;;  %v1978_v6 = vsel %vm513_vm1, %v9579_v13, 0.0 }
 0x65c   :  { %v9583_v50 = vpop.eup %8224  ;;  %8232 = vpow2.f32 %v1900_v37  ;;  %v1854_v36 = vsub.f32 %v9437_v48, %v1812_v58  ;;  %1979 = vadd.xlane.f32.xlu0 %v1978_v6  ;;  %v1902_v44 = vmul.f32 1.442695, %v1849_v60 }
 0x65d   :  { %v1815_v16 = vpop.xlane.xlu1 %1814  ;;  %v1981_v2 = vsel %vm513_vm1, %v9583_v50, 0.0  ;;  %8234 = vpow2.f32 %v1906_v51 }
 0x65e   :  { %v9589_v4 = vpop.eup %8226  ;;  %v1912_v41 = vmul.f32 1.442695, %v1854_v36  ;;  %1982 = vadd.xlane.f32.xlu1 %v1981_v2  ;;  %v1855_v25 = vsub.f32 %v9445_v33, %v1815_v16 }
 0x65f   :  { %v1806_v17 = vpop.xlane.xlu0 %1805  ;;  %v1972_v7 = vsel %vm513_vm1, %v9589_v4, 0.0 }
 0x660   :  { %v9593_v40 = vpop.eup %8228  ;;  %8236 = vpow2.f32 %v1912_v41  ;;  %v1852_v32 = vsub.f32 %v9442_v61, %v1806_v17  ;;  %1973 = vadd.xlane.f32.xlu0 %v1972_v7  ;;  %v1914_v2 = vmul.f32 1.442695, %v1855_v25 }
 0x661   :  { %v1809_v48 = vpop.xlane.xlu1 %1808  ;;  %v1975_v62 = vsel %vm513_vm1, %v9593_v40, 0.0  ;;  %8238 = vpow2.f32 %v1902_v44 }
 0x662   :  { %v9598_v15 = vpop.eup %8230  ;;  %1976 = vadd.xlane.f32.xlu1 %v1975_v62  ;;  %v1908_v59 = vmul.f32 1.442695, %v1852_v32  ;;  %v1853_v33 = vsub.f32 %v9450_v39, %v1809_v48 }
 0x663   :  { %v1824_v37 = vpop.xlane.xlu0 %1823  ;;  %v1990_v6 = vsel %vm513_vm1, %v9598_v15, 0.0 }
 0x664   :  { %v1858_v51 = vsub.f32 %v9457_v22, %v1824_v37  ;;  %8240 = vpow2.f32 %v1908_v59  ;;  %v1910_v25 = vmul.f32 1.442695, %v1853_v33 }
 0x665   :  { %v1827_v58 = vpop.xlane.xlu1 %1826 }
 0x666   :  { %v9604_v61 = vpop.eup %8232  ;;  %v1920_v60 = vmul.f32 1.442695, %v1858_v51  ;;  %v1859_v36 = vsub.f32 %v9465_v53, %v1827_v58  ;;  %1991 = vadd.xlane.f32.xlu1 %v1990_v6 }
 0x667   :  { %v1818_v41 = vpop.xlane.xlu0 %1817  ;;  %v9609_v17 = vpop.eup %8234  ;;  %v1984_v7 = vsel %vm513_vm1, %v9604_v61, 0.0 }
 0x668   :  { %8242 = vpow2.f32 %v1920_v60  ;;  %v1856_v16 = vsub.f32 %v9462_v55, %v1818_v41  ;;  %v1922_v32 = vmul.f32 1.442695, %v1859_v36  ;;  %v1993_v55 = vsel %vm513_vm1, %v9609_v17, 0.0 }
 0x669   :  { %v1821_v22 = vpop.xlane.xlu1 %1820  ;;  %8244 = vpow2.f32 %v1914_v2 }
 0x66a   :  { %v9613_v44 = vpop.eup %8236  ;;  %v1916_v62 = vmul.f32 1.442695, %v1856_v16  ;;  %1985 = vadd.xlane.f32.xlu1 %v1984_v7  ;;  %v1857_v39 = vsub.f32 %v9470_v18, %v1821_v22 }
 0x66b   :  { %v2002_v53 = vsel %vm513_vm1, %v9613_v44, 0.0  ;;  %v9620_v48 = vpop.eup %8238 }
 0x66c   :  { %8246 = vpow2.f32 %v1916_v62  ;;  %2003 = vadd.xlane.f32.xlu0 %v2002_v53  ;;  %v1918_v59 = vmul.f32 1.442695, %v1857_v39  ;;  %v1987_v51 = vsel %vm513_vm1, %v9620_v48, 0.0  ;;  %v9656_v53 = vpop.permute.xlu0 %2407 }
 0x66d   :  { %8248 = vpow2.f32 %v1922_v32  ;;  %v9658_v39 = vpop.permute.xlu1 %2468 }
 0x66e   :  { %1994 = vadd.xlane.f32.xlu1 %v1993_v55  ;;  %8250 = vpow2.f32 %v1910_v25  ;;  %v9622_v37 = vpop.eup %8240 }
 0x66f   :  { %8252 = vpow2.f32 %v1918_v59  ;;  %v1996_v60 = vsel %vm513_vm1, %v9622_v37, 0.0 }
 0x672   :  { %v9626_v58 = vpop.eup %8242  ;;  %1988 = vadd.xlane.f32.xlu1 %v1987_v51 }
 0x673   :  { %v2014_v18 = vsel %vm513_vm1, %v9626_v58, 0.0  ;;  %v9630_v6 = vpop.eup %8244 }
 0x674   :  { %2015 = vadd.xlane.f32.xlu0 %v2014_v18  ;;  %v2005_v33 = vsel %vm513_vm1, %v9630_v6, 0.0 }
 0x676   :  { %v9634_v36 = vpop.eup %8246  ;;  %1997 = vadd.xlane.f32.xlu1 %v1996_v60 }
 0x677   :  { %v2008_v2 = vsel %vm513_vm1, %v9634_v36, 0.0  ;;  %v9638_v41 = vpop.eup %8248 }
 0x678   :  { %2009 = vadd.xlane.f32.xlu0 %v2008_v2  ;;  %v9642_v16 = vpop.eup %8250  ;;  %v2017_v22 = vsel %vm513_vm1, %v9638_v41, 0.0 }
 0x679   :  { %v1999_v7 = vsel %vm513_vm1, %v9642_v16, 0.0  ;;  %v9648_v32 = vpop.eup %8252 }
 0x67a   :  { %2006 = vadd.xlane.f32.xlu1 %v2005_v33  ;;  %v2011_v62 = vsel %vm513_vm1, %v9648_v32, 0.0 }
 0x67c   :  { %2018 = vadd.xlane.f32.xlu0 %v2017_v22 }
 0x67e   :  { %2000 = vadd.xlane.f32.xlu1 %v1999_v7 }
 0x682   :  { %2012 = vadd.xlane.f32.xlu1 %v2011_v62 }
 0x692   :  { %2527 = vrot.lane.b32.xlu0 %v9204_v29, %s8556_s19 }
 0x693   :  { %2529 = vrot.lane.b32.xlu1 %v9202_v42, %s8556_s19 }
 0x6c1   :  { %v1932_v25 = vpop.xlane.xlu0 %1931 }
 0x6c5   :  { %v1926_v55 = vpop.xlane.xlu0 %1925 }
 0x6c9   :  { %v1935_v59 = vpop.xlane.xlu1 %1934 }
 0x6ca   :  { %8254 = vrcp.f32 %v1935_v59 }
 0x6cb   :  { %8256 = vrcp.f32 %v1926_v55 }
 0x6cc   :  { %8258 = vrcp.f32 %v1932_v25 }
 0x6cd   :  { %v1929_v51 = vpop.xlane.xlu1 %1928 }
 0x6ce   :  { %8260 = vrcp.f32 %v1929_v51 }
 0x6d1   :  { %v1944_v18 = vpop.xlane.xlu0 %1943 }
 0x6d3   :  { %v1947_v60 = vpop.xlane.xlu1 %1946 }
 0x6d4   :  { %v8255_v2 = vpop.eup %8254  ;;  %8262 = vrcp.f32 %v1947_v60 }
 0x6d5   :  { %v1938_v29 = vpop.xlane.xlu0 %1937  ;;  %v8257_v33 = vpop.eup %8256  ;;  %v2055_v62 = vmul.f32 %v8255_v2, %v9507_v14 }
 0x6d6   :  { %8264 = vrcp.f32 %v1938_v29  ;;  %v8259_v42 = vpop.eup %8258  ;;  %v2052_v55 = vmul.f32 %v8257_v33, %v9501_v43 }
 0x6d7   :  { %8266 = vrcp.f32 %v1944_v18  ;;  %v1941_v22 = vpop.xlane.xlu1 %1940  ;;  %v2054_v59 = vmul.f32 %v8259_v42, %v9496_v11 }
 0x6d8   :  { %v8261_v7 = vpop.eup %8260  ;;  %8268 = vrcp.f32 %v1941_v22 }
 0x6d9   :  { %v1956_v19 = vpop.xlane.xlu0 %1955  ;;  %v2053_v25 = vmul.f32 %v8261_v7, %v9512_v9  ;;  %v2085_v60 = vpack.c.bf16 %v2055_v62, %v2054_v59 }
 0x6db   :  { %v1959_v51 = vpop.xlane.xlu1 %1958  ;;  %v2084_v8 = vpack.c.bf16 %v2053_v25, %v2052_v55 }
 0x6dc   :  { %8270 = vrcp.f32 %v1959_v51 }
 0x6dd   :  { %7628 = vmatprep.mubr.msk.bf16.mxu1 %vm513_vm1, %v2084_v8  ;;  %v1950_v29 = vpop.xlane.xlu0 %1949 }
 0x6de   :  { %8272 = vrcp.f32 %v1950_v29  ;;  %7629 = vmatmul.mubr.msk.bf16.vlgmr.msra.gmra.mrb[48].mxu1 %vm513_vm1, %v2085_v60  ;;  %v8263_v18 = vpop.eup %8262 }
 0x6df   :  { %8274 = vrcp.f32 %v1956_v19  ;;  %7633 = vmatpush3.bf16.msra.mxu1 %v9288_v54  ;;  %v1953_v14 = vpop.xlane.xlu1 %1952  ;;  %v2059_v33 = vmul.f32 %v8263_v18, %v9524_v26 }
 0x6e0   :  { %v8265_v43 = vpop.eup %8264  ;;  %8276 = vrcp.f32 %v1953_v14  ;;  %7634 = vmatprep.subr.bf16.mxu1 %v9293_v34 }
 0x6e1   :  { %v8267_v11 = vpop.eup %8266  ;;  %v1968_v9 = vpop.xlane.xlu0 %1967  ;;  %v2056_v42 = vmul.f32 %v8265_v43, %v9529_v23 }
 0x6e2   :  { %v8269_v2 = vpop.eup %8268  ;;  %v2058_v19 = vmul.f32 %v8267_v11, %v9519_v56 }
 0x6e3   :  { %7635 = vmatpush3.bf16.msra.mxu1 %v9293_v34  ;;  %v1971_v8 = vpop.xlane.xlu1 %1970  ;;  %v2057_v22 = vmul.f32 %v8269_v2, %v9534_v27 }
 0x6e4   :  { %7648 = vmatprep.subr.bf16.mxu1 %v9486_v45  ;;  %8278 = vrcp.f32 %v1971_v8  ;;  %v2087_v62 = vpack.c.bf16 %v2059_v33, %v2058_v19 }
 0x6e5   :  { %v1962_v54 = vpop.xlane.xlu0 %1961  ;;  %v2086_v7 = vpack.c.bf16 %v2057_v22, %v2056_v42 }
 0x6e6   :  { %8280 = vrcp.f32 %v1962_v54  ;;  %v8271_v55 = vpop.eup %8270 }
 0x6e7   :  { %8282 = vrcp.f32 %v1968_v9  ;;  %v1965_v25 = vpop.xlane.xlu1 %1964  ;;  %7636 = vmatprep.mubr.msk.bf16.mxu1 %vm513_vm1, %v2086_v7  ;;  %v2063_v27 = vmul.f32 %v8271_v55, %v9544_v57 }
 0x6e8   :  { %v8273_v34 = vpop.eup %8272  ;;  %8284 = vrcp.f32 %v1965_v25  ;;  %7637 = vmatmul.mubr.msk.bf16.vlgmr.msra.gmra.mrb[52].mxu1 %vm513_vm1, %v2087_v62 }
 0x6e9   :  { %v8275_v26 = vpop.eup %8274  ;;  %7649 = vmatpush3.bf16.msra.mxu1 %v9486_v45  ;;  %v1980_v56 = vpop.xlane.xlu0 %1979  ;;  %v2060_v51 = vmul.f32 %v8273_v34, %v9549_v24 }
 0x6ea   :  { %v8277_v23 = vpop.eup %8276  ;;  %7650 = vmatprep.subr.bf16.mxu1 %v9482_v35  ;;  %v2062_v29 = vmul.f32 %v8275_v26, %v9539_v46 }
 0x6eb   :  { %v1983_v59 = vpop.xlane.xlu1 %1982  ;;  %v2061_v60 = vmul.f32 %v8277_v23, %v9554_v0 }
 0x6ec   :  { %8286 = vrcp.f32 %v1983_v59  ;;  %v2089_v45 = vpack.c.bf16 %v2063_v27, %v2062_v29 }
 0x6ed   :  { %7651 = vmatpush3.bf16.msra.mxu1 %v9482_v35  ;;  %v1974_v18 = vpop.xlane.xlu0 %1973  ;;  %v2088_v14 = vpack.c.bf16 %v2061_v60, %v2060_v51 }
 0x6ee   :  { %7664 = vmatprep.subr.bf16.mxu1 %v9488_v20  ;;  %8288 = vrcp.f32 %v1974_v18  ;;  %v8279_v43 = vpop.eup %8278 }
 0x6ef   :  { %8290 = vrcp.f32 %v1980_v56  ;;  %v1977_v57 = vpop.xlane.xlu1 %1976  ;;  %7644 = vmatprep.mubr.msk.bf16.mxu0 %vm513_vm1, %v2088_v14  ;;  %v2067_v35 = vmul.f32 %v8279_v43, %v9564_v10 }
 0x6f0   :  { %v8281_v11 = vpop.eup %8280  ;;  %8292 = vrcp.f32 %v1977_v57  ;;  %7645 = vmatmul.mubr.msk.bf16.vlgmr.msra.gmra.mrb[32].mxu0 %vm513_vm1, %v2089_v45 }
 0x6f1   :  { %v8283_v24 = vpop.eup %8282  ;;  %7657 = vmatpush3.bf16.msra.mxu0 %v9298_v30  ;;  %v2064_v9 = vmul.f32 %v8281_v11, %v9569_v31 }
 0x6f2   :  { %v8285_v46 = vpop.eup %8284  ;;  %7658 = vmatprep.subr.bf16.mxu0 %v9484_v38  ;;  %v2066_v33 = vmul.f32 %v8283_v24, %v9559_v47 }
 0x6f3   :  { %v1992_v0 = vpop.xlane.xlu1 %1991  ;;  %v2065_v2 = vmul.f32 %v8285_v46, %v9574_v28 }
 0x6f4   :  { %v2091_v42 = vpack.c.bf16 %v2067_v35, %v2066_v33 }
 0x6f5   :  { %7659 = vmatpush3.bf16.msra.mxu0 %v9484_v38  ;;  %v2090_v8 = vpack.c.bf16 %v2065_v2, %v2064_v9 }
 0x6f6   :  { %7672 = vmatprep.subr.bf16.mxu0 %v9490_v63  ;;  %v8287_v22 = vpop.eup %8286 }
 0x6f7   :  { %v1986_v30 = vpop.xlane.xlu1 %1985  ;;  %7652 = vmatprep.mubr.msk.bf16.mxu1 %vm513_vm1, %v2090_v8  ;;  %v2071_v28 = vmul.f32 %v8287_v22, %v9583_v50 }
 0x6f8   :  { %v8289_v10 = vpop.eup %8288  ;;  %7653 = vmatmul.mubr.msk.bf16.vlgmr.msra.gmra.mrb[56].mxu1 %vm513_vm1, %v2091_v42 }
 0x6f9   :  { %v8291_v19 = vpop.eup %8290  ;;  %7665 = vmatpush3.bf16.msra.mxu1 %v9488_v20  ;;  %v2068_v47 = vmul.f32 %v8289_v10, %v9589_v4  ;;  %v2004_v62 = vpop.xlane.xlu0 %2003 }
 0x6fa   :  { %v8293_v31 = vpop.eup %8292  ;;  %7666 = vmatprep.subr.bf16.mxu1 %v9656_v53  ;;  %v2070_v7 = vmul.f32 %v8291_v19, %v9579_v13 }
 0x6fb   :  { %v1995_v38 = vpop.xlane.xlu1 %1994  ;;  %v2069_v54 = vmul.f32 %v8293_v31, %v9593_v40 }
 0x6fc   :  { %8294 = vrcp.f32 %v1995_v38  ;;  %v2093_v25 = vpack.c.bf16 %v2071_v28, %v2070_v7  ;;  %v8116_v38 = vld [vmem:[%s11041_s5 + $0x20] sm:$0xff]  }
 0x6fd   :  { %7667 = vmatpush3.bf16.msra.mxu1 %v9656_v53  ;;  %v2092_v55 = vpack.c.bf16 %v2069_v54, %v2068_v47  ;;  %8296 = vrcp.f32 %v1986_v30 }
 0x6fe   :  { %8298 = vrcp.f32 %v1992_v0 }
 0x6ff   :  { %v1989_v20 = vpop.xlane.xlu1 %1988  ;;  %7660 = vmatprep.mubr.msk.bf16.mxu0 %vm513_vm1, %v2092_v55 }
 0x700   :  { %8300 = vrcp.f32 %v1989_v20  ;;  %7661 = vmatmul.mubr.msk.bf16.vlgmr.msra.gmra.mrb[36].mxu0 %vm513_vm1, %v2093_v25  ;;  %v8117_v20 = vld [vmem:[%s11041_s5 + $0x28] sm:$0xff]  }
 0x701   :  { %7673 = vmatpush3.bf16.msra.mxu0 %v9490_v63  ;;  %v2016_v50 = vpop.xlane.xlu0 %2015 }
 0x702   :  { %7674 = vmatprep.subr.bf16.mxu0 %v9658_v39 }
 0x703   :  { %v1998_v13 = vpop.xlane.xlu1 %1997 }
 0x705   :  { %7675 = vmatpush3.bf16.msra.mxu0 %v9658_v39  ;;  %v2010_v4 = vpop.xlane.xlu0 %2009 }
 0x706   :  { %v8295_v40 = vpop.eup %8294 }
 0x707   :  { %v2007_v53 = vpop.xlane.xlu1 %2006  ;;  %v8297_v34 = vpop.eup %8296  ;;  %v2075_v27 = vmul.f32 %v8295_v40, %v9609_v17 }
 0x708   :  { %v8299_v26 = vpop.eup %8298  ;;  %8302 = vrcp.f32 %v2007_v53  ;;  %v2072_v63 = vmul.f32 %v8297_v34, %v9604_v61 }
 0x709   :  { %v2019_v56 = vpop.xlane.xlu0 %2018  ;;  %8304 = vrcp.f32 %v1998_v13  ;;  %v2074_v60 = vmul.f32 %v8299_v26, %v9598_v15  ;;  %v8118_v26 = vld [vmem:[%s11041_s5 + $0x30] sm:$0xff]  }
 0x70a   :  { %v8301_v23 = vpop.eup %8300  ;;  %8306 = vrcp.f32 %v2004_v62 }
 0x70b   :  { %v2001_v59 = vpop.xlane.xlu1 %2000  ;;  %v2073_v51 = vmul.f32 %v8301_v23, %v9620_v48  ;;  %v2095_v18 = vpack.c.bf16 %v2075_v27, %v2074_v60  ;;  %v8119_v60 = vld [vmem:[%s11041_s5 + $0x38] sm:$0xff]  }
 0x70c   :  { %8308 = vrcp.f32 %v2001_v59 }
 0x70d   :  { %8310 = vrcp.f32 %v2019_v56  ;;  %v2528_v39 = vpop.permute.xlu0 %2527  ;;  %v2094_v29 = vpack.c.bf16 %v2073_v51, %v2072_v63 }
 0x70e   :  { %8312 = vrcp.f32 %v2010_v4  ;;  %7680 = vmatprep.subr.bf16.mxu1 %v2528_v39 }
 0x70f   :  { %8314 = vrcp.f32 %v2016_v50  ;;  %v2013_v14 = vpop.xlane.xlu1 %2012  ;;  %7668 = vmatprep.mubr.msk.bf16.mxu1 %vm513_vm1, %v2094_v29 }
 0x710   :  { %8316 = vrcp.f32 %v2013_v14  ;;  %7669 = vmatmul.mubr.msk.bf16.vlgmr.msra.gmra.mrb[60].mxu1 %vm513_vm1, %v2095_v18 }
 0x711   :  { %7681 = vmatpush3.bf16.msra.mxu1 %v2528_v39 }
 0x712   :  { %v8303_v61 = vpop.eup %8302 }
 0x713   :  { %v2530_v17 = vpop.permute.xlu1 %2529  ;;  %v8305_v48 = vpop.eup %8304  ;;  %v2079_v43 = vmul.f32 %v8303_v61, %v9630_v6 }
 0x714   :  { %7682 = vmatprep.subr.bf16.mxu1 %v2530_v17  ;;  %v8307_v15 = vpop.eup %8306  ;;  %v2076_v11 = vmul.f32 %v8305_v48, %v9622_v37 }
 0x715   :  { %7683 = vmatpush3.bf16.msra.mxu1 %v2530_v17  ;;  %v2078_v35 = vmul.f32 %v8307_v15, %v9613_v44  ;;  %v8112_v44 = vld [vmem:[%s11041_s5] sm:$0xff]  }
 0x716   :  { %v8309_v45 = vpop.eup %8308  ;;  %7688 = vmatprep.subr.bf16.mxu0 %v8112_v44 }
 0x717   :  { %v8311_v57 = vpop.eup %8310  ;;  %v2077_v24 = vmul.f32 %v8309_v45, %v9642_v16  ;;  %v2097_v8 = vpack.c.bf16 %v2079_v43, %v2078_v35 }
 0x718   :  { %v8313_v46 = vpop.eup %8312  ;;  %v2083_v33 = vmul.f32 %v8311_v57, %v9638_v41  ;;  %v8115_v41 = vld [vmem:[%s11041_s5 + $0x18] sm:$0xff]  }
 0x719   :  { %v8315_v0 = vpop.eup %8314  ;;  %v2096_v9 = vpack.c.bf16 %v2077_v24, %v2076_v11  ;;  %v2080_v42 = vmul.f32 %v8313_v46, %v9634_v36  ;;  %v8113_v36 = vld [vmem:[%s11041_s5 + $0x8] sm:$0xff]  }
 0x71a   :  { %v8317_v2 = vpop.eup %8316  ;;  %v2082_v22 = vmul.f32 %v8315_v0, %v9626_v58  ;;  %7694 = vmatprep.subr.bf16.mxu1 %v8113_v36  ;;  %v8114_v58 = vld [vmem:[%s11041_s5 + $0x10] sm:$0xff]  }
 0x71b   :  { %7676 = vmatprep.mubr.msk.bf16.mxu0 %vm513_vm1, %v2096_v9  ;;  %v2081_v6 = vmul.f32 %v8317_v2, %v9648_v32 }
 0x71c   :  { %7677 = vmatmul.mubr.msk.bf16.vlgmr.msra.gmra.mrb[40].mxu0 %vm513_vm1, %v2097_v8  ;;  %v2099_v16 = vpack.c.bf16 %v2083_v33, %v2082_v22 }
 0x71d   :  { %v2098_v37 = vpack.c.bf16 %v2081_v6, %v2080_v42  ;;  %7689 = vmatpush3.bf16.msra.mxu0 %v8112_v44 }
 0x71e   :  { %7700 = vmatprep.subr.bf16.mxu0 %v8114_v58 }
 0x71f   :  { %7684 = vmatprep.mubr.msk.bf16.mxu1 %vm513_vm1, %v2098_v37 }
 0x720   :  { %7685 = vmatmul.mubr.msk.bf16.vlgmr.msra.gmra.mrb[64].mxu1 %vm513_vm1, %v2099_v16 }
 0x721   :  { %7695 = vmatpush3.bf16.msra.mxu1 %v8113_v36 }
 0x722   :  { %7706 = vmatprep.subr.bf16.mxu1 %v8115_v41 }
 0x7b1   :  { %v7630_v32 = vpop.f32.mrb[48].mxu1 }
 0x7b2   :  { %v2146_v30 = vpop.f32.mrb[49].mxu1 }
 0x7b3   :  { %v7631_v10 = vpop.f32.mrb[50].mxu1 }
 0x7b4   :  { %v2589_v19 = vpack.c.bf16 %v7631_v10, %v7630_v32  ;;  %v2149_v31 = vpop.f32.mrb[51].mxu1 }
 0x7b5   :  { %v2588_v28 = vpack.c.bf16 %v2149_v31, %v2146_v30 }
 0x7b7   :  { %7690 = vmatprep.mubr.msk.bf16.mxu0 %vm1201_vm2, %v2588_v28 }
 0x7b8   :  { %7691 = vmatmul.mubr.msk.bf16.vlgmr.msra.gmra.mrb[44].mxu0 %vm1201_vm2, %v2589_v19 }
 0x7b9   :  { %7701 = vmatpush3.bf16.msra.mxu0 %v8114_v58 }
 0x7ba   :  { %7712 = vmatprep.subr.bf16.mxu0 %v8116_v38 }
 0x7bb   :  { %v7638_v47 = vpop.f32.mrb[52].mxu1 }
 0x7bc   :  { %v2207_v54 = vpop.f32.mrb[53].mxu1 }
 0x7bd   :  { %v7639_v7 = vpop.f32.mrb[54].mxu1 }
 0x7be   :  { %v2591_v62 = vpack.c.bf16 %v7639_v7, %v7638_v47  ;;  %v2210_v55 = vpop.f32.mrb[55].mxu1 }
 0x7bf   :  { %v2590_v25 = vpack.c.bf16 %v2210_v55, %v2207_v54 }
 0x7c1   :  { %7696 = vmatprep.mubr.msk.bf16.mxu1 %vm1201_vm2, %v2590_v25 }
 0x7c2   :  { %7697 = vmatmul.mubr.msk.bf16.vlgmr.msra.gmra.mrb[68].mxu1 %vm1201_vm2, %v2591_v62 }
 0x7c3   :  { %v7646_v50 = vpop.f32.mrb[32].mxu0  ;;  %7707 = vmatpush3.bf16.msra.mxu1 %v8115_v41 }
 0x7c4   :  { %v2268_v13 = vpop.f32.mrb[33].mxu0  ;;  %7718 = vmatprep.subr.bf16.mxu1 %v8117_v20 }
 0x7c5   :  { %v7647_v4 = vpop.f32.mrb[34].mxu0 }
 0x7c6   :  { %v2593_v40 = vpack.c.bf16 %v7647_v4, %v7646_v50  ;;  %v2271_v53 = vpop.f32.mrb[35].mxu0 }
 0x7c7   :  { %v2592_v34 = vpack.c.bf16 %v2271_v53, %v2268_v13 }
 0x7c9   :  { %7702 = vmatprep.mubr.msk.bf16.mxu0 %vm1201_vm2, %v2592_v34 }
 0x7ca   :  { %7703 = vmatmul.mubr.msk.bf16.vlgmr.msra.gmra.mrb[48].mxu0 %vm1201_vm2, %v2593_v40 }
 0x7cb   :  { %v7654_v56 = vpop.f32.mrb[56].mxu1  ;;  %7713 = vmatpush3.bf16.msra.mxu0 %v8116_v38 }
 0x7cc   :  { %v2329_v23 = vpop.f32.mrb[57].mxu1  ;;  %7724 = vmatprep.subr.bf16.mxu0 %v8118_v26 }
 0x7cd   :  { %v7655_v27 = vpop.f32.mrb[58].mxu1 }
 0x7ce   :  { %v2595_v59 = vpack.c.bf16 %v7655_v27, %v7654_v56  ;;  %v2332_v63 = vpop.f32.mrb[59].mxu1 }
 0x7cf   :  { %v2594_v51 = vpack.c.bf16 %v2332_v63, %v2329_v23 }
 0x7d1   :  { %7708 = vmatprep.mubr.msk.bf16.mxu1 %vm1201_vm2, %v2594_v51 }
 0x7d2   :  { %7709 = vmatmul.mubr.msk.bf16.vlgmr.msra.gmra.mrb[72].mxu1 %vm1201_vm2, %v2595_v59 }
 0x7d3   :  { %v7662_v39 = vpop.f32.mrb[36].mxu0  ;;  %7719 = vmatpush3.bf16.msra.mxu1 %v8117_v20 }
 0x7d4   :  { %v2390_v29 = vpop.f32.mrb[37].mxu0  ;;  %7730 = vmatprep.subr.bf16.mxu1 %v8119_v60 }
 0x7d5   :  { %v7663_v18 = vpop.f32.mrb[38].mxu0 }
 0x7d6   :  { %v2597_v14 = vpack.c.bf16 %v7663_v18, %v7662_v39  ;;  %v2393_v61 = vpop.f32.mrb[39].mxu0 }
 0x7d7   :  { %v2596_v17 = vpack.c.bf16 %v2393_v61, %v2390_v29 }
 0x7d9   :  { %7714 = vmatprep.mubr.msk.bf16.mxu0 %vm1201_vm2, %v2596_v17 }
 0x7da   :  { %7715 = vmatmul.mubr.msk.bf16.vlgmr.msra.gmra.mrb[52].mxu0 %vm1201_vm2, %v2597_v14 }
 0x7db   :  { %7725 = vmatpush3.bf16.msra.mxu0 %v8118_v26 }
 0x7e3   :  { %v7670_v48 = vpop.f32.mrb[60].mxu1 }
 0x7e4   :  { %v2451_v15 = vpop.f32.mrb[61].mxu1 }
 0x7e5   :  { %v7671_v45 = vpop.f32.mrb[62].mxu1 }
 0x7e6   :  { %v2599_v43 = vpack.c.bf16 %v7671_v45, %v7670_v48  ;;  %v2454_v57 = vpop.f32.mrb[63].mxu1 }
 0x7e7   :  { %v2598_v11 = vpack.c.bf16 %v2454_v57, %v2451_v15 }
 0x7e9   :  { %7720 = vmatprep.mubr.msk.bf16.mxu1 %vm1201_vm2, %v2598_v11 }
 0x7ea   :  { %7721 = vmatmul.mubr.msk.bf16.vlgmr.msra.gmra.mrb[76].mxu1 %vm1201_vm2, %v2599_v43 }
 0x7eb   :  { %7731 = vmatpush3.bf16.msra.mxu1 %v8119_v60 }
 0x7ef   :  { %v7678_v24 = vpop.f32.mrb[40].mxu0 }
 0x7f0   :  { %v2512_v46 = vpop.f32.mrb[41].mxu0 }
 0x7f1   :  { %v7679_v35 = vpop.f32.mrb[42].mxu0 }
 0x7f2   :  { %v2601_v0 = vpack.c.bf16 %v7679_v35, %v7678_v24  ;;  %v2515_v9 = vpop.f32.mrb[43].mxu0 }
 0x7f3   :  { %v2600_v2 = vpack.c.bf16 %v2515_v9, %v2512_v46  ;;  %v7686_v33 = vpop.f32.mrb[64].mxu1 }
 0x7f4   :  { %v2573_v8 = vpop.f32.mrb[65].mxu1 }
 0x7f5   :  { %v7687_v42 = vpop.f32.mrb[66].mxu1  ;;  %7726 = vmatprep.mubr.msk.bf16.mxu0 %vm1201_vm2, %v2600_v2 }
 0x7f6   :  { %v2603_v6 = vpack.c.bf16 %v7687_v42, %v7686_v33  ;;  %v2576_v22 = vpop.f32.mrb[67].mxu1  ;;  %7727 = vmatmul.mubr.msk.bf16.vlgmr.msra.gmra.mrb[56].mxu0 %vm1201_vm2, %v2601_v0 }
 0x7f7   :  { %v2602_v37 = vpack.c.bf16 %v2576_v22, %v2573_v8 }
 0x7f9   :  { %7732 = vmatprep.mubr.msk.bf16.mxu1 %vm1201_vm2, %v2602_v37 }
 0x7fa   :  { %7733 = vmatmul.mubr.msk.bf16.vlgmr.msra.gmra.mrb[80].mxu1 %vm1201_vm2, %v2603_v6 }
 0x88b   :  { %v7692_v16 = vpop.f32.mrb[44].mxu0 }
 0x88c   :  { %v2666_v44 = vpop.f32.mrb[45].mxu0  ;;  %v3122_v31 = vsel %vm513_vm1, %v7692_v16, 0.0 }
 0x88d   :  { %v7693_v36 = vpop.f32.mrb[46].mxu0  ;;  %v3108_v47 = vsel %vm513_vm1, %v2666_v44, 0.0 }
 0x88e   :  { %v2669_v58 = vpop.f32.mrb[47].mxu0  ;;  %v3129_v55 = vsel %vm513_vm1, %v7693_v36, 0.0 }
 0x88f   :  { %v3115_v13 = vsel %vm513_vm1, %v2669_v58, 0.0 }
 0x895   :  { %v7698_v41 = vpop.f32.mrb[68].mxu1 }
 0x896   :  { %v2727_v32 = vpop.f32.mrb[69].mxu1  ;;  %v3150_v26 = vsel %vm513_vm1, %v7698_v41, 0.0 }
 0x897   :  { %v7699_v30 = vpop.f32.mrb[70].mxu1  ;;  %v3136_v27 = vsel %vm513_vm1, %v2727_v32, 0.0 }
 0x898   :  { %v2730_v10 = vpop.f32.mrb[71].mxu1  ;;  %v3157_v60 = vsel %vm513_vm1, %v7699_v30, 0.0 }
 0x899   :  { %v3143_v14 = vsel %vm513_vm1, %v2730_v10, 0.0  ;;  %v11066_v10 = vsub.s32 2, %v8881_v3 }
 0x89d   :  { %v7704_v19 = vpop.f32.mrb[48].mxu0 }
 0x89e   :  { %v3123_v28 = vsel %vm513_vm1, %v7704_v19, 0.0  ;;  %v2788_v38 = vpop.f32.mrb[49].mxu0 }
 0x89f   :  { %v3124_v54 = vadd.f32 %v3123_v28, %v3122_v31  ;;  %v3109_v7 = vsel %vm513_vm1, %v2788_v38, 0.0  ;;  %v7705_v62 = vpop.f32.mrb[50].mxu0  ;;  %v9794_v31 = vld [vmem:[%s11044_s8] sm:$0x3f] }
 0x8a0   :  { %v3110_v25 = vadd.f32 %v3109_v7, %v3108_v47  ;;  %v3130_v20 = vsel %vm513_vm1, %v7705_v62, 0.0  ;;  %v2791_v50 = vpop.f32.mrb[51].mxu0  ;;  %v3167_v28 = vrot.slane %v9794_v31, %v11066_v10 }
 0x8a1   :  { %v3131_v4 = vadd.f32 %v3130_v20, %v3129_v55  ;;  %v3116_v40 = vsel %vm513_vm1, %v2791_v50, 0.0 }
 0x8a2   :  { %v3117_v53 = vadd.f32 %v3116_v40, %v3115_v13 }
 0x8a5   :  { %v7710_v34 = vpop.f32.mrb[72].mxu1 }
 0x8a6   :  { %v3151_v56 = vsel %vm513_vm1, %v7710_v34, 0.0  ;;  %v2849_v23 = vpop.f32.mrb[73].mxu1 }
 0x8a7   :  { %v3152_v59 = vadd.f32 %v3151_v56, %v3150_v26  ;;  %v3137_v63 = vsel %vm513_vm1, %v2849_v23, 0.0  ;;  %v7711_v51 = vpop.f32.mrb[74].mxu1 }
 0x8a8   :  { %v3138_v39 = vadd.f32 %v3137_v63, %v3136_v27  ;;  %v3158_v29 = vsel %vm513_vm1, %v7711_v51, 0.0  ;;  %v2852_v18 = vpop.f32.mrb[75].mxu1 }
 0x8a9   :  { %v3159_v61 = vadd.f32 %v3158_v29, %v3157_v60  ;;  %v3144_v17 = vsel %vm513_vm1, %v2852_v18, 0.0 }
 0x8aa   :  { %v3145_v48 = vadd.f32 %v3144_v17, %v3143_v14 }
 0x8ad   :  { %v7716_v15 = vpop.f32.mrb[52].mxu0 }
 0x8ae   :  { %v3125_v45 = vsel %vm513_vm1, %v7716_v15, 0.0  ;;  %v2910_v43 = vpop.f32.mrb[53].mxu0 }
 0x8af   :  { %v3126_v57 = vadd.f32 %v3125_v45, %v3124_v54  ;;  %v3111_v11 = vsel %vm513_vm1, %v2910_v43, 0.0  ;;  %v7717_v24 = vpop.f32.mrb[54].mxu0 }
 0x8b0   :  { %v3112_v46 = vadd.f32 %v3111_v11, %v3110_v25  ;;  %v3132_v35 = vsel %vm513_vm1, %v7717_v24, 0.0  ;;  %v2913_v0 = vpop.f32.mrb[55].mxu0 }
 0x8b1   :  { %v3133_v9 = vadd.f32 %v3132_v35, %v3131_v4  ;;  %v3118_v2 = vsel %vm513_vm1, %v2913_v0, 0.0 }
 0x8b2   :  { %v3119_v33 = vadd.f32 %v3118_v2, %v3117_v53 }
 0x8bd   :  { %v7722_v8 = vpop.f32.mrb[76].mxu1 }
 0x8be   :  { %v3153_v42 = vsel %vm513_vm1, %v7722_v8, 0.0  ;;  %v2971_v6 = vpop.f32.mrb[77].mxu1 }
 0x8bf   :  { %v3154_v22 = vadd.f32 %v3153_v42, %v3152_v59  ;;  %v3139_v37 = vsel %vm513_vm1, %v2971_v6, 0.0  ;;  %v7723_v16 = vpop.f32.mrb[78].mxu1 }
 0x8c0   :  { %v3140_v44 = vadd.f32 %v3139_v37, %v3138_v39  ;;  %v3160_v36 = vsel %vm513_vm1, %v7723_v16, 0.0  ;;  %v2974_v58 = vpop.f32.mrb[79].mxu1 }
 0x8c1   :  { %v3161_v41 = vadd.f32 %v3160_v36, %v3159_v61  ;;  %v3146_v32 = vsel %vm513_vm1, %v2974_v58, 0.0 }
 0x8c2   :  { %v3147_v30 = vadd.f32 %v3146_v32, %v3145_v48 }
 0x8c9   :  { %v7728_v19 = vpop.f32.mrb[56].mxu0 }
 0x8ca   :  { %v3127_v38 = vsel %vm513_vm1, %v7728_v19, 0.0  ;;  %v3032_v47 = vpop.f32.mrb[57].mxu0 }
 0x8cb   :  { %v3128_v54 = vadd.f32 %v3127_v38, %v3126_v57  ;;  %v3113_v7 = vsel %vm513_vm1, %v3032_v47, 0.0  ;;  %v7729_v62 = vpop.f32.mrb[58].mxu0 }
 0x8cc   :  { %v3114_v55 = vadd.f32 %v3113_v7, %v3112_v46  ;;  %v3134_v25 = vsel %vm513_vm1, %v7729_v62, 0.0  ;;  %v3035_v20 = vpop.f32.mrb[59].mxu0 }
 0x8cd   :  { %v3170_v50 = vadd.f32 %v3167_v28, %v3128_v54  ;;  %v3135_v13 = vadd.f32 %v3134_v25, %v3133_v9  ;;  %v3120_v4 = vsel %vm513_vm1, %v3035_v20, 0.0  ;;  %v7734_v40 = vpop.f32.mrb[80].mxu1  ;;  %v11079_v9 = vld [vmem:[#allocation7_spill] sm:$0xff] }
 0x8ce   :  { %v3168_v53 = vadd.f32 %v3167_v28, %v3114_v55  ;;  %v3121_v34 = vadd.f32 %v3120_v4, %v3119_v33  ;;  %v3155_v26 = vsel %vm513_vm1, %v7734_v40, 0.0  ;;  %v3093_v56 = vpop.f32.mrb[81].mxu1  ;;  %v11080_v33 = vld [vmem:[#allocation8_spill] sm:$0xff] }
 0x8cf   :  { %v3156_v23 = vadd.f32 %v3155_v26, %v3154_v22  ;;  %v3141_v27 = vsel %vm513_vm1, %v3093_v56, 0.0  ;;  %v7735_v59 = vpop.f32.mrb[82].mxu1  ;;  %v9810_v18 = vadd.f32 %v3170_v50, %v8981_v1  ;;  %v3171_v17 = vadd.f32 %v3167_v28, %v3135_v13 }
 0x8d0   :  { %v9806_v63 = vadd.f32 %v3168_v53, %v8961_v49  ;;  %v3169_v51 = vadd.f32 %v3167_v28, %v3121_v34  ;;  %v3142_v60 = vadd.f32 %v3141_v27, %v3140_v44  ;;  %v3162_v39 = vsel %vm513_vm1, %v7735_v59, 0.0  ;;  %v3096_v29 = vpop.f32.mrb[83].mxu1 }
 0x8d1   :  { %v3163_v14 = vadd.f32 %v3162_v39, %v3161_v41  ;;  %v3148_v61 = vsel %vm513_vm1, %v3096_v29, 0.0  ;;  %v9821_v1 = vadd.f32 %v3171_v17, %v8983_v5  ;;  %v3174_v0 = vadd.f32 %v3167_v28, %v3156_v23 }
 0x8d2   :  { %v9814_v48 = vadd.f32 %v3169_v51, %v8963_v52  ;;  %v3149_v15 = vadd.f32 %v3148_v61, %v3147_v30  ;;  %v3184_v49 = vsel %vm513_vm1, %v9806_v63, 0.0  ;;  %v3172_v11 = vadd.f32 %v3167_v28, %v3142_v60 }
 0x8d3   :  { %3185 = vadd.xlane.f32.xlu0 %v3184_v49  ;;  %v3175_v45 = vadd.f32 %v3167_v28, %v3163_v14  ;;  %v3190_v52 = vsel %vm513_vm1, %v9810_v18, 0.0  ;;  %v3193_v5 = vsel %vm513_vm1, %v9821_v1, 0.0  ;;  %v9841_v8 = vadd.f32 %v3174_v0, %v11080_v33 }
 0x8d4   :  { %v3173_v43 = vadd.f32 %v3167_v28, %v3149_v15  ;;  %v3187_v57 = vsel %vm513_vm1, %v9814_v48, 0.0  ;;  %v9834_v2 = vadd.f32 %v3172_v11, %v11079_v9 }
 0x8d5   :  { %3188 = vadd.xlane.f32.xlu1 %v3187_v57  ;;  %v9829_v46 = vadd.f32 %v3175_v45, %v8999_v12  ;;  %v3202_v42 = vsel %vm513_vm1, %v9841_v8, 0.0  ;;  %v8120_v45 = vld [vmem:[%s11042_s6] sm:$0xff]  }
 0x8d6   :  { %v9824_v24 = vadd.f32 %v3173_v43, %v8991_v21  ;;  %v3196_v12 = vsel %vm513_vm1, %v9834_v2, 0.0  ;;  %7736 = vmatprep.subr.bf16.mxu0 %v8120_v45  ;;  %v8121_v43 = vld [vmem:[%s11042_s6 + $0x8] sm:$0xff]  }
 0x8d7   :  { %3191 = vadd.xlane.f32.xlu0 %v3190_v52  ;;  %v3205_v21 = vsel %vm513_vm1, %v9829_v46, 0.0  ;;  %7737 = vmatpush3.bf16.msra.mxu0 %v8120_v45 }
 0x8d8   :  { %v3199_v35 = vsel %vm513_vm1, %v9824_v24, 0.0  ;;  %7738 = vmatprep.subr.bf16.mxu0 %v8121_v43 }
 0x8d9   :  { %3200 = vadd.xlane.f32.xlu1 %v3199_v35 }
 0x8db   :  { %3194 = vadd.xlane.f32.xlu0 %v3193_v5  ;;  %7739 = vmatpush3.bf16.msra.mxu0 %v8121_v43 }
 0x8dd   :  { %3206 = vadd.xlane.f32.xlu1 %v3205_v21 }
 0x8df   :  { %3197 = vadd.xlane.f32.xlu0 %v3196_v12 }
 0x8e3   :  { %3203 = vadd.xlane.f32.xlu0 %v3202_v42 }
 0x960   :  { %v3186_v6 = vpop.xlane.xlu0 %3185 }
 0x961   :  { %v3208_v22 = vmul.f32 0.03125, %v3186_v6  ;;  %v11065_v6 = vsub.s32 3, %v8881_v3 }
 0x962   :  { %v3189_v37 = vpop.xlane.xlu1 %3188 }
 0x963   :  { %v9848_v16 = vsub.f32 %v9806_v63, %v3208_v22  ;;  %v3209_v44 = vmul.f32 0.03125, %v3189_v37 }
 0x964   :  { %v3192_v36 = vpop.xlane.xlu0 %3191 }
 0x965   :  { %v9851_v58 = vsub.f32 %v9814_v48, %v3209_v44  ;;  %v3210_v41 = vmul.f32 0.03125, %v3192_v36  ;;  %v3224_v32 = vmul.f32 %v9848_v16, %v9848_v16 }
 0x966   :  { %v3201_v30 = vpop.xlane.xlu1 %3200 }
 0x967   :  { %v9856_v19 = vsub.f32 %v9810_v18, %v3210_v41  ;;  %v3213_v28 = vmul.f32 0.03125, %v3201_v30  ;;  %v3232_v38 = vsel %vm513_vm1, %v3224_v32, 0.0  ;;  %v3225_v47 = vmul.f32 %v9851_v58, %v9851_v58 }
 0x968   :  { %3233 = vadd.xlane.f32.xlu0 %v3232_v38  ;;  %v3195_v54 = vpop.xlane.xlu0 %3194  ;;  %v3291_v32 = vrot.slane %v9794_v31, %v11065_v6  ;;  %v11064_v30 = vsub.s32 4, %v8881_v3 }
 0x969   :  { %v3211_v7 = vmul.f32 0.03125, %v3195_v54  ;;  %v3235_v62 = vsel %vm513_vm1, %v3225_v47, 0.0  ;;  %v3226_v55 = vmul.f32 %v9856_v19, %v9856_v19  ;;  %v9865_v20 = vsub.f32 %v9824_v24, %v3213_v28 }
 0x96a   :  { %3236 = vadd.xlane.f32.xlu1 %v3235_v62  ;;  %v3207_v25 = vpop.xlane.xlu1 %3206 }
 0x96b   :  { %v9868_v50 = vsub.f32 %v9821_v1, %v3211_v7  ;;  %v3215_v13 = vmul.f32 0.03125, %v3207_v25  ;;  %v3238_v4 = vsel %vm513_vm1, %v3226_v55, 0.0  ;;  %v3229_v27 = vmul.f32 %v9865_v20, %v9865_v20 }
 0x96c   :  { %3239 = vadd.xlane.f32.xlu0 %v3238_v4  ;;  %v3198_v40 = vpop.xlane.xlu0 %3197 }
 0x96d   :  { %v3212_v53 = vmul.f32 0.03125, %v3198_v40  ;;  %v3227_v34 = vmul.f32 %v9868_v50, %v9868_v50  ;;  %v9874_v26 = vsub.f32 %v9829_v46, %v3215_v13  ;;  %v3247_v29 = vsel %vm513_vm1, %v3229_v27, 0.0 }
 0x96f   :  { %v9877_v56 = vsub.f32 %v9834_v2, %v3212_v53  ;;  %v3241_v23 = vsel %vm513_vm1, %v3227_v34, 0.0  ;;  %v3231_v61 = vmul.f32 %v9874_v26, %v9874_v26  ;;  %v3303_v53 = vrot.slane %v9794_v31, %v11064_v30 }
 0x970   :  { %3242 = vadd.xlane.f32.xlu1 %v3241_v23  ;;  %v3204_v59 = vpop.xlane.xlu0 %3203 }
 0x971   :  { %v3214_v51 = vmul.f32 0.03125, %v3204_v59  ;;  %v3228_v60 = vmul.f32 %v9877_v56, %v9877_v56  ;;  %v3253_v15 = vsel %vm513_vm1, %v3231_v61, 0.0 }
 0x973   :  { %v9885_v39 = vsub.f32 %v9841_v8, %v3214_v51  ;;  %v3244_v14 = vsel %vm513_vm1, %v3228_v60, 0.0 }
 0x974   :  { %3248 = vadd.xlane.f32.xlu1 %v3247_v29  ;;  %3245 = vadd.xlane.f32.xlu0 %v3244_v14 }
 0x975   :  { %v3230_v17 = vmul.f32 %v9885_v39, %v9885_v39 }
 0x977   :  { %v3250_v49 = vsel %vm513_vm1, %v3230_v17, 0.0 }
 0x978   :  { %3254 = vadd.xlane.f32.xlu1 %v3253_v15  ;;  %3251 = vadd.xlane.f32.xlu0 %v3250_v49 }
 0x9f5   :  { %v3234_v57 = vpop.xlane.xlu0 %3233 }
 0x9f6   :  { %v3256_v11 = vmul.f32 0.03125, %v3234_v57 }
 0x9f7   :  { %v3237_v52 = vpop.xlane.xlu1 %3236 }
 0x9f8   :  { %v3264_v35 = vadd.f32 1e-05, %v3256_v11  ;;  %v3257_v0 = vmul.f32 0.03125, %v3237_v52 }
 0x9f9   :  { %v3240_v9 = vpop.xlane.xlu0 %3239 }
 0x9fa   :  { %8318 = vrsqrt.f32 %v3264_v35  ;;  %v3265_v5 = vadd.f32 1e-05, %v3257_v0  ;;  %v3258_v21 = vmul.f32 0.03125, %v3240_v9 }
 0x9fc   :  { %8320 = vrsqrt.f32 %v3265_v5  ;;  %v3266_v33 = vadd.f32 1e-05, %v3258_v21 }
 0x9fd   :  { %v3243_v12 = vpop.xlane.xlu1 %3242 }
 0x9fe   :  { %8322 = vrsqrt.f32 %v3266_v33  ;;  %v3259_v42 = vmul.f32 0.03125, %v3243_v12 }
 0xa00   :  { %v3267_v22 = vadd.f32 1e-05, %v3259_v42 }
 0xa01   :  { %v3249_v37 = vpop.xlane.xlu1 %3248  ;;  %v3246_v44 = vpop.xlane.xlu0 %3245 }
 0xa02   :  { %8324 = vrsqrt.f32 %v3267_v22  ;;  %v3261_v36 = vmul.f32 0.03125, %v3249_v37  ;;  %v3260_v41 = vmul.f32 0.03125, %v3246_v44  ;;  %v8122_v44 = vld [vmem:[%s11043_s7] sm:$0xff]  }
 0xa03   :  { %7748 = vmatprep.subr.bf16.mxu1 %v8122_v44 }
 0xa04   :  { %v8319_v28 = vpop.eup %8318  ;;  %v3269_v38 = vadd.f32 1e-05, %v3261_v36  ;;  %v3268_v47 = vadd.f32 1e-05, %v3260_v41  ;;  %7749 = vmatpush3.bf16.msra.mxu1 %v8122_v44  ;;  %v8125_v36 = vld [vmem:[%s11043_s7 + $0x18] sm:$0xff]  }
 0xa05   :  { %v3255_v54 = vpop.xlane.xlu1 %3254  ;;  %v3252_v7 = vpop.xlane.xlu0 %3251  ;;  %v3280_v62 = vmul.f32 %v8319_v28, %v9848_v16  ;;  %v7035_v41 = vld [vmem:[%s11045_s9] ss:$0 sm:$0xff] }
 0xa06   :  { %v8321_v55 = vpop.eup %8320  ;;  %8326 = vrsqrt.f32 %v3269_v38  ;;  %v3263_v25 = vmul.f32 0.03125, %v3255_v54  ;;  %v3262_v13 = vmul.f32 0.03125, %v3252_v7 }
 0xa07   :  { %8328 = vrsqrt.f32 %v3268_v47  ;;  %v3281_v4 = vmul.f32 %v8321_v55, %v9851_v58  ;;  %v3292_v40 = vmul.f32 %v3291_v32, %v3280_v62 }
 0xa08   :  { %v8323_v34 = vpop.eup %8322  ;;  %v3271_v23 = vadd.f32 1e-05, %v3263_v25  ;;  %v3270_v27 = vadd.f32 1e-05, %v3262_v13 }
 0xa09   :  { %v3282_v59 = vmul.f32 %v8323_v34, %v9856_v19  ;;  %v3293_v51 = vmul.f32 %v3291_v32, %v3281_v4  ;;  %v3304_v16 = vadd.f32 %v3303_v53, %v3292_v40 }
 0xa0a   :  { %8330 = vrsqrt.f32 %v3271_v23 }
 0xa0b   :  { %8332 = vrsqrt.f32 %v3270_v27  ;;  %v3305_v60 = vadd.f32 %v3303_v53, %v3293_v51  ;;  %v3294_v14 = vmul.f32 %v3291_v32, %v3282_v59 }
 0xa0c   :  { %v8325_v29 = vpop.eup %8324 }
 0xa0d   :  { %v3283_v61 = vmul.f32 %v8325_v29, %v9868_v50  ;;  %v3312_v58 = vpack.c.bf16 %v3305_v60, %v3304_v16  ;;  %v3306_v45 = vadd.f32 %v3303_v53, %v3294_v14 }
 0xa0f   :  { %v3295_v17 = vmul.f32 %v3291_v32, %v3283_v61  ;;  %7740 = vmatprep.mubr.msk.bf16.mxu0 %vm513_vm1, %v3312_v58 }
 0xa10   :  { %v8327_v15 = vpop.eup %8326 }
 0xa11   :  { %v8329_v49 = vpop.eup %8328  ;;  %v3307_v43 = vadd.f32 %v3303_v53, %v3295_v17  ;;  %v3285_v57 = vmul.f32 %v8327_v15, %v9865_v20 }
 0xa12   :  { %v3284_v19 = vmul.f32 %v8329_v49, %v9877_v56 }
 0xa13   :  { %v3313_v11 = vpack.c.bf16 %v3307_v43, %v3306_v45  ;;  %v3297_v52 = vmul.f32 %v3291_v32, %v3285_v57 }
 0xa14   :  { %v8331_v35 = vpop.eup %8330  ;;  %v3296_v0 = vmul.f32 %v3291_v32, %v3284_v19 }
 0xa15   :  { %v8333_v9 = vpop.eup %8332  ;;  %7741 = vmatmul.mubr.msk.bf16.vlgmr.msra.gmra.mrb[60].mxu0 %vm513_vm1, %v3313_v11  ;;  %v3309_v50 = vadd.f32 %v3303_v53, %v3297_v52  ;;  %v3287_v5 = vmul.f32 %v8331_v35, %v9874_v26  ;;  %v8123_v26 = vld [vmem:[%s11043_s7 + $0x8] sm:$0xff]  }
 0xa16   :  { %v3308_v21 = vadd.f32 %v3303_v53, %v3296_v0  ;;  %v3286_v33 = vmul.f32 %v8333_v9, %v9885_v39  ;;  %7750 = vmatprep.subr.bf16.mxu1 %v8123_v26  ;;  %v8124_v39 = vld [vmem:[%s11043_s7 + $0x10] sm:$0xff]  }
 0xa17   :  { %v3299_v12 = vmul.f32 %v3291_v32, %v3287_v5  ;;  %7751 = vmatpush3.bf16.msra.mxu1 %v8123_v26 }
 0xa18   :  { %v3314_v42 = vpack.c.bf16 %v3309_v50, %v3308_v21  ;;  %v3298_v22 = vmul.f32 %v3291_v32, %v3286_v33  ;;  %7752 = vmatprep.subr.bf16.mxu1 %v8124_v39 }
 0xa19   :  { %v3311_v37 = vadd.f32 %v3303_v53, %v3299_v12 }
 0xa1a   :  { %7744 = vmatprep.mubr.msk.bf16.mxu0 %vm513_vm1, %v3314_v42  ;;  %v3310_v20 = vadd.f32 %v3303_v53, %v3298_v22 }
 0xa1b   :  { %7753 = vmatpush3.bf16.msra.mxu1 %v8124_v39 }
 0xa1c   :  { %v3315_v56 = vpack.c.bf16 %v3311_v37, %v3310_v20  ;;  %7754 = vmatprep.subr.bf16.mxu1 %v8125_v36 }
 0xa1e   :  { %7745 = vmatmul.mubr.msk.bf16.gmra.mrb[64].mxu0 %vm513_vm1, %v3315_v56 }
 0xa1f   :  { %7755 = vmatpush3.bf16.msra.mxu1 %v8125_v36 }
 0xae8   :  { %v7742_v32 = vpop.f32.mrb[60].mxu0 }
 0xae9   :  { %v9936_v28 = vadd.f32 %v7742_v32, %v7035_v41  ;;  %v3385_v38 = vpop.f32.mrb[61].mxu0 }
 0xaea   :  { %v9938_v47 = vadd.f32 %v7035_v41, %v3385_v38  ;;  %v7743_v54 = vpop.f32.mrb[62].mxu0 }
 0xaeb   :  { %v3426_v7 = vmul.f32 0.044715, %v9936_v28  ;;  %v9941_v62 = vadd.f32 %v7743_v54, %v7035_v41  ;;  %v3388_v55 = vpop.f32.mrb[63].mxu0 }
 0xaec   :  { %v3424_v25 = vmul.f32 0.044715, %v9938_v47  ;;  %v9944_v13 = vadd.f32 %v7035_v41, %v3388_v55 }
 0xaed   :  { %v3434_v4 = vmul.f32 %v3426_v7, %v9936_v28  ;;  %v3427_v40 = vmul.f32 0.044715, %v9941_v62 }
 0xaee   :  { %v3432_v53 = vmul.f32 %v3424_v25, %v9938_v47  ;;  %v3425_v34 = vmul.f32 0.044715, %v9944_v13 }
 0xaef   :  { %v3442_v23 = vmul.f32 %v3434_v4, %v9936_v28  ;;  %v3435_v27 = vmul.f32 %v3427_v40, %v9941_v62 }
 0xaf0   :  { %v3440_v59 = vmul.f32 %v3432_v53, %v9938_v47  ;;  %v3433_v51 = vmul.f32 %v3425_v34, %v9944_v13 }
 0xaf1   :  { %v3450_v16 = vadd.f32 %v3442_v23, %v9936_v28  ;;  %v3443_v60 = vmul.f32 %v3435_v27, %v9941_v62  ;;  %v7746_v29 = vpop.f32.mrb[64].mxu0  ;;  %v3418_v27 = vmul.f32 0.5, %v9936_v28 }
 0xaf2   :  { %v3448_v14 = vadd.f32 %v3440_v59, %v9938_v47  ;;  %v3441_v61 = vmul.f32 %v3433_v51, %v9944_v13  ;;  %v9958_v58 = vadd.f32 %v7746_v29, %v7035_v41  ;;  %v3401_v17 = vpop.f32.mrb[65].mxu0  ;;  %v3419_v59 = vmul.f32 0.5, %v9941_v62 }
 0xaf3   :  { %v3458_v15 = vmul.f32 0.7978846, %v3450_v16  ;;  %v3451_v49 = vadd.f32 %v3443_v60, %v9941_v62  ;;  %v9961_v45 = vadd.f32 %v7035_v41, %v3401_v17  ;;  %v7747_v43 = vpop.f32.mrb[66].mxu0  ;;  %v3416_v16 = vmul.f32 0.5, %v9938_v47 }
 0xaf4   :  { %v3456_v57 = vmul.f32 0.7978846, %v3448_v14  ;;  %v3449_v19 = vadd.f32 %v3441_v61, %v9944_v13  ;;  %v3430_v11 = vmul.f32 0.044715, %v9958_v58  ;;  %v3413_v52 = vadd.f32 %v7747_v43, %v7035_v41  ;;  %v3404_v35 = vpop.f32.mrb[67].mxu0 }
 0xaf5   :  { %8334 = vtanh.f32 %v3458_v15  ;;  %v3459_v0 = vmul.f32 0.7978846, %v3451_v49  ;;  %v3428_v9 = vmul.f32 0.044715, %v9961_v45  ;;  %v3405_v50 = vadd.f32 %v7035_v41, %v3404_v35 }
 0xaf6   :  { %8336 = vtanh.f32 %v3456_v57  ;;  %v3457_v5 = vmul.f32 0.7978846, %v3449_v19  ;;  %v3438_v21 = vmul.f32 %v3430_v11, %v9958_v58  ;;  %v3431_v33 = vmul.f32 0.044715, %v3413_v52 }
 0xaf7   :  { %8338 = vtanh.f32 %v3459_v0  ;;  %v3436_v12 = vmul.f32 %v3428_v9, %v9961_v45  ;;  %v3429_v42 = vmul.f32 0.044715, %v3405_v50  ;;  %v3417_v60 = vmul.f32 0.5, %v9944_v13 }
 0xaf8   :  { %8340 = vtanh.f32 %v3457_v5  ;;  %v3446_v22 = vmul.f32 %v3438_v21, %v9958_v58  ;;  %v3439_v37 = vmul.f32 %v3431_v33, %v3413_v52  ;;  %v3422_v13 = vmul.f32 0.5, %v9958_v58 }
 0xaf9   :  { %v3444_v20 = vmul.f32 %v3436_v12, %v9961_v45  ;;  %v3437_v56 = vmul.f32 %v3429_v42, %v3405_v50  ;;  %v3423_v35 = vmul.f32 0.5, %v3413_v52  ;;  %v3420_v9 = vmul.f32 0.5, %v9961_v45 }
 0xafa   :  { %v3454_v44 = vadd.f32 %v3446_v22, %v9958_v58  ;;  %v3447_v26 = vmul.f32 %v3439_v37, %v3413_v52  ;;  %v3421_v5 = vmul.f32 0.5, %v3405_v50 }
 0xafb   :  { %v3452_v39 = vadd.f32 %v3444_v20, %v9961_v45  ;;  %v3445_v36 = vmul.f32 %v3437_v56, %v3405_v50  ;;  %v11063_v56 = vsub.s32 5, %v8881_v3 }
 0xafc   :  { %v3462_v41 = vmul.f32 0.7978846, %v3454_v44  ;;  %v3455_v32 = vadd.f32 %v3447_v26, %v3413_v52 }
 0xafd   :  { %v3460_v38 = vmul.f32 0.7978846, %v3452_v39  ;;  %v3453_v54 = vadd.f32 %v3445_v36, %v3405_v50  ;;  %v3503_v58 = vrot.slane %v9794_v31, %v11063_v56 }
 0xafe   :  { %8342 = vtanh.f32 %v3462_v41  ;;  %v3463_v7 = vmul.f32 0.7978846, %v3455_v32 }
 0xaff   :  { %v8335_v55 = vpop.eup %8334  ;;  %8344 = vtanh.f32 %v3460_v38  ;;  %v3461_v25 = vmul.f32 0.7978846, %v3453_v54 }
 0xb00   :  { %v8337_v4 = vpop.eup %8336  ;;  %8346 = vtanh.f32 %v3463_v7  ;;  %v3474_v40 = vadd.f32 1.0, %v8335_v55 }
 0xb01   :  { %v8339_v53 = vpop.eup %8338  ;;  %8348 = vtanh.f32 %v3461_v25  ;;  %v3472_v34 = vadd.f32 1.0, %v8337_v4 }
 0xb02   :  { %v8341_v23 = vpop.eup %8340  ;;  %v3475_v51 = vadd.f32 1.0, %v8339_v53  ;;  %v3482_v14 = vmul.f32 %v3474_v40, %v3418_v27 }
 0xb03   :  { %v3473_v29 = vadd.f32 1.0, %v8341_v23  ;;  %v3480_v17 = vmul.f32 %v3472_v34, %v3416_v16 }
 0xb04   :  { %v3483_v61 = vmul.f32 %v3475_v51, %v3419_v59 }
 0xb05   :  { %v3481_v15 = vmul.f32 %v3473_v29, %v3417_v60 }
 0xb06   :  { %v3489_v49 = vpack.c.bf16 %v3483_v61, %v3482_v14 }
 0xb07   :  { %v3488_v43 = vpack.c.bf16 %v3481_v15, %v3480_v17 }
 0xb08   :  { %v8343_v57 = vpop.eup %8342 }
 0xb09   :  { %v8345_v19 = vpop.eup %8344  ;;  %7756 = vmatprep.mubr.msk.bf16.mxu1 %vm3528_vm12, %v3488_v43  ;;  %v3478_v28 = vadd.f32 1.0, %v8343_v57 }
 0xb0a   :  { %v8347_v11 = vpop.eup %8346  ;;  %7757 = vmatmul.mubr.msk.bf16.vlgmr.msra.gmra.mrb[84].mxu1 %vm3528_vm12, %v3489_v49  ;;  %v3476_v62 = vadd.f32 1.0, %v8345_v19 }
 0xb0b   :  { %v8349_v47 = vpop.eup %8348  ;;  %v3479_v0 = vadd.f32 1.0, %v8347_v11  ;;  %v3486_v33 = vmul.f32 %v3478_v28, %v3422_v13 }
 0xb0c   :  { %v3477_v21 = vadd.f32 1.0, %v8349_v47  ;;  %v3484_v42 = vmul.f32 %v3476_v62, %v3420_v9 }
 0xb0d   :  { %v3487_v12 = vmul.f32 %v3479_v0, %v3423_v35 }
 0xb0e   :  { %v3485_v22 = vmul.f32 %v3477_v21, %v3421_v5 }
 0xb0f   :  { %v3491_v37 = vpack.c.bf16 %v3487_v12, %v3486_v33 }
 0xb10   :  { %v3490_v20 = vpack.c.bf16 %v3485_v22, %v3484_v42 }
 0xb12   :  { %7760 = vmatprep.mubr.msk.bf16.mxu1 %vm3528_vm12, %v3490_v20 }
 0xb13   :  { %7761 = vmatmul.mubr.msk.bf16.gmra.mrb[88].mxu1 %vm3528_vm12, %v3491_v37 }
 0xbdd   :  { %v7758_v52 = vpop.f32.mrb[84].mxu1 }
 0xbde   :  { %v3575_v45 = vpop.f32.mrb[85].mxu1  ;;  %v3584_v50 = vadd.f32 %v7758_v52, %v3503_v58 }
 0xbdf   :  { %v3576_v44 = vadd.f32 %v3575_v45, %v3503_v58  ;;  %v7759_v26 = vpop.f32.mrb[86].mxu1 }
 0xbe0   :  { %v3578_v39 = vpop.f32.mrb[87].mxu1  ;;  %v3587_v41 = vadd.f32 %v7759_v26, %v3503_v58  ;;  %v9990_v38 = vadd.f32 %v3584_v50, %v9810_v18 }
 0xbe1   :  { %v9987_v36 = vadd.f32 %v3576_v44, %v9806_v63  ;;  %v3579_v32 = vadd.f32 %v3578_v39, %v3503_v58 }
 0xbe2   :  { %v9998_v7 = vadd.f32 %v3587_v41, %v9821_v1  ;;  %v3622_v18 = vsel %vm513_vm1, %v9990_v38, 0.0 }
 0xbe3   :  { %v9993_v54 = vadd.f32 %v3579_v32, %v9814_v48  ;;  %v3616_v31 = vsel %vm513_vm1, %v9987_v36, 0.0 }
 0xbe4   :  { %3617 = vadd.xlane.f32.xlu0 %v3616_v31  ;;  %v3625_v34 = vsel %vm513_vm1, %v9998_v7, 0.0 }
 0xbe5   :  { %v3619_v55 = vsel %vm513_vm1, %v9993_v54, 0.0 }
 0xbe6   :  { %v7762_v63 = vpop.f32.mrb[88].mxu1  ;;  %3620 = vadd.xlane.f32.xlu1 %v3619_v55 }
 0xbe7   :  { %v3591_v25 = vpop.f32.mrb[89].mxu1  ;;  %v3600_v4 = vadd.f32 %v7762_v63, %v3503_v58 }
 0xbe8   :  { %v3592_v40 = vadd.f32 %v3591_v25, %v3503_v58  ;;  %v7763_v48 = vpop.f32.mrb[90].mxu1  ;;  %3623 = vadd.xlane.f32.xlu0 %v3622_v18 }
 0xbe9   :  { %v3594_v53 = vpop.f32.mrb[91].mxu1  ;;  %v3603_v23 = vadd.f32 %v7763_v48, %v3503_v58  ;;  %v10010_v59 = vadd.f32 %v3600_v4, %v9841_v8  ;;  %v8126_v4 = vld [vmem:[%s11040_s4 + $0x80] sm:$0xff]   ;;  %v8128_v48 = vld [vmem:[%s11040_s4 + $0x88] sm:$0xff]  }
 0xbea   :  { %v10007_v1 = vadd.f32 %v3592_v40, %v9834_v2  ;;  %v3595_v27 = vadd.f32 %v3594_v53, %v3503_v58  ;;  %3626 = vadd.xlane.f32.xlu1 %v3625_v34  ;;  %v8127_v40 = vld [vmem:[%s11040_s4 + $0xa0] sm:$0xff]   ;;  %7764 = vmatprep.subr.bf16.mxu0 %v8126_v4  ;;  %v8129_v53 = vld [vmem:[%s11040_s4 + $0xa8] sm:$0xff]   ;;  %v10089_v34 = vld [vmem:[%s11040_s4 + $0x90] sm:$0xff]  }
 0xbeb   :  { %11082 = vst [vmem:[#allocation8_spill] sm:$0xff] %v10010_v59  ;;  %v10018_v60 = vadd.f32 %v3603_v23, %v9829_v46  ;;  %v3634_v29 = vsel %vm513_vm1, %v10010_v59, 0.0  ;;  %7780 = vmatprep.subr.bf16.mxu1 %v8127_v40  ;;  %7765 = vmatpush3.bf16.msra.mxu0 %v8126_v4  ;;  %v10094_v23 = vld [vmem:[%s11040_s4 + $0xc0] sm:$0xff]  }
 0xbec   :  { %11081 = vst [vmem:[#allocation7_spill] sm:$0xff] %v10007_v1  ;;  %v10013_v51 = vadd.f32 %v3595_v27, %v9824_v24  ;;  %v3628_v16 = vsel %vm513_vm1, %v10007_v1, 0.0  ;;  %7781 = vmatpush3.bf16.msra.mxu1 %v8127_v40  ;;  %7766 = vmatprep.subr.bf16.mxu0 %v8128_v48 }
 0xbed   :  { %3629 = vadd.xlane.f32.xlu0 %v3628_v16  ;;  %11084 = vst [vmem:[#allocation14_spill] sm:$0xff] %v10018_v60  ;;  %v3637_v8 = vsel %vm513_vm1, %v10018_v60, 0.0  ;;  %7782 = vmatprep.subr.bf16.mxu1 %v8129_v53 }
 0xbee   :  { %11083 = vst [vmem:[#allocation13_spill] sm:$0xff] %v10013_v51  ;;  %v3631_v2 = vsel %vm513_vm1, %v10013_v51, 0.0 }
 0xbef   :  { %3632 = vadd.xlane.f32.xlu1 %v3631_v2  ;;  %7767 = vmatpush3.bf16.msra.mxu0 %v8128_v48 }
 0xbf0   :  { %7783 = vmatpush3.bf16.msra.mxu1 %v8129_v53  ;;  %7772 = vmatprep.subr.bf16.mxu0 %v10089_v34 }
 0xbf1   :  { %3635 = vadd.xlane.f32.xlu0 %v3634_v29  ;;  %7796 = vmatprep.subr.bf16.mxu1 %v10094_v23 }
 0xbf3   :  { %3638 = vadd.xlane.f32.xlu1 %v3637_v8 }
 0xc71   :  { %v3618_v24 = vpop.xlane.xlu0 %3617 }
 0xc72   :  { %v3640_v14 = vmul.f32 0.03125, %v3618_v24 }
 0xc73   :  { %v3621_v61 = vpop.xlane.xlu1 %3620 }
 0xc74   :  { %v10027_v17 = vsub.f32 %v9987_v36, %v3640_v14  ;;  %v3641_v46 = vmul.f32 0.03125, %v3621_v61 }
 0xc75   :  { %v3624_v15 = vpop.xlane.xlu0 %3623 }
 0xc76   :  { %v10030_v49 = vsub.f32 %v9993_v54, %v3641_v46  ;;  %v3642_v43 = vmul.f32 0.03125, %v3624_v15  ;;  %v3656_v57 = vmul.f32 %v10027_v17, %v10027_v17 }
 0xc77   :  { %v3627_v19 = vpop.xlane.xlu1 %3626 }
 0xc78   :  { %v10035_v28 = vsub.f32 %v9990_v38, %v3642_v43  ;;  %v3643_v11 = vmul.f32 0.03125, %v3627_v19  ;;  %v3664_v62 = vsel %vm513_vm1, %v3656_v57, 0.0  ;;  %v3657_v47 = vmul.f32 %v10030_v49, %v10030_v49 }
 0xc79   :  { %3665 = vadd.xlane.f32.xlu0 %v3664_v62  ;;  %v7050_v62 = vld [vmem:[%s11044_s8 + $0x8] sm:$0x3f] }
 0xc7a   :  { %v10041_v13 = vsub.f32 %v9998_v7, %v3643_v11  ;;  %v3630_v35 = vpop.xlane.xlu0 %3629  ;;  %v3667_v0 = vsel %vm513_vm1, %v3657_v47, 0.0  ;;  %v3658_v9 = vmul.f32 %v10035_v28, %v10035_v28 }
 0xc7b   :  { %v3644_v5 = vmul.f32 0.03125, %v3630_v35  ;;  %3668 = vadd.xlane.f32.xlu1 %v3667_v0 }
 0xc7c   :  { %v3633_v21 = vpop.xlane.xlu1 %3632  ;;  %v3670_v33 = vsel %vm513_vm1, %v3658_v9, 0.0  ;;  %v3659_v12 = vmul.f32 %v10041_v13, %v10041_v13 }
 0xc7d   :  { %v10050_v42 = vsub.f32 %v10007_v1, %v3644_v5  ;;  %v3645_v22 = vmul.f32 0.03125, %v3633_v21  ;;  %3671 = vadd.xlane.f32.xlu0 %v3670_v33  ;;  %v11085_v5 = vld [vmem:[#allocation5_spill] sm:$0xff] }
 0xc7e   :  { %v3636_v37 = vpop.xlane.xlu0 %3635  ;;  %v3673_v20 = vsel %vm513_vm1, %v3659_v12, 0.0  ;;  %v3723_v21 = vrot.slane %v7050_v62, %v11085_v5  ;;  %v8137_v5 = vld [vmem:[%s11040_s4 + $0xe8] sm:$0xff]  }
 0xc7f   :  { %v10054_v58 = vsub.f32 %v10013_v51, %v3645_v22  ;;  %v3646_v52 = vmul.f32 0.03125, %v3636_v37  ;;  %3674 = vadd.xlane.f32.xlu1 %v3673_v20  ;;  %v3660_v45 = vmul.f32 %v10050_v42, %v10050_v42 }
 0xc80   :  { %v3639_v50 = vpop.xlane.xlu1 %3638 }
 0xc81   :  { %v10059_v44 = vsub.f32 %v10010_v59, %v3646_v52  ;;  %v3647_v26 = vmul.f32 0.03125, %v3639_v50  ;;  %v3676_v39 = vsel %vm513_vm1, %v3660_v45, 0.0  ;;  %v3661_v41 = vmul.f32 %v10054_v58, %v10054_v58 }
 0xc82   :  { %3677 = vadd.xlane.f32.xlu0 %v3676_v39 }
 0xc83   :  { %v10065_v32 = vsub.f32 %v10018_v60, %v3647_v26  ;;  %v3679_v31 = vsel %vm513_vm1, %v3661_v41, 0.0  ;;  %v3662_v55 = vmul.f32 %v10059_v44, %v10059_v44  ;;  %v11086_v26 = vld [vmem:[#allocation6_spill] sm:$0xff] }
 0xc84   :  { %3680 = vadd.xlane.f32.xlu1 %v3679_v31  ;;  %v3735_v39 = vrot.slane %v7050_v62, %v11086_v26 }
 0xc85   :  { %v3682_v63 = vsel %vm513_vm1, %v3662_v55, 0.0  ;;  %v3663_v25 = vmul.f32 %v10065_v32, %v10065_v32 }
 0xc86   :  { %3683 = vadd.xlane.f32.xlu0 %v3682_v63 }
 0xc87   :  { %v3685_v18 = vsel %vm513_vm1, %v3663_v25, 0.0 }
 0xc88   :  { %3686 = vadd.xlane.f32.xlu1 %v3685_v18 }
 0xd06   :  { %v3666_v27 = vpop.xlane.xlu0 %3665 }
 0xd07   :  { %v3688_v16 = vmul.f32 0.03125, %v3666_v27 }
 0xd08   :  { %v3669_v2 = vpop.xlane.xlu1 %3668 }
 0xd09   :  { %v3696_v29 = vadd.f32 1e-05, %v3688_v16  ;;  %v3689_v8 = vmul.f32 0.03125, %v3669_v2 }
 0xd0a   :  { %v3672_v24 = vpop.xlane.xlu0 %3671 }
 0xd0b   :  { %8350 = vrsqrt.f32 %v3696_v29  ;;  %v3697_v14 = vadd.f32 1e-05, %v3689_v8  ;;  %v3690_v61 = vmul.f32 0.03125, %v3672_v24 }
 0xd0c   :  { %v3675_v46 = vpop.xlane.xlu1 %3674 }
 0xd0d   :  { %8352 = vrsqrt.f32 %v3697_v14  ;;  %v3698_v15 = vadd.f32 1e-05, %v3690_v61  ;;  %v3691_v43 = vmul.f32 0.03125, %v3675_v46 }
 0xd0f   :  { %8354 = vrsqrt.f32 %v3698_v15  ;;  %v3699_v57 = vadd.f32 1e-05, %v3691_v43  ;;  %v3678_v19 = vpop.xlane.xlu0 %3677 }
 0xd10   :  { %v3692_v11 = vmul.f32 0.03125, %v3678_v19 }
 0xd11   :  { %8356 = vrsqrt.f32 %v3699_v57  ;;  %v3681_v47 = vpop.xlane.xlu1 %3680 }
 0xd12   :  { %v3700_v35 = vadd.f32 1e-05, %v3692_v11  ;;  %v3693_v0 = vmul.f32 0.03125, %v3681_v47 }
 0xd13   :  { %v3684_v9 = vpop.xlane.xlu0 %3683 }
 0xd14   :  { %8358 = vrsqrt.f32 %v3700_v35  ;;  %v3701_v33 = vadd.f32 1e-05, %v3693_v0  ;;  %v3694_v12 = vmul.f32 0.03125, %v3684_v9  ;;  %v8135_v0 = vld [vmem:[%s11040_s4 + $0xe0] sm:$0xff]   ;;  %v8136_v9 = vld [vmem:[%s11040_s4 + $0xb8] sm:$0xff]  }
 0xd15   :  { %v8351_v22 = vpop.eup %8350  ;;  %v3687_v37 = vpop.xlane.xlu1 %3686 }
 0xd16   :  { %8360 = vrsqrt.f32 %v3701_v33  ;;  %v3702_v20 = vadd.f32 1e-05, %v3694_v12  ;;  %v3695_v52 = vmul.f32 0.03125, %v3687_v37  ;;  %v3712_v45 = vmul.f32 %v8351_v22, %v10027_v17  ;;  %v8139_v33 = vld [vmem:[%s11040_s4 + $0xd8] sm:$0xff]   ;;  %v8140_v12 = vld [vmem:[%s11040_s4 + $0xf0] sm:$0xff]  }
 0xd17   :  { %v8353_v50 = vpop.eup %8352  ;;  %v8141_v22 = vld [vmem:[%s11040_s4 + $0xf8] sm:$0xff]  }
 0xd18   :  { %8362 = vrsqrt.f32 %v3702_v20  ;;  %v3703_v41 = vadd.f32 1e-05, %v3695_v52  ;;  %v3713_v31 = vmul.f32 %v8353_v50, %v10030_v49  ;;  %v3724_v55 = vmul.f32 %v3723_v21, %v3712_v45 }
 0xd19   :  { %v8355_v63 = vpop.eup %8354 }
 0xd1a   :  { %v3714_v25 = vmul.f32 %v8355_v63, %v10035_v28  ;;  %8364 = vrsqrt.f32 %v3703_v41  ;;  %v3725_v18 = vmul.f32 %v3723_v21, %v3713_v31  ;;  %v3736_v53 = vadd.f32 %v3735_v39, %v3724_v55 }
 0xd1b   :  { %v8357_v4 = vpop.eup %8356 }
 0xd1c   :  { %v3726_v40 = vmul.f32 %v3723_v21, %v3714_v25  ;;  %v3715_v48 = vmul.f32 %v8357_v4, %v10041_v13  ;;  %v3737_v27 = vadd.f32 %v3735_v39, %v3725_v18  ;;  %v8132_v13 = vld [vmem:[%s11040_s4 + $0x98] sm:$0xff]  }
 0xd1e   :  { %v8359_v17 = vpop.eup %8358  ;;  %v3727_v16 = vmul.f32 %v3723_v21, %v3715_v48  ;;  %v3744_v2 = vpack.c.bf16 %v3737_v27, %v3736_v53  ;;  %v3738_v24 = vadd.f32 %v3735_v39, %v3726_v40 }
 0xd1f   :  { %v3716_v29 = vmul.f32 %v8359_v17, %v10050_v42  ;;  %v8133_v42 = vld [vmem:[%s11040_s4 + $0xc8] sm:$0xff]  }
 0xd20   :  { %v8361_v8 = vpop.eup %8360  ;;  %v3739_v49 = vadd.f32 %v3735_v39, %v3727_v16  ;;  %7768 = vmatprep.mubr.msk.bf16.mxu0 %vm513_vm1, %v3744_v2  ;;  %7784 = vmatprep.mubr.msk.bf16.mxu1 %vm513_vm1, %v3744_v2 }
 0xd21   :  { %v3717_v28 = vmul.f32 %v8361_v8, %v10054_v58  ;;  %v3728_v14 = vmul.f32 %v3723_v21, %v3716_v29 }
 0xd22   :  { %v8363_v61 = vpop.eup %8362  ;;  %v3745_v46 = vpack.c.bf16 %v3739_v49, %v3738_v24 }
 0xd23   :  { %v3718_v15 = vmul.f32 %v8363_v61, %v10059_v44  ;;  %v3729_v43 = vmul.f32 %v3723_v21, %v3717_v28  ;;  %v3740_v58 = vadd.f32 %v3735_v39, %v3728_v14  ;;  %v8134_v44 = vld [vmem:[%s11040_s4 + $0xb0] sm:$0xff]  }
 0xd24   :  { %v8365_v57 = vpop.eup %8364  ;;  %7769 = vmatmul.mubr.msk.bf16.vlgmr.msra.gmra.mrb[68].mxu0 %vm513_vm1, %v3745_v46  ;;  %7785 = vmatmul.mubr.msk.bf16.vlgmr.msra.gmra.mrb[92].mxu1 %vm513_vm1, %v3745_v46 }
 0xd25   :  { %v3730_v19 = vmul.f32 %v3723_v21, %v3718_v15  ;;  %v3719_v11 = vmul.f32 %v8365_v57, %v10065_v32  ;;  %7773 = vmatpush3.bf16.msra.mxu0 %v10089_v34  ;;  %7797 = vmatpush3.bf16.msra.mxu1 %v10094_v23  ;;  %v3741_v62 = vadd.f32 %v3735_v39, %v3729_v43 }
 0xd26   :  { %7800 = vmatprep.mubr.msk.bf16.mxu1 %vm513_vm1, %v3744_v2  ;;  %7774 = vmatprep.subr.bf16.mxu0 %v8132_v13 }
 0xd27   :  { %v3731_v47 = vmul.f32 %v3723_v21, %v3719_v11  ;;  %v3746_v35 = vpack.c.bf16 %v3741_v62, %v3740_v58  ;;  %7798 = vmatprep.subr.bf16.mxu1 %v8133_v42  ;;  %v3742_v32 = vadd.f32 %v3735_v39, %v3730_v19  ;;  %v8138_v21 = vld [vmem:[%s11040_s4 + $0xd0] sm:$0xff]  }
 0xd29   :  { %7776 = vmatprep.mubr.msk.bf16.mxu0 %vm513_vm1, %v3746_v35  ;;  %7775 = vmatpush3.bf16.msra.mxu0 %v8132_v13  ;;  %v3743_v34 = vadd.f32 %v3735_v39, %v3731_v47 }
 0xd2a   :  { %7799 = vmatpush3.bf16.msra.mxu1 %v8133_v42  ;;  %7788 = vmatprep.subr.bf16.mxu0 %v8134_v44 }
 0xd2b   :  { %v3747_v23 = vpack.c.bf16 %v3743_v34, %v3742_v32  ;;  %7812 = vmatprep.subr.bf16.mxu1 %v8135_v0 }
 0xd2d   :  { %7777 = vmatmul.mubr.msk.bf16.vlgmr.msra.gmra.mrb[72].mxu0 %vm513_vm1, %v3747_v23  ;;  %7801 = vmatmul.mubr.msk.bf16.vlgmr.msra.gmra.mrb[96].mxu1 %vm513_vm1, %v3745_v46 }
 0xd2e   :  { %7789 = vmatpush3.bf16.msra.mxu0 %v8134_v44  ;;  %7792 = vmatprep.mubr.msk.bf16.mxu0 %vm513_vm1, %v3746_v35 }
 0xd2f   :  { %7813 = vmatpush3.bf16.msra.mxu1 %v8135_v0  ;;  %7816 = vmatprep.mubr.msk.bf16.mxu1 %vm513_vm1, %v3744_v2 }
 0xd30   :  { %7790 = vmatprep.subr.bf16.mxu0 %v8136_v9  ;;  %7814 = vmatprep.subr.bf16.mxu1 %v8137_v5 }
 0xd32   :  { %7791 = vmatpush3.bf16.msra.mxu0 %v8136_v9 }
 0xd33   :  { %7815 = vmatpush3.bf16.msra.mxu1 %v8137_v5  ;;  %7804 = vmatprep.subr.bf16.mxu0 %v8138_v21 }
 0xd35   :  { %7793 = vmatmul.mubr.msk.bf16.vlgmr.msra.gmra.mrb[76].mxu0 %vm513_vm1, %v3747_v23 }
 0xd36   :  { %7817 = vmatmul.mubr.msk.bf16.vlgmr.msra.gmra.mrb[100].mxu1 %vm513_vm1, %v3745_v46  ;;  %7805 = vmatpush3.bf16.msra.mxu0 %v8138_v21 }
 0xd37   :  { %7808 = vmatprep.mubr.msk.bf16.mxu0 %vm513_vm1, %v3746_v35  ;;  %7806 = vmatprep.subr.bf16.mxu0 %v8139_v33 }
 0xd3a   :  { %7807 = vmatpush3.bf16.msra.mxu0 %v8139_v33 }
 0xd3b   :  { %7820 = vmatprep.subr.bf16.mxu0 %v8140_v12 }
 0xd3d   :  { %7809 = vmatmul.mubr.msk.bf16.vlgmr.msra.gmra.mrb[80].mxu0 %vm513_vm1, %v3747_v23 }
 0xd3e   :  { %7821 = vmatpush3.bf16.msra.mxu0 %v8140_v12  ;;  %7824 = vmatprep.mubr.msk.bf16.mxu0 %vm513_vm1, %v3746_v35 }
 0xd3f   :  { %7822 = vmatprep.subr.bf16.mxu0 %v8141_v22 }
 0xd42   :  { %7823 = vmatpush3.bf16.msra.mxu0 %v8141_v22 }
 0xd45   :  { %7825 = vmatmul.mubr.msk.bf16.vlgmr.msra.gmra.mrb[84].mxu0 %vm513_vm1, %v3747_v23 }
 0xdf7   :  { %v7770_v37 = vpop.f32.mrb[68].mxu0  ;;  %v7786_v20 = vpop.f32.mrb[92].mxu1 }
 0xdf8   :  { %v3833_v52 = vpop.f32.mrb[69].mxu0  ;;  %v3961_v45 = vpop.f32.mrb[93].mxu1 }
 0xdf9   :  { %v7771_v50 = vpop.f32.mrb[70].mxu0  ;;  %v7787_v26 = vpop.f32.mrb[94].mxu1 }
 0xdfa   :  { %v10159_v39 = vpack.c.bf16 %v7771_v50, %v7770_v37  ;;  %v10161_v41 = vpack.c.bf16 %v7787_v26, %v7786_v20  ;;  %v3836_v31 = vpop.f32.mrb[71].mxu0  ;;  %v3964_v55 = vpop.f32.mrb[95].mxu1 }
 0xdfb   :  { %v4281_v63 = vpack.c.bf16 %v3836_v31, %v3833_v52  ;;  %v10163_v25 = vpack.c.bf16 %v3964_v55, %v3961_v45 }
 0xdfc   :  { %4301 = vrot.lane.b32.xlu1 %v10159_v39, %s8555_s0 }
 0xdfd   :  { %4299 = vrot.lane.b32.xlu0 %v4281_v63, %s8555_s0  ;;  %7832 = vmatprep.mubr.msk.bf16.mxu1 %vm1201_vm2, %v4281_v63 }
 0xe00   :  { %v7778_v18 = vpop.f32.mrb[72].mxu0  ;;  %v7802_v4 = vpop.f32.mrb[96].mxu1 }
 0xe01   :  { %v3900_v40 = vpop.f32.mrb[73].mxu0  ;;  %v4083_v48 = vpop.f32.mrb[97].mxu1  ;;  %4433 = vrot.lane.b32.xlu0 %v10163_v25, %s8555_s0 }
 0xe02   :  { %v7803_v53 = vpop.f32.mrb[98].mxu1  ;;  %v7779_v27 = vpop.f32.mrb[74].mxu0 }
 0xe03   :  { %v10171_v17 = vpack.c.bf16 %v7803_v53, %v7802_v4  ;;  %v10173_v16 = vpack.c.bf16 %v7779_v27, %v7778_v18  ;;  %v3903_v2 = vpop.f32.mrb[75].mxu0  ;;  %v4086_v29 = vpop.f32.mrb[99].mxu1 }
 0xe04   :  { %v4283_v8 = vpack.c.bf16 %v3903_v2, %v3900_v40  ;;  %v10175_v24 = vpack.c.bf16 %v4086_v29, %v4083_v48 }
 0xe06   :  { %4366 = vrot.lane.b32.xlu1 %v4283_v8, %s8555_s0  ;;  %7840 = vmatprep.mubr.msk.bf16.mxu0 %vm1201_vm2, %v4283_v8 }
 0xe08   :  { %v7794_v49 = vpop.f32.mrb[76].mxu0 }
 0xe09   :  { %v7818_v28 = vpop.f32.mrb[100].mxu1  ;;  %v4022_v14 = vpop.f32.mrb[77].mxu0 }
 0xe0a   :  { %v4205_v61 = vpop.f32.mrb[101].mxu1  ;;  %4368 = vrot.lane.b32.xlu1 %v10173_v16, %s8555_s0  ;;  %v7795_v46 = vpop.f32.mrb[78].mxu0 }
 0xe0b   :  { %v7819_v13 = vpop.f32.mrb[102].mxu1  ;;  %v10181_v15 = vpack.c.bf16 %v7795_v46, %v7794_v49  ;;  %v4025_v43 = vpop.f32.mrb[79].mxu0 }
 0xe0c   :  { %v10183_v42 = vpack.c.bf16 %v7819_v13, %v7818_v28  ;;  %v10185_v57 = vpack.c.bf16 %v4025_v43, %v4022_v14  ;;  %v4208_v58 = vpop.f32.mrb[103].mxu1 }
 0xe0d   :  { %v10187_v19 = vpack.c.bf16 %v4208_v58, %v4205_v61 }
 0xe0e   :  { %4435 = vrot.lane.b32.xlu1 %v10161_v41, %s8555_s0  ;;  %4500 = vrot.lane.b32.xlu0 %v10185_v57, %s8555_s0 }
 0xe10   :  { %v7810_v11 = vpop.f32.mrb[80].mxu0 }
 0xe11   :  { %v4144_v62 = vpop.f32.mrb[81].mxu0 }
 0xe12   :  { %4502 = vrot.lane.b32.xlu1 %v10181_v15, %s8555_s0  ;;  %4567 = vrot.lane.b32.xlu0 %v10175_v24, %s8555_s0  ;;  %v7811_v44 = vpop.f32.mrb[82].mxu0 }
 0xe13   :  { %v10197_v47 = vpack.c.bf16 %v7811_v44, %v7810_v11  ;;  %v4147_v35 = vpop.f32.mrb[83].mxu0 }
 0xe14   :  { %v10199_v0 = vpack.c.bf16 %v4147_v35, %v4144_v62  ;;  %v11087_v62 = vld [vmem:[#allocation9_spill] sm:$0xff] }
 0xe16   :  { %4569 = vrot.lane.b32.xlu1 %v10171_v17, %s8555_s0  ;;  %4634 = vrot.lane.b32.xlu0 %v10199_v0, %s8555_s0 }
 0xe18   :  { %v7826_v32 = vpop.f32.mrb[84].mxu0 }
 0xe19   :  { %v4266_v34 = vpop.f32.mrb[85].mxu0 }
 0xe1a   :  { %4636 = vrot.lane.b32.xlu1 %v10197_v47, %s8555_s0  ;;  %4701 = vrot.lane.b32.xlu0 %v10187_v19, %s8555_s0  ;;  %v7827_v23 = vpop.f32.mrb[86].mxu0 }
 0xe1b   :  { %v10209_v9 = vpack.c.bf16 %v7827_v23, %v7826_v32  ;;  %v4269_v5 = vpop.f32.mrb[87].mxu0  ;;  %v11088_v32 = vld [vmem:[#allocation10_spill] sm:$0xff] }
 0xe1c   :  { %v10211_v21 = vpack.c.bf16 %v4269_v5, %v4266_v34 }
 0xe1e   :  { %4703 = vrot.lane.b32.xlu1 %v10183_v42, %s8555_s0  ;;  %4768 = vrot.lane.b32.xlu0 %v10211_v21, %s8555_s0 }
 0xe22   :  { %4770 = vrot.lane.b32.xlu1 %v10209_v9, %s8555_s0  ;;  %5201 = vrot.lane.b32.xlu0 %v4281_v63, %s8556_s19 }
 0xe26   :  { %5203 = vrot.lane.b32.xlu1 %v10159_v39, %s8556_s19  ;;  %5264 = vrot.lane.b32.xlu0 %v10173_v16, %s8556_s19 }
 0xe2a   :  { %5262 = vrot.lane.b32.xlu1 %v4283_v8, %s8556_s19  ;;  %5325 = vrot.lane.b32.xlu0 %v10161_v41, %s8556_s19 }
 0xe2e   :  { %5323 = vrot.lane.b32.xlu1 %v10163_v25, %s8556_s19  ;;  %5445 = vrot.lane.b32.xlu0 %v10175_v24, %s8556_s19 }
 0xe32   :  { %5384 = vrot.lane.b32.xlu1 %v10185_v57, %s8556_s19  ;;  %5386 = vrot.lane.b32.xlu0 %v10181_v15, %s8556_s19 }
 0xe36   :  { %5567 = vrot.lane.b32.xlu1 %v10187_v19, %s8556_s19  ;;  %5447 = vrot.lane.b32.xlu0 %v10171_v17, %s8556_s19 }
 0xe3a   :  { %5506 = vrot.lane.b32.xlu0 %v10199_v0, %s8556_s19 }
 0xe6e   :  { %v4302_v22 = vpop.permute.xlu1 %4301 }
 0xe6f   :  { %v4300_v33 = vpop.permute.xlu0 %4299  ;;  %v4313_v20 = vsel %vm1201_vm2, %v4302_v22, 0 }
 0xe70   :  { %8056 = vmatprep.subr.msk.bf16.mxu1 %vm1201_vm2, %v4300_v33  ;;  %v4310_v12 = vsel %vm1201_vm2, %v4300_v33, 0  ;;  %v11089_v33 = vld [vmem:[#allocation11_spill] sm:$0xff] }
 0xe71   :  { %7829 = vmatpush3.bf16.xpose.msra.mxu1 %v4310_v12 }
 0xe72   :  { %8057 = vmatprep.subr.msk.bf16.mxu1 %vm1201_vm2, %v4302_v22 }
 0xe73   :  { %v4434_v52 = vpop.permute.xlu0 %4433 }
 0xe74   :  { %v4444_v26 = vsel %vm1201_vm2, %v4434_v52, 0 }
 0xe78   :  { %v4367_v37 = vpop.permute.xlu1 %4366 }
 0xe79   :  { %8058 = vmatprep.subr.msk.bf16.mxu0 %vm1201_vm2, %v4367_v37  ;;  %7831 = vmatpush3.bf16.xpose.msra.mxu1 %v4313_v20  ;;  %v4377_v45 = vsel %vm1201_vm2, %v4367_v37, 0  ;;  %v11090_v37 = vld [vmem:[#allocation12_spill] sm:$0xff] }
 0xe7a   :  { %7837 = vmatpush3.bf16.xpose.msra.mxu0 %v4377_v45  ;;  %8060 = vmatprep.subr.msk.bf16.mxu1 %vm1201_vm2, %v4434_v52 }
 0xe7c   :  { %v4369_v50 = vpop.permute.xlu1 %4368 }
 0xe7d   :  { %8059 = vmatprep.subr.msk.bf16.mxu0 %vm1201_vm2, %v4369_v50  ;;  %v4380_v55 = vsel %vm1201_vm2, %v4369_v50, 0 }
 0xe80   :  { %7833 = vmatmul.mubr.msk.bf16.vlgmr.msra.gmra.mrb[104].mxu1 %vm1201_vm2, %v10159_v39  ;;  %v4436_v31 = vpop.permute.xlu1 %4435  ;;  %v4501_v63 = vpop.permute.xlu0 %4500 }
 0xe81   :  { %7845 = vmatpush3.bf16.xpose.msra.mxu1 %v4444_v26  ;;  %7848 = vmatprep.mubr.msk.bf16.mxu1 %vm1201_vm2, %v10163_v25  ;;  %v4447_v18 = vsel %vm1201_vm2, %v4436_v31, 0  ;;  %v4511_v39 = vsel %vm1201_vm2, %v4501_v63, 0 }
 0xe82   :  { %7839 = vmatpush3.bf16.xpose.msra.mxu0 %v4380_v55  ;;  %8061 = vmatprep.subr.msk.bf16.mxu1 %vm1201_vm2, %v4436_v31 }
 0xe83   :  { %8062 = vmatprep.subr.msk.bf16.mxu0 %vm1201_vm2, %v4501_v63 }
 0xe84   :  { %v4503_v4 = vpop.permute.xlu1 %4502  ;;  %v4568_v40 = vpop.permute.xlu0 %4567 }
 0xe85   :  { %v4578_v25 = vsel %vm1201_vm2, %v4568_v40, 0  ;;  %v4514_v53 = vsel %vm1201_vm2, %v4503_v4, 0 }
 0xe88   :  { %v4570_v48 = vpop.permute.xlu1 %4569  ;;  %v4635_v27 = vpop.permute.xlu0 %4634 }
 0xe89   :  { %7841 = vmatmul.mubr.msk.bf16.vlgmr.msra.gmra.mrb[88].mxu0 %vm1201_vm2, %v10173_v16  ;;  %7847 = vmatpush3.bf16.xpose.msra.mxu1 %v4447_v18  ;;  %v4581_v2 = vsel %vm1201_vm2, %v4570_v48, 0 }
 0xe8a   :  { %7853 = vmatpush3.bf16.xpose.msra.mxu0 %v4511_v39  ;;  %7856 = vmatprep.mubr.msk.bf16.mxu0 %vm1201_vm2, %v10185_v57 }
 0xe8b   :  { %8063 = vmatprep.subr.msk.bf16.mxu0 %vm1201_vm2, %v4503_v4  ;;  %8064 = vmatprep.subr.msk.bf16.mxu1 %vm1201_vm2, %v4568_v40 }
 0xe8c   :  { %v4637_v16 = vpop.permute.xlu1 %4636  ;;  %v4702_v29 = vpop.permute.xlu0 %4701 }
 0xe8d   :  { %v4648_v49 = vsel %vm1201_vm2, %v4637_v16, 0 }
 0xe90   :  { %7849 = vmatmul.mubr.msk.bf16.vlgmr.msra.gmra.mrb[108].mxu1 %vm1201_vm2, %v10161_v41  ;;  %v4645_v41 = vsel %vm1201_vm2, %v4635_v27, 0  ;;  %v4704_v8 = vpop.permute.xlu1 %4703  ;;  %v4769_v28 = vpop.permute.xlu0 %4768 }
 0xe91   :  { %7861 = vmatpush3.bf16.xpose.msra.mxu1 %v4578_v25  ;;  %7864 = vmatprep.mubr.msk.bf16.mxu1 %vm1201_vm2, %v10175_v24  ;;  %v4712_v24 = vsel %vm1201_vm2, %v4702_v29, 0  ;;  %v4715_v61 = vsel %vm1201_vm2, %v4704_v8, 0 }
 0xe92   :  { %7855 = vmatpush3.bf16.xpose.msra.mxu0 %v4514_v53  ;;  %8065 = vmatprep.subr.msk.bf16.mxu1 %vm1201_vm2, %v4570_v48 }
 0xe93   :  { %8066 = vmatprep.subr.msk.bf16.mxu0 %vm1201_vm2, %v4635_v27 }
 0xe94   :  { %v4771_v14 = vpop.permute.xlu1 %4770  ;;  %v5202_v13 = vpop.permute.xlu0 %5201 }
 0xe95   :  { %v4782_v43 = vsel %vm1201_vm2, %v4771_v14, 0 }
 0xe98   :  { %v5204_v46 = vpop.permute.xlu1 %5203  ;;  %v5265_v58 = vpop.permute.xlu0 %5264 }
 0xe99   :  { %7857 = vmatmul.mubr.msk.bf16.vlgmr.msra.gmra.mrb[92].mxu0 %vm1201_vm2, %v10181_v15  ;;  %7863 = vmatpush3.bf16.xpose.msra.mxu1 %v4581_v2 }
 0xe9a   :  { %7869 = vmatpush3.bf16.xpose.msra.mxu0 %v4645_v41  ;;  %7872 = vmatprep.mubr.msk.bf16.mxu0 %vm1201_vm2, %v10199_v0 }
 0xe9b   :  { %8067 = vmatprep.subr.msk.bf16.mxu0 %vm1201_vm2, %v4637_v16  ;;  %8068 = vmatprep.subr.msk.bf16.mxu1 %vm1201_vm2, %v4702_v29 }
 0xe9c   :  { %v5263_v15 = vpop.permute.xlu1 %5262 }
 0xea0   :  { %7865 = vmatmul.mubr.msk.bf16.vlgmr.msra.gmra.mrb[112].mxu1 %vm1201_vm2, %v10171_v17  ;;  %v4779_v17 = vsel %vm1201_vm2, %v4769_v28, 0  ;;  %v10299_v57 = vpop.permute.xlu1 %5323 }
 0xea1   :  { %7877 = vmatpush3.bf16.xpose.msra.mxu1 %v4712_v24  ;;  %7880 = vmatprep.mubr.msk.bf16.mxu1 %vm1201_vm2, %v10187_v19 }
 0xea2   :  { %7871 = vmatpush3.bf16.xpose.msra.mxu0 %v4648_v49  ;;  %8069 = vmatprep.subr.msk.bf16.mxu1 %vm1201_vm2, %v4704_v8 }
 0xea3   :  { %8070 = vmatprep.subr.msk.bf16.mxu0 %vm1201_vm2, %v4769_v28 }
 0xea4   :  { %v10304_v19 = vpop.permute.xlu1 %5384 }
 0xea9   :  { %7873 = vmatmul.mubr.msk.bf16.vlgmr.msra.gmra.mrb[96].mxu0 %vm1201_vm2, %v10197_v47  ;;  %7879 = vmatpush3.bf16.xpose.msra.mxu1 %v4715_v61 }
 0xeaa   :  { %7885 = vmatpush3.bf16.xpose.msra.mxu0 %v4779_v17  ;;  %7888 = vmatprep.mubr.msk.bf16.mxu0 %vm1201_vm2, %v10211_v21 }
 0xeab   :  { %8071 = vmatprep.subr.msk.bf16.mxu0 %vm1201_vm2, %v4771_v14  ;;  %7892 = vmatprep.subr.bf16.mxu1 %v5202_v13 }
 0xeb0   :  { %7881 = vmatmul.mubr.msk.bf16.vlgmr.msra.gmra.mrb[116].mxu1 %vm1201_vm2, %v10183_v42 }
 0xeb1   :  { %7893 = vmatpush3.bf16.msra.mxu1 %v5202_v13 }
 0xeb2   :  { %7887 = vmatpush3.bf16.xpose.msra.mxu0 %v4782_v43  ;;  %7894 = vmatprep.subr.bf16.mxu1 %v5204_v46 }
 0xeb3   :  { %7900 = vmatprep.subr.bf16.mxu0 %v5263_v15 }
 0xeb5   :  { %7895 = vmatpush3.bf16.msra.mxu1 %v5204_v46 }
 0xeb6   :  { %7908 = vmatprep.subr.bf16.mxu1 %v10299_v57 }
 0xeb9   :  { %7889 = vmatmul.mubr.msk.bf16.vlgmr.msra.gmra.mrb[100].mxu0 %vm1201_vm2, %v10209_v9 }
 0xeba   :  { %7901 = vmatpush3.bf16.msra.mxu0 %v5263_v15 }
 0xebb   :  { %7902 = vmatprep.subr.bf16.mxu0 %v5265_v58 }
 0xebe   :  { %7903 = vmatpush3.bf16.msra.mxu0 %v5265_v58 }
 0xebf   :  { %7916 = vmatprep.subr.bf16.mxu0 %v10304_v19 }
 0xf53   :  { %v7834_v11 = vpop.f32.mrb[104].mxu1 }
 0xf54   :  { %v10308_v44 = vadd.f32 %v7834_v11, %v11087_v62  ;;  %v4349_v35 = vpop.f32.mrb[105].mxu1 }
 0xf55   :  { %v7835_v0 = vpop.f32.mrb[106].mxu1  ;;  %v10311_v34 = vadd.f32 %v4349_v35, %v11088_v32 }
 0xf56   :  { %v4352_v23 = vpop.f32.mrb[107].mxu1  ;;  %v4839_v5 = vsel %vm513_vm1, %v10308_v44, -inf  ;;  %v10321_v20 = vadd.f32 %v7835_v0, %v11090_v37 }
 0xf57   :  { %v10316_v12 = vadd.f32 %v4352_v23, %v11089_v33  ;;  %4840 = vmax.xlane.f32.xlu0 %v4839_v5  ;;  %v4833_v52 = vsel %vm513_vm1, %v10311_v34, -inf }
 0xf58   :  { %v4842_v55 = vsel %vm513_vm1, %v10321_v20, -inf }
 0xf59   :  { %v4836_v22 = vsel %vm513_vm1, %v10316_v12, -inf }
 0xf5a   :  { %4837 = vmax.xlane.f32.xlu1 %v4836_v22 }
 0xf5b   :  { %4834 = vmax.xlane.f32.xlu0 %v4833_v52 }
 0xf5c   :  { %v7842_v45 = vpop.f32.mrb[88].mxu0 }
 0xf5d   :  { %v4416_v50 = vpop.f32.mrb[89].mxu0  ;;  %v10326_v26 = vadd.f32 %v7842_v45, %v11087_v62 }
 0xf5e   :  { %v7843_v31 = vpop.f32.mrb[90].mxu0  ;;  %v10339_v40 = vadd.f32 %v4416_v50, %v11088_v32 }
 0xf5f   :  { %v10331_v63 = vadd.f32 %v7843_v31, %v11090_v37  ;;  %v4419_v18 = vpop.f32.mrb[91].mxu0  ;;  %4843 = vmax.xlane.f32.xlu0 %v4842_v55  ;;  %v4851_v25 = vsel %vm513_vm1, %v10326_v26, -inf }
 0xf60   :  { %v10334_v39 = vadd.f32 %v4419_v18, %v11089_v33  ;;  %v4845_v8 = vsel %vm513_vm1, %v10339_v40, -inf }
 0xf61   :  { %v4854_v4 = vsel %vm513_vm1, %v10331_v63, -inf }
 0xf62   :  { %4855 = vmax.xlane.f32.xlu1 %v4854_v4  ;;  %v4848_v27 = vsel %vm513_vm1, %v10334_v39, -inf }
 0xf63   :  { %4852 = vmax.xlane.f32.xlu0 %v4851_v25  ;;  %v7850_v48 = vpop.f32.mrb[108].mxu1 }
 0xf64   :  { %v4483_v53 = vpop.f32.mrb[109].mxu1  ;;  %v10346_v2 = vadd.f32 %v7850_v48, %v11087_v62 }
 0xf65   :  { %v7851_v16 = vpop.f32.mrb[110].mxu1  ;;  %v10359_v28 = vadd.f32 %v4483_v53, %v11088_v32 }
 0xf66   :  { %4849 = vmax.xlane.f32.xlu1 %v4848_v27  ;;  %v10349_v41 = vadd.f32 %v7851_v16, %v11090_v37  ;;  %v4486_v29 = vpop.f32.mrb[111].mxu1  ;;  %v4863_v14 = vsel %vm513_vm1, %v10346_v2, -inf }
 0xf67   :  { %4846 = vmax.xlane.f32.xlu0 %v4845_v8  ;;  %v10356_v49 = vadd.f32 %v4486_v29, %v11089_v33  ;;  %v4857_v43 = vsel %vm513_vm1, %v10359_v28, -inf }
 0xf68   :  { %v4866_v24 = vsel %vm513_vm1, %v10349_v41, -inf }
 0xf69   :  { %v4860_v17 = vsel %vm513_vm1, %v10356_v49, -inf }
 0xf6a   :  { %4867 = vmax.xlane.f32.xlu1 %v4866_v24 }
 0xf6b   :  { %4864 = vmax.xlane.f32.xlu0 %v4863_v14 }
 0xf6c   :  { %v7858_v61 = vpop.f32.mrb[92].mxu0 }
 0xf6d   :  { %v4550_v46 = vpop.f32.mrb[93].mxu0  ;;  %v10366_v13 = vadd.f32 %v7858_v61, %v11087_v62 }
 0xf6e   :  { %4861 = vmax.xlane.f32.xlu1 %v4860_v17  ;;  %v7859_v15 = vpop.f32.mrb[94].mxu0  ;;  %v10379_v23 = vadd.f32 %v4550_v46, %v11088_v32 }
 0xf6f   :  { %v10371_v58 = vadd.f32 %v7859_v15, %v11090_v37  ;;  %v4553_v11 = vpop.f32.mrb[95].mxu0  ;;  %4858 = vmax.xlane.f32.xlu0 %v4857_v43  ;;  %v4875_v5 = vsel %vm513_vm1, %v10366_v13, -inf }
 0xf70   :  { %v10374_v35 = vadd.f32 %v4553_v11, %v11089_v33  ;;  %v4869_v4 = vsel %vm513_vm1, %v10379_v23, -inf }
 0xf71   :  { %v4878_v0 = vsel %vm513_vm1, %v10371_v58, -inf }
 0xf72   :  { %4879 = vmax.xlane.f32.xlu1 %v4878_v0  ;;  %v4872_v45 = vsel %vm513_vm1, %v10374_v35, -inf }
 0xf73   :  { %4876 = vmax.xlane.f32.xlu0 %v4875_v5  ;;  %v7866_v22 = vpop.f32.mrb[112].mxu1 }
 0xf74   :  { %v4617_v52 = vpop.f32.mrb[113].mxu1  ;;  %v10386_v31 = vadd.f32 %v7866_v22, %v11087_v62 }
 0xf75   :  { %v7867_v50 = vpop.f32.mrb[114].mxu1  ;;  %v10399_v53 = vadd.f32 %v4617_v52, %v11088_v32 }
 0xf76   :  { %4873 = vmax.xlane.f32.xlu1 %v4872_v45  ;;  %v10389_v55 = vadd.f32 %v7867_v50, %v11090_v37  ;;  %v4620_v18 = vpop.f32.mrb[115].mxu1  ;;  %v4887_v27 = vsel %vm513_vm1, %v10386_v31, -inf }
 0xf77   :  { %4870 = vmax.xlane.f32.xlu0 %v4869_v4  ;;  %v10396_v48 = vadd.f32 %v4620_v18, %v11089_v33  ;;  %v4881_v61 = vsel %vm513_vm1, %v10399_v53, -inf }
 0xf78   :  { %v4890_v25 = vsel %vm513_vm1, %v10389_v55, -inf }
 0xf79   :  { %v4884_v8 = vsel %vm513_vm1, %v10396_v48, -inf }
 0xf7a   :  { %4891 = vmax.xlane.f32.xlu1 %v4890_v25 }
 0xf7b   :  { %4888 = vmax.xlane.f32.xlu0 %v4887_v27 }
 0xf7c   :  { %v7874_v16 = vpop.f32.mrb[96].mxu0 }
 0xf7d   :  { %v4684_v29 = vpop.f32.mrb[97].mxu0  ;;  %v10406_v24 = vadd.f32 %v7874_v16, %v11087_v62 }
 0xf7e   :  { %4885 = vmax.xlane.f32.xlu1 %v4884_v8  ;;  %v7875_v14 = vpop.f32.mrb[98].mxu0  ;;  %v10419_v11 = vadd.f32 %v4684_v29, %v11088_v32 }
 0xf7f   :  { %v10411_v46 = vadd.f32 %v7875_v14, %v11090_v37  ;;  %v4687_v17 = vpop.f32.mrb[99].mxu0  ;;  %4882 = vmax.xlane.f32.xlu0 %v4881_v61  ;;  %v4899_v0 = vsel %vm513_vm1, %v10406_v24, -inf }
 0xf80   :  { %v10414_v15 = vadd.f32 %v4687_v17, %v11089_v33  ;;  %v4893_v25 = vsel %vm513_vm1, %v10419_v11, -inf }
 0xf81   :  { %v4902_v43 = vsel %vm513_vm1, %v10411_v46, -inf }
 0xf82   :  { %4903 = vmax.xlane.f32.xlu1 %v4902_v43  ;;  %v4896_v52 = vsel %vm513_vm1, %v10414_v15, -inf }
 0xf83   :  { %4900 = vmax.xlane.f32.xlu0 %v4899_v0  ;;  %v7882_v5 = vpop.f32.mrb[116].mxu1 }
 0xf84   :  { %v4751_v22 = vpop.f32.mrb[117].mxu1  ;;  %v10426_v50 = vadd.f32 %v7882_v5, %v11087_v62 }
 0xf85   :  { %v7883_v45 = vpop.f32.mrb[118].mxu1  ;;  %v10439_v29 = vadd.f32 %v4751_v22, %v11088_v32 }
 0xf86   :  { %4897 = vmax.xlane.f32.xlu1 %v4896_v52  ;;  %v10429_v18 = vadd.f32 %v7883_v45, %v11090_v37  ;;  %v4754_v4 = vpop.f32.mrb[119].mxu1  ;;  %v4911_v8 = vsel %vm513_vm1, %v10426_v50, -inf }
 0xf87   :  { %4894 = vmax.xlane.f32.xlu0 %v4893_v25  ;;  %v10436_v16 = vadd.f32 %v4754_v4, %v11089_v33  ;;  %v4905_v5 = vsel %vm513_vm1, %v10439_v29, -inf }
 0xf88   :  { %v4914_v27 = vsel %vm513_vm1, %v10429_v18, -inf }
 0xf89   :  { %v4908_v17 = vsel %vm513_vm1, %v10436_v16, -inf }
 0xf8a   :  { %4915 = vmax.xlane.f32.xlu1 %v4914_v27 }
 0xf8b   :  { %4912 = vmax.xlane.f32.xlu0 %v4911_v8 }
 0xf8c   :  { %v7890_v14 = vpop.f32.mrb[100].mxu0 }
 0xf8d   :  { %v4818_v61 = vpop.f32.mrb[101].mxu0  ;;  %v10446_v43 = vadd.f32 %v7890_v14, %v11087_v62 }
 0xf8e   :  { %4909 = vmax.xlane.f32.xlu1 %v4908_v17  ;;  %v7891_v0 = vpop.f32.mrb[102].mxu0  ;;  %v10459_v25 = vadd.f32 %v4818_v61, %v11088_v32  ;;  %v10471_v32 = vpop.permute.xlu0 %5325 }
 0xf8f   :  { %v10451_v22 = vadd.f32 %v7891_v0, %v11090_v37  ;;  %v4821_v52 = vpop.f32.mrb[103].mxu0  ;;  %4906 = vmax.xlane.f32.xlu0 %v4905_v5  ;;  %v4923_v62 = vsel %vm513_vm1, %v10446_v43, -inf  ;;  %v10481_v17 = vpop.permute.xlu1 %5567 }
 0xf90   :  { %v10454_v45 = vadd.f32 %v4821_v52, %v11089_v33  ;;  %v4917_v27 = vsel %vm513_vm1, %v10459_v25, -inf }
 0xf91   :  { %v4926_v4 = vsel %vm513_vm1, %v10451_v22, -inf }
 0xf92   :  { %4927 = vmax.xlane.f32.xlu1 %v4926_v4  ;;  %v4920_v37 = vsel %vm513_vm1, %v10454_v45, -inf  ;;  %v10473_v33 = vpop.permute.xlu0 %5445 }
 0xf93   :  { %4924 = vmax.xlane.f32.xlu0 %v4923_v62 }
 0xf96   :  { %4921 = vmax.xlane.f32.xlu1 %v4920_v37  ;;  %v10475_v8 = vpop.permute.xlu0 %5386 }
 0xf97   :  { %4918 = vmax.xlane.f32.xlu0 %v4917_v27 }
 0xf9a   :  { %v10477_v14 = vpop.permute.xlu0 %5447 }
 0xf9e   :  { %v10479_v61 = vpop.permute.xlu0 %5506 }
 0xfa7   :  { %5569 = vrot.lane.b32.xlu1 %v10183_v42, %s8556_s19 }
 0xfad   :  { %5508 = vrot.lane.b32.xlu0 %v10197_v47, %s8556_s19 }
 0xfe4   :  { %v4841_v0 = vpop.xlane.xlu0 %4840 }
 0xfe5   :  { %v4931_v5 = vsub.f32 %v10308_v44, %v4841_v0 }
 0xfe7   :  { %v4965_v52 = vmul.f32 1.442695, %v4931_v5  ;;  %v4838_v42 = vpop.xlane.xlu1 %4837 }
 0xfe8   :  { %v4835_v4 = vpop.xlane.xlu0 %4834  ;;  %v4930_v62 = vsub.f32 %v10316_v12, %v4838_v42 }
 0xfe9   :  { %8366 = vpow2.f32 %v4965_v52  ;;  %v4929_v47 = vsub.f32 %v10311_v34, %v4835_v4 }
 0xfea   :  { %v4963_v30 = vmul.f32 1.442695, %v4930_v62 }
 0xfeb   :  { %v4961_v37 = vmul.f32 1.442695, %v4929_v47 }
 0xfec   :  { %v4844_v27 = vpop.xlane.xlu0 %4843 }
 0xfed   :  { %8368 = vpow2.f32 %v4961_v37  ;;  %v4932_v56 = vsub.f32 %v10321_v20, %v4844_v27 }
 0xfef   :  { %v4967_v6 = vmul.f32 1.442695, %v4932_v56  ;;  %v4856_v10 = vpop.xlane.xlu1 %4855 }
 0xff0   :  { %v4936_v59 = vsub.f32 %v10331_v63, %v4856_v10  ;;  %v4853_v1 = vpop.xlane.xlu0 %4852 }
 0xff1   :  { %8370 = vpow2.f32 %v4967_v6  ;;  %v4935_v44 = vsub.f32 %v10326_v26, %v4853_v1 }
 0xff2   :  { %8372 = vpow2.f32 %v4963_v30  ;;  %v4975_v34 = vmul.f32 1.442695, %v4936_v59 }
 0xff3   :  { %v10489_v0 = vpop.eup %8366  ;;  %v4973_v5 = vmul.f32 1.442695, %v4935_v44  ;;  %v4850_v12 = vpop.xlane.xlu1 %4849 }
 0xff4   :  { %v4934_v52 = vsub.f32 %v10334_v39, %v4850_v12  ;;  %v4847_v42 = vpop.xlane.xlu0 %4846  ;;  %v5031_v20 = vsel %vm513_vm1, %v10489_v0, 0.0 }
 0xff5   :  { %8374 = vpow2.f32 %v4973_v5  ;;  %v4933_v56 = vsub.f32 %v10339_v40, %v4847_v42  ;;  %5032 = vadd.xlane.f32.xlu0 %v5031_v20 }
 0xff6   :  { %8376 = vpow2.f32 %v4975_v34  ;;  %v4971_v6 = vmul.f32 1.442695, %v4934_v52 }
 0xff7   :  { %v10495_v10 = vpop.eup %8368  ;;  %v4969_v1 = vmul.f32 1.442695, %v4933_v56  ;;  %v4868_v26 = vpop.xlane.xlu1 %4867 }
 0xff8   :  { %v4940_v30 = vsub.f32 %v10349_v41, %v4868_v26  ;;  %v4865_v59 = vpop.xlane.xlu0 %4864  ;;  %v5025_v63 = vsel %vm513_vm1, %v10495_v10, 0.0 }
 0xff9   :  { %8378 = vpow2.f32 %v4969_v1  ;;  %v4939_v39 = vsub.f32 %v10346_v2, %v4865_v59  ;;  %5026 = vadd.xlane.f32.xlu0 %v5025_v63 }
 0xffa   :  { %8380 = vpow2.f32 %v4971_v6  ;;  %v4983_v40 = vmul.f32 1.442695, %v4940_v30 }
 0xffb   :  { %v10501_v4 = vpop.eup %8370  ;;  %v4981_v47 = vmul.f32 1.442695, %v4939_v39  ;;  %v4862_v62 = vpop.xlane.xlu1 %4861 }
 0xffc   :  { %v4938_v37 = vsub.f32 %v10356_v49, %v4862_v62  ;;  %v4859_v27 = vpop.xlane.xlu0 %4858  ;;  %v5034_v41 = vsel %vm513_vm1, %v10501_v4, 0.0  ;;  %v10506_v44 = vpop.eup %8372 }
 0xffd   :  { %8382 = vpow2.f32 %v4981_v47  ;;  %v4937_v34 = vsub.f32 %v10359_v28, %v4859_v27  ;;  %5035 = vadd.xlane.f32.xlu1 %v5034_v41  ;;  %v5028_v49 = vsel %vm513_vm1, %v10506_v44, 0.0 }
 0xffe   :  { %8384 = vpow2.f32 %v4983_v40  ;;  %v4979_v5 = vmul.f32 1.442695, %v4938_v37 }
 0xfff   :  { %v10509_v2 = vpop.eup %8374  ;;  %v4977_v12 = vmul.f32 1.442695, %v4937_v34  ;;  %v4880_v52 = vpop.xlane.xlu1 %4879 }
0x1000   :  { %v4944_v42 = vsub.f32 %v10371_v58, %v4880_v52  ;;  %v4877_v20 = vpop.xlane.xlu0 %4876  ;;  %v5043_v56 = vsel %vm513_vm1, %v10509_v2, 0.0  ;;  %v10516_v6 = vpop.eup %8376 }
0x1001   :  { %8386 = vpow2.f32 %v4977_v12  ;;  %v4943_v28 = vsub.f32 %v10366_v13, %v4877_v20  ;;  %5029 = vadd.xlane.f32.xlu1 %v5028_v49  ;;  %5044 = vadd.xlane.f32.xlu0 %v5043_v56  ;;  %v5046_v39 = vsel %vm513_vm1, %v10516_v6, 0.0 }
0x1002   :  { %8388 = vpow2.f32 %v4979_v5  ;;  %v4991_v26 = vmul.f32 1.442695, %v4944_v42 }
0x1003   :  { %v10519_v1 = vpop.eup %8378  ;;  %v4989_v30 = vmul.f32 1.442695, %v4943_v28  ;;  %v4874_v58 = vpop.xlane.xlu1 %4873 }
0x1004   :  { %v4942_v59 = vsub.f32 %v10374_v35, %v4874_v58  ;;  %v4871_v63 = vpop.xlane.xlu0 %4870  ;;  %v5037_v40 = vsel %vm513_vm1, %v10519_v1, 0.0  ;;  %v10526_v47 = vpop.eup %8380 }
0x1005   :  { %8390 = vpow2.f32 %v4989_v30  ;;  %v4941_v13 = vsub.f32 %v10379_v23, %v4871_v63  ;;  %5047 = vadd.xlane.f32.xlu1 %v5046_v39  ;;  %5038 = vadd.xlane.f32.xlu0 %v5037_v40  ;;  %v5040_v5 = vsel %vm513_vm1, %v10526_v47, 0.0 }
0x1006   :  { %8392 = vpow2.f32 %v4991_v26  ;;  %v4987_v37 = vmul.f32 1.442695, %v4942_v59 }
0x1007   :  { %v10529_v62 = vpop.eup %8382  ;;  %v4985_v27 = vmul.f32 1.442695, %v4941_v13  ;;  %v4892_v35 = vpop.xlane.xlu1 %4891 }
0x1008   :  { %v4948_v41 = vsub.f32 %v10389_v55, %v4892_v35  ;;  %v4889_v34 = vpop.xlane.xlu0 %4888  ;;  %v5055_v12 = vsel %vm513_vm1, %v10529_v62, 0.0  ;;  %v10536_v52 = vpop.eup %8384 }
0x1009   :  { %8394 = vpow2.f32 %v4985_v27  ;;  %v4947_v23 = vsub.f32 %v10386_v31, %v4889_v34  ;;  %5041 = vadd.xlane.f32.xlu1 %v5040_v5  ;;  %5056 = vadd.xlane.f32.xlu0 %v5055_v12  ;;  %v5058_v26 = vsel %vm513_vm1, %v10536_v52, 0.0 }
0x100a   :  { %8396 = vpow2.f32 %v4987_v37  ;;  %v4999_v20 = vmul.f32 1.442695, %v4948_v41 }
0x100b   :  { %v10539_v42 = vpop.eup %8386  ;;  %v4997_v49 = vmul.f32 1.442695, %v4947_v23  ;;  %v4886_v55 = vpop.xlane.xlu1 %4885 }
0x100c   :  { %v4946_v56 = vsub.f32 %v10396_v48, %v4886_v55  ;;  %v4883_v28 = vpop.xlane.xlu0 %4882  ;;  %v5049_v30 = vsel %vm513_vm1, %v10539_v42, 0.0  ;;  %v10546_v58 = vpop.eup %8388 }
0x100d   :  { %8398 = vpow2.f32 %v4997_v49  ;;  %v4945_v31 = vsub.f32 %v10399_v53, %v4883_v28  ;;  %5059 = vadd.xlane.f32.xlu1 %v5058_v26  ;;  %5050 = vadd.xlane.f32.xlu0 %v5049_v30  ;;  %v5052_v13 = vsel %vm513_vm1, %v10546_v58, 0.0 }
0x100e   :  { %8400 = vpow2.f32 %v4999_v20  ;;  %v4995_v63 = vmul.f32 1.442695, %v4946_v56 }
0x100f   :  { %v10549_v59 = vpop.eup %8390  ;;  %v4993_v39 = vmul.f32 1.442695, %v4945_v31  ;;  %v4904_v48 = vpop.xlane.xlu1 %4903 }
0x1010   :  { %v4901_v40 = vpop.xlane.xlu0 %4900  ;;  %v5067_v37 = vsel %vm513_vm1, %v10549_v59, 0.0  ;;  %v10555_v27 = vpop.eup %8392  ;;  %v4952_v55 = vsub.f32 %v10411_v46, %v4904_v48 }
0x1011   :  { %8402 = vpow2.f32 %v4993_v39  ;;  %v4951_v53 = vsub.f32 %v10406_v24, %v4901_v40  ;;  %5053 = vadd.xlane.f32.xlu1 %v5052_v13  ;;  %5068 = vadd.xlane.f32.xlu0 %v5067_v37  ;;  %v5070_v12 = vsel %vm513_vm1, %v10555_v27, 0.0 }
0x1012   :  { %8404 = vpow2.f32 %v4995_v63  ;;  %v5007_v40 = vmul.f32 1.442695, %v4952_v55 }
0x1013   :  { %v10558_v35 = vpop.eup %8394  ;;  %v5005_v41 = vmul.f32 1.442695, %v4951_v53  ;;  %v4898_v34 = vpop.xlane.xlu1 %4897 }
0x1014   :  { %v4895_v5 = vpop.xlane.xlu0 %4894  ;;  %v5061_v23 = vsel %vm513_vm1, %v10558_v35, 0.0  ;;  %v10564_v20 = vpop.eup %8396  ;;  %v4950_v46 = vsub.f32 %v10414_v15, %v4898_v34 }
0x1015   :  { %v4949_v49 = vsub.f32 %v10419_v11, %v4895_v5  ;;  %5071 = vadd.xlane.f32.xlu1 %v5070_v12  ;;  %5062 = vadd.xlane.f32.xlu0 %v5061_v23  ;;  %8406 = vpow2.f32 %v5005_v41  ;;  %v5064_v30 = vsel %vm513_vm1, %v10564_v20, 0.0 }
0x1017   :  { %v10567_v24 = vpop.eup %8398  ;;  %v5001_v56 = vmul.f32 1.442695, %v4949_v49  ;;  %v4916_v28 = vpop.xlane.xlu1 %4915 }
0x1018   :  { %v4913_v26 = vpop.xlane.xlu0 %4912  ;;  %v5079_v31 = vsel %vm513_vm1, %v10567_v24, 0.0  ;;  %v10574_v63 = vpop.eup %8400 }
0x1019   :  { %v4955_v11 = vsub.f32 %v10426_v50, %v4913_v26  ;;  %5065 = vadd.xlane.f32.xlu1 %v5064_v30  ;;  %5080 = vadd.xlane.f32.xlu0 %v5079_v31  ;;  %8408 = vpow2.f32 %v5001_v56  ;;  %v5082_v53 = vsel %vm513_vm1, %v10574_v63, 0.0  ;;  %v5003_v50 = vmul.f32 1.442695, %v4950_v46 }
0x101a   :  { %v4956_v56 = vsub.f32 %v10429_v18, %v4916_v28 }
0x101b   :  { %v10577_v39 = vpop.eup %8402  ;;  %v5013_v48 = vmul.f32 1.442695, %v4955_v11  ;;  %v4910_v13 = vpop.xlane.xlu1 %4909 }
0x101c   :  { %v4907_v37 = vpop.xlane.xlu0 %4906  ;;  %v5073_v41 = vsel %vm513_vm1, %v10577_v39, 0.0  ;;  %v10584_v5 = vpop.eup %8404  ;;  %v4954_v18 = vsub.f32 %v10436_v16, %v4910_v13 }
0x101d   :  { %8410 = vpow2.f32 %v5013_v48  ;;  %5083 = vadd.xlane.f32.xlu1 %v5082_v53  ;;  %5074 = vadd.xlane.f32.xlu0 %v5073_v41  ;;  %v4953_v12 = vsub.f32 %v10439_v29, %v4907_v37  ;;  %v5076_v23 = vsel %vm513_vm1, %v10584_v5, 0.0  ;;  %v5015_v48 = vmul.f32 1.442695, %v4956_v56 }
0x101e   :  { %8412 = vpow2.f32 %v5007_v40 }
0x101f   :  { %v4928_v15 = vpop.xlane.xlu1 %4927  ;;  %v10589_v49 = vpop.eup %8406  ;;  %8414 = vpow2.f32 %v5003_v50  ;;  %v5009_v26 = vmul.f32 1.442695, %v4953_v12 }
0x1020   :  { %v4925_v34 = vpop.xlane.xlu0 %4924  ;;  %v4960_v30 = vsub.f32 %v10451_v22, %v4928_v15  ;;  %v5091_v29 = vsel %vm513_vm1, %v10589_v49, 0.0 }
0x1021   :  { %v4959_v55 = vsub.f32 %v10446_v43, %v4925_v34  ;;  %5077 = vadd.xlane.f32.xlu1 %v5076_v23 }
0x1022   :  { %v5023_v28 = vmul.f32 1.442695, %v4960_v30 }
0x1023   :  { %v5021_v31 = vmul.f32 1.442695, %v4959_v55  ;;  %v10596_v40 = vpop.eup %8408  ;;  %v4922_v22 = vpop.xlane.xlu1 %4921 }
0x1024   :  { %v4919_v11 = vpop.xlane.xlu0 %4918  ;;  %v5085_v53 = vsel %vm513_vm1, %v10596_v40, 0.0  ;;  %v4958_v16 = vsub.f32 %v10454_v45, %v4922_v22 }
0x1025   :  { %8416 = vpow2.f32 %v5021_v31  ;;  %v4957_v46 = vsub.f32 %v10459_v25, %v4919_v11  ;;  %5092 = vadd.xlane.f32.xlu1 %v5091_v29  ;;  %v5011_v25 = vmul.f32 1.442695, %v4954_v18 }
0x1026   :  { %8418 = vpow2.f32 %v5009_v26  ;;  %v5019_v34 = vmul.f32 1.442695, %v4958_v16 }
0x1027   :  { %v10599_v43 = vpop.eup %8410  ;;  %v5017_v37 = vmul.f32 1.442695, %v4957_v46 }
0x1028   :  { %v5103_v41 = vsel %vm513_vm1, %v10599_v43, 0.0  ;;  %v10606_v50 = vpop.eup %8412  ;;  %v10647_v22 = vpop.permute.xlu0 %5508 }
0x1029   :  { %8420 = vpow2.f32 %v5017_v37  ;;  %5086 = vadd.xlane.f32.xlu1 %v5085_v53  ;;  %5104 = vadd.xlane.f32.xlu0 %v5103_v41  ;;  %v5094_v13 = vsel %vm513_vm1, %v10606_v50, 0.0  ;;  %v10611_v12 = vpop.eup %8414  ;;  %v10649_v41 = vpop.permute.xlu1 %5569 }
0x102a   :  { %8422 = vpow2.f32 %v5015_v48  ;;  %v5088_v23 = vsel %vm513_vm1, %v10611_v12, 0.0 }
0x102b   :  { %8424 = vpow2.f32 %v5023_v28 }
0x102c   :  { %8426 = vpow2.f32 %v5011_v25 }
0x102d   :  { %5095 = vadd.xlane.f32.xlu1 %v5094_v13  ;;  %8428 = vpow2.f32 %v5019_v34 }
0x102f   :  { %v10613_v15 = vpop.eup %8416 }
0x1030   :  { %v5115_v55 = vsel %vm513_vm1, %v10613_v15, 0.0  ;;  %v10619_v56 = vpop.eup %8418 }
0x1031   :  { %5089 = vadd.xlane.f32.xlu1 %v5088_v23  ;;  %5116 = vadd.xlane.f32.xlu0 %v5115_v55  ;;  %v5097_v30 = vsel %vm513_vm1, %v10619_v56, 0.0 }
0x1033   :  { %v10621_v45 = vpop.eup %8420 }
0x1034   :  { %v10623_v26 = vpop.eup %8422  ;;  %v5109_v31 = vsel %vm513_vm1, %v10621_v45, 0.0 }
0x1035   :  { %v10629_v11 = vpop.eup %8424  ;;  %5098 = vadd.xlane.f32.xlu1 %v5097_v30  ;;  %5110 = vadd.xlane.f32.xlu0 %v5109_v31  ;;  %v5106_v29 = vsel %vm513_vm1, %v10623_v26, 0.0 }
0x1036   :  { %v5118_v46 = vsel %vm513_vm1, %v10629_v11, 0.0  ;;  %v10635_v48 = vpop.eup %8426 }
0x1037   :  { %v5100_v18 = vsel %vm513_vm1, %v10635_v48, 0.0  ;;  %v10639_v28 = vpop.eup %8428 }
0x1038   :  { %v5112_v37 = vsel %vm513_vm1, %v10639_v28, 0.0 }
0x1039   :  { %5107 = vadd.xlane.f32.xlu1 %v5106_v29  ;;  %5119 = vadd.xlane.f32.xlu0 %v5118_v46 }
0x103d   :  { %5101 = vadd.xlane.f32.xlu1 %v5100_v18 }
0x1041   :  { %5113 = vadd.xlane.f32.xlu1 %v5112_v37 }
0x104f   :  { %5628 = vrot.lane.b32.xlu0 %v10211_v21, %s8556_s19 }
0x1052   :  { %5630 = vrot.lane.b32.xlu1 %v10209_v9, %s8556_s19 }
0x1082   :  { %v5033_v53 = vpop.xlane.xlu0 %5032 }
0x1086   :  { %v5027_v25 = vpop.xlane.xlu0 %5026 }
0x108a   :  { %v5036_v16 = vpop.xlane.xlu1 %5035 }
0x108b   :  { %8430 = vrcp.f32 %v5036_v16 }
0x108c   :  { %8432 = vrcp.f32 %v5027_v25 }
0x108d   :  { %8434 = vrcp.f32 %v5033_v53 }
0x108e   :  { %v5030_v13 = vpop.xlane.xlu1 %5029  ;;  %v5045_v34 = vpop.xlane.xlu0 %5044 }
0x108f   :  { %8436 = vrcp.f32 %v5030_v13 }
0x1092   :  { %v5048_v23 = vpop.xlane.xlu1 %5047  ;;  %v5039_v55 = vpop.xlane.xlu0 %5038 }
0x1093   :  { %8438 = vrcp.f32 %v5048_v23 }
0x1094   :  { %8440 = vrcp.f32 %v5039_v55 }
0x1095   :  { %v8431_v21 = vpop.eup %8430  ;;  %8442 = vrcp.f32 %v5045_v34 }
0x1096   :  { %v5042_v9 = vpop.xlane.xlu1 %5041  ;;  %v5057_v30 = vpop.xlane.xlu0 %5056  ;;  %v5156_v18 = vmul.f32 %v8431_v21, %v10501_v4 }
0x1097   :  { %v8433_v31 = vpop.eup %8432  ;;  %8444 = vrcp.f32 %v5042_v9 }
0x1098   :  { %v8435_v29 = vpop.eup %8434  ;;  %v5153_v53 = vmul.f32 %v8433_v31, %v10495_v10 }
0x1099   :  { %v8437_v46 = vpop.eup %8436  ;;  %v5155_v13 = vmul.f32 %v8435_v29, %v10489_v0 }
0x109a   :  { %v5060_v37 = vpop.xlane.xlu1 %5059  ;;  %v5051_v25 = vpop.xlane.xlu0 %5050  ;;  %v5154_v16 = vmul.f32 %v8437_v46, %v10506_v44 }
0x109b   :  { %8446 = vrcp.f32 %v5060_v37  ;;  %v5186_v34 = vpack.c.bf16 %v5156_v18, %v5155_v13 }
0x109c   :  { %v5185_v23 = vpack.c.bf16 %v5154_v16, %v5153_v53  ;;  %8448 = vrcp.f32 %v5051_v25 }
0x109d   :  { %v8439_v55 = vpop.eup %8438  ;;  %8450 = vrcp.f32 %v5057_v30 }
0x109e   :  { %v5054_v60 = vpop.xlane.xlu1 %5053  ;;  %7896 = vmatprep.mubr.msk.bf16.mxu1 %vm513_vm1, %v5185_v23  ;;  %v5069_v9 = vpop.xlane.xlu0 %5068  ;;  %v5160_v0 = vmul.f32 %v8439_v55, %v10516_v6 }
0x109f   :  { %v8441_v51 = vpop.eup %8440  ;;  %8452 = vrcp.f32 %v5054_v60  ;;  %7897 = vmatmul.mubr.msk.bf16.vlgmr.msra.gmra.mrb[120].mxu1 %vm513_vm1, %v5186_v34 }
0x10a0   :  { %v8443_v4 = vpop.eup %8442  ;;  %7909 = vmatpush3.bf16.msra.mxu1 %v10299_v57  ;;  %v5157_v30 = vmul.f32 %v8441_v51, %v10519_v1 }
0x10a1   :  { %v8445_v10 = vpop.eup %8444  ;;  %7910 = vmatprep.subr.bf16.mxu1 %v10471_v32  ;;  %v5159_v29 = vmul.f32 %v8443_v4, %v10509_v2 }
0x10a2   :  { %v5072_v44 = vpop.xlane.xlu1 %5071  ;;  %v5063_v21 = vpop.xlane.xlu0 %5062  ;;  %v5158_v31 = vmul.f32 %v8445_v10, %v10526_v47 }
0x10a3   :  { %8454 = vrcp.f32 %v5072_v44  ;;  %v5188_v57 = vpack.c.bf16 %v5160_v0, %v5159_v29 }
0x10a4   :  { %7911 = vmatpush3.bf16.msra.mxu1 %v10471_v32  ;;  %v5187_v60 = vpack.c.bf16 %v5158_v31, %v5157_v30  ;;  %8456 = vrcp.f32 %v5063_v21 }
0x10a5   :  { %7924 = vmatprep.subr.bf16.mxu1 %v10473_v33  ;;  %v8447_v46 = vpop.eup %8446  ;;  %8458 = vrcp.f32 %v5069_v9 }
0x10a6   :  { %v5066_v6 = vpop.xlane.xlu1 %5065  ;;  %7904 = vmatprep.mubr.msk.bf16.mxu0 %vm513_vm1, %v5187_v60  ;;  %v5081_v18 = vpop.xlane.xlu0 %5080  ;;  %v5164_v32 = vmul.f32 %v8447_v46, %v10536_v52 }
0x10a7   :  { %v8449_v37 = vpop.eup %8448  ;;  %8460 = vrcp.f32 %v5066_v6  ;;  %7905 = vmatmul.mubr.msk.bf16.vlgmr.msra.gmra.mrb[104].mxu0 %vm513_vm1, %v5188_v57 }
0x10a8   :  { %v8451_v51 = vpop.eup %8450  ;;  %7917 = vmatpush3.bf16.msra.mxu0 %v10304_v19  ;;  %v5161_v25 = vmul.f32 %v8449_v37, %v10539_v42 }
0x10a9   :  { %v8453_v2 = vpop.eup %8452  ;;  %7918 = vmatprep.subr.bf16.mxu0 %v10475_v8  ;;  %v5163_v16 = vmul.f32 %v8451_v51, %v10529_v62 }
0x10aa   :  { %v5084_v1 = vpop.xlane.xlu1 %5083  ;;  %v5075_v47 = vpop.xlane.xlu0 %5074  ;;  %v5162_v53 = vmul.f32 %v8453_v2, %v10546_v58 }
0x10ab   :  { %8462 = vrcp.f32 %v5084_v1  ;;  %v5190_v19 = vpack.c.bf16 %v5164_v32, %v5163_v16 }
0x10ac   :  { %7919 = vmatpush3.bf16.msra.mxu0 %v10475_v8  ;;  %v5189_v13 = vpack.c.bf16 %v5162_v53, %v5161_v25  ;;  %8464 = vrcp.f32 %v5075_v47 }
0x10ad   :  { %7932 = vmatprep.subr.bf16.mxu0 %v10479_v61  ;;  %v8455_v23 = vpop.eup %8454  ;;  %8466 = vrcp.f32 %v5081_v18 }
0x10ae   :  { %v5078_v52 = vpop.xlane.xlu1 %5077  ;;  %7912 = vmatprep.mubr.msk.bf16.mxu1 %vm513_vm1, %v5189_v13  ;;  %v8457_v34 = vpop.eup %8456  ;;  %v5168_v8 = vmul.f32 %v8455_v23, %v10555_v27 }
0x10af   :  { %8468 = vrcp.f32 %v5078_v52  ;;  %7913 = vmatmul.mubr.msk.bf16.vlgmr.msra.gmra.mrb[124].mxu1 %vm513_vm1, %v5190_v19  ;;  %v8459_v42 = vpop.eup %8458  ;;  %v5165_v55 = vmul.f32 %v8457_v34, %v10558_v35 }
0x10b0   :  { %7925 = vmatpush3.bf16.msra.mxu1 %v10473_v33  ;;  %v5167_v4 = vmul.f32 %v8459_v42, %v10549_v59 }
0x10b1   :  { %v8461_v62 = vpop.eup %8460  ;;  %7926 = vmatprep.subr.bf16.mxu1 %v10477_v14 }
0x10b2   :  { %v5093_v58 = vpop.xlane.xlu1 %5092  ;;  %v5166_v9 = vmul.f32 %v8461_v62, %v10564_v20  ;;  %v5192_v0 = vpack.c.bf16 %v5168_v8, %v5167_v4 }
0x10b4   :  { %7927 = vmatpush3.bf16.msra.mxu1 %v10477_v14  ;;  %v5191_v10 = vpack.c.bf16 %v5166_v9, %v5165_v55 }
0x10b5   :  { %7940 = vmatprep.subr.bf16.mxu1 %v10481_v17  ;;  %v8463_v44 = vpop.eup %8462 }
0x10b6   :  { %v5087_v33 = vpop.xlane.xlu1 %5086  ;;  %7920 = vmatprep.mubr.msk.bf16.mxu0 %vm513_vm1, %v5191_v10  ;;  %v8465_v27 = vpop.eup %8464  ;;  %v5172_v20 = vmul.f32 %v8463_v44, %v10574_v63 }
0x10b7   :  { %7921 = vmatmul.mubr.msk.bf16.vlgmr.msra.gmra.mrb[108].mxu0 %vm513_vm1, %v5192_v0  ;;  %v8467_v21 = vpop.eup %8466  ;;  %v5105_v14 = vpop.xlane.xlu0 %5104  ;;  %v5169_v30 = vmul.f32 %v8465_v27, %v10577_v39 }
0x10b8   :  { %7933 = vmatpush3.bf16.msra.mxu0 %v10479_v61  ;;  %v5171_v29 = vmul.f32 %v8467_v21, %v10567_v24 }
0x10b9   :  { %v8469_v35 = vpop.eup %8468  ;;  %7934 = vmatprep.subr.bf16.mxu0 %v10647_v22 }
0x10ba   :  { %v5096_v59 = vpop.xlane.xlu1 %5095  ;;  %v5170_v31 = vmul.f32 %v8469_v35, %v10584_v5  ;;  %v5194_v57 = vpack.c.bf16 %v5172_v20, %v5171_v29  ;;  %v8146_v35 = vld [vmem:[%s11041_s5 + $0x60] sm:$0xff]  }
0x10bb   :  { %8470 = vrcp.f32 %v5096_v59 }
0x10bc   :  { %7935 = vmatpush3.bf16.msra.mxu0 %v10647_v22  ;;  %v5193_v60 = vpack.c.bf16 %v5170_v31, %v5169_v30  ;;  %8472 = vrcp.f32 %v5087_v33 }
0x10bd   :  { %8474 = vrcp.f32 %v5093_v58 }
0x10be   :  { %v5090_v61 = vpop.xlane.xlu1 %5089  ;;  %7928 = vmatprep.mubr.msk.bf16.mxu1 %vm513_vm1, %v5193_v60  ;;  %v5117_v63 = vpop.xlane.xlu0 %5116  ;;  %v8147_v60 = vld [vmem:[%s11041_s5 + $0x68] sm:$0xff]  }
0x10bf   :  { %8476 = vrcp.f32 %v5090_v61  ;;  %7929 = vmatmul.mubr.msk.bf16.vlgmr.msra.gmra.mrb[128].mxu1 %vm513_vm1, %v5194_v57 }
0x10c0   :  { %7941 = vmatpush3.bf16.msra.mxu1 %v10481_v17 }
0x10c1   :  { %7942 = vmatprep.subr.bf16.mxu1 %v10649_v41 }
0x10c2   :  { %v5099_v39 = vpop.xlane.xlu1 %5098  ;;  %v5111_v24 = vpop.xlane.xlu0 %5110 }
0x10c4   :  { %7943 = vmatpush3.bf16.msra.mxu1 %v10649_v41 }
0x10c5   :  { %v8471_v5 = vpop.eup %8470 }
0x10c6   :  { %v5108_v22 = vpop.xlane.xlu1 %5107  ;;  %v5120_v46 = vpop.xlane.xlu0 %5119  ;;  %v5176_v51 = vmul.f32 %v8471_v5, %v10606_v50 }
0x10c7   :  { %v8473_v6 = vpop.eup %8472  ;;  %8478 = vrcp.f32 %v5108_v22  ;;  %v8148_v22 = vld [vmem:[%s11041_s5 + $0x70] sm:$0xff]  }
0x10c8   :  { %v8475_v18 = vpop.eup %8474  ;;  %8480 = vrcp.f32 %v5099_v39  ;;  %v5173_v17 = vmul.f32 %v8473_v6, %v10596_v40 }
0x10c9   :  { %v8477_v37 = vpop.eup %8476  ;;  %8482 = vrcp.f32 %v5105_v14  ;;  %v5175_v47 = vmul.f32 %v8475_v18, %v10589_v49 }
0x10ca   :  { %v5102_v2 = vpop.xlane.xlu1 %5101  ;;  %v5629_v32 = vpop.permute.xlu0 %5628  ;;  %v5174_v1 = vmul.f32 %v8477_v37, %v10611_v12 }
0x10cb   :  { %8484 = vrcp.f32 %v5102_v2  ;;  %7948 = vmatprep.subr.bf16.mxu0 %v5629_v32  ;;  %v5196_v25 = vpack.c.bf16 %v5176_v51, %v5175_v47 }
0x10cc   :  { %8486 = vrcp.f32 %v5120_v46  ;;  %v5195_v41 = vpack.c.bf16 %v5174_v1, %v5173_v17 }
0x10cd   :  { %8488 = vrcp.f32 %v5111_v24 }
0x10ce   :  { %8490 = vrcp.f32 %v5117_v63  ;;  %v5114_v53 = vpop.xlane.xlu1 %5113  ;;  %7936 = vmatprep.mubr.msk.bf16.mxu0 %vm513_vm1, %v5195_v41 }
0x10cf   :  { %8492 = vrcp.f32 %v5114_v53  ;;  %7937 = vmatmul.mubr.msk.bf16.vlgmr.msra.gmra.mrb[112].mxu0 %vm513_vm1, %v5196_v25 }
0x10d0   :  { %7949 = vmatpush3.bf16.msra.mxu0 %v5629_v32  ;;  %v8149_v32 = vld [vmem:[%s11041_s5 + $0x78] sm:$0xff]  }
0x10d1   :  { %v8479_v50 = vpop.eup %8478 }
0x10d2   :  { %v5631_v40 = vpop.permute.xlu1 %5630  ;;  %v8481_v16 = vpop.eup %8480  ;;  %v5180_v13 = vmul.f32 %v8479_v50, %v10623_v26 }
0x10d3   :  { %7950 = vmatprep.subr.bf16.mxu0 %v5631_v40  ;;  %v8483_v12 = vpop.eup %8482  ;;  %v5177_v23 = vmul.f32 %v8481_v16, %v10619_v56 }
0x10d4   :  { %7951 = vmatpush3.bf16.msra.mxu0 %v5631_v40  ;;  %v5179_v42 = vmul.f32 %v8483_v12, %v10599_v43  ;;  %v8142_v43 = vld [vmem:[%s11041_s5 + $0x40] sm:$0xff]  }
0x10d5   :  { %v8485_v49 = vpop.eup %8484  ;;  %7956 = vmatprep.subr.bf16.mxu1 %v8142_v43 }
0x10d6   :  { %v8487_v19 = vpop.eup %8486  ;;  %v5178_v52 = vmul.f32 %v8485_v49, %v10635_v48  ;;  %v5198_v9 = vpack.c.bf16 %v5180_v13, %v5179_v42 }
0x10d7   :  { %v8489_v34 = vpop.eup %8488  ;;  %v5184_v55 = vmul.f32 %v8487_v19, %v10629_v11  ;;  %v8145_v11 = vld [vmem:[%s11041_s5 + $0x58] sm:$0xff]  }
0x10d8   :  { %v8491_v62 = vpop.eup %8490  ;;  %v5197_v8 = vpack.c.bf16 %v5178_v52, %v5177_v23  ;;  %v5181_v4 = vmul.f32 %v8489_v34, %v10621_v45  ;;  %v8143_v45 = vld [vmem:[%s11041_s5 + $0x48] sm:$0xff]  }
0x10d9   :  { %v8493_v58 = vpop.eup %8492  ;;  %v5183_v10 = vmul.f32 %v8491_v62, %v10613_v15  ;;  %7962 = vmatprep.subr.bf16.mxu0 %v8143_v45  ;;  %v8144_v15 = vld [vmem:[%s11041_s5 + $0x50] sm:$0xff]  }
0x10da   :  { %7944 = vmatprep.mubr.msk.bf16.mxu1 %vm513_vm1, %v5197_v8  ;;  %v5182_v26 = vmul.f32 %v8493_v58, %v10639_v28 }
0x10db   :  { %7945 = vmatmul.mubr.msk.bf16.vlgmr.msra.gmra.mrb[132].mxu1 %vm513_vm1, %v5198_v9  ;;  %v5200_v48 = vpack.c.bf16 %v5184_v55, %v5183_v10 }
0x10dc   :  { %v5199_v56 = vpack.c.bf16 %v5182_v26, %v5181_v4  ;;  %7957 = vmatpush3.bf16.msra.mxu1 %v8142_v43 }
0x10dd   :  { %7968 = vmatprep.subr.bf16.mxu1 %v8144_v15 }
0x10de   :  { %7952 = vmatprep.mubr.msk.bf16.mxu0 %vm513_vm1, %v5199_v56 }
0x10df   :  { %7953 = vmatmul.mubr.msk.bf16.vlgmr.msra.gmra.mrb[116].mxu0 %vm513_vm1, %v5200_v48 }
0x10e0   :  { %7963 = vmatpush3.bf16.msra.mxu0 %v8143_v45 }
0x10e1   :  { %7974 = vmatprep.subr.bf16.mxu0 %v8145_v11 }
0x1172   :  { %v7898_v28 = vpop.f32.mrb[120].mxu1 }
0x1173   :  { %v5247_v0 = vpop.f32.mrb[121].mxu1 }
0x1174   :  { %v7899_v44 = vpop.f32.mrb[122].mxu1 }
0x1175   :  { %v5690_v33 = vpack.c.bf16 %v7899_v44, %v7898_v28  ;;  %v5250_v27 = vpop.f32.mrb[123].mxu1 }
0x1176   :  { %v5689_v21 = vpack.c.bf16 %v5250_v27, %v5247_v0 }
0x1178   :  { %7958 = vmatprep.mubr.msk.bf16.mxu1 %vm1201_vm2, %v5689_v21 }
0x1179   :  { %7959 = vmatmul.mubr.msk.bf16.vlgmr.msra.gmra.mrb[136].mxu1 %vm1201_vm2, %v5690_v33 }
0x117a   :  { %v7906_v20 = vpop.f32.mrb[104].mxu0  ;;  %7969 = vmatpush3.bf16.msra.mxu1 %v8144_v15 }
0x117b   :  { %v5308_v14 = vpop.f32.mrb[105].mxu0  ;;  %7980 = vmatprep.subr.bf16.mxu1 %v8146_v35 }
0x117c   :  { %v7907_v59 = vpop.f32.mrb[106].mxu0 }
0x117d   :  { %v5692_v30 = vpack.c.bf16 %v7907_v59, %v7906_v20  ;;  %v5311_v31 = vpop.f32.mrb[107].mxu0 }
0x117e   :  { %v5691_v29 = vpack.c.bf16 %v5311_v31, %v5308_v14 }
0x1180   :  { %7964 = vmatprep.mubr.msk.bf16.mxu0 %vm1201_vm2, %v5691_v29 }
0x1181   :  { %7965 = vmatmul.mubr.msk.bf16.vlgmr.msra.gmra.mrb[120].mxu0 %vm1201_vm2, %v5692_v30 }
0x1182   :  { %v7914_v57 = vpop.f32.mrb[124].mxu1  ;;  %7975 = vmatpush3.bf16.msra.mxu0 %v8145_v11 }
0x1183   :  { %v5369_v61 = vpop.f32.mrb[125].mxu1  ;;  %7986 = vmatprep.subr.bf16.mxu0 %v8147_v60 }
0x1184   :  { %v7915_v63 = vpop.f32.mrb[126].mxu1 }
0x1185   :  { %v5694_v39 = vpack.c.bf16 %v7915_v63, %v7914_v57  ;;  %v5372_v24 = vpop.f32.mrb[127].mxu1 }
0x1186   :  { %v5693_v5 = vpack.c.bf16 %v5372_v24, %v5369_v61 }
0x1188   :  { %7970 = vmatprep.mubr.msk.bf16.mxu1 %vm1201_vm2, %v5693_v5 }
0x1189   :  { %7971 = vmatmul.mubr.msk.bf16.vlgmr.msra.gmra.mrb[140].mxu1 %vm1201_vm2, %v5694_v39 }
0x118a   :  { %v7922_v46 = vpop.f32.mrb[108].mxu0  ;;  %7981 = vmatpush3.bf16.msra.mxu1 %v8146_v35 }
0x118b   :  { %v5430_v6 = vpop.f32.mrb[109].mxu0  ;;  %7992 = vmatprep.subr.bf16.mxu1 %v8148_v22 }
0x118c   :  { %v7923_v18 = vpop.f32.mrb[110].mxu0 }
0x118d   :  { %v5696_v37 = vpack.c.bf16 %v7923_v18, %v7922_v46  ;;  %v5433_v51 = vpop.f32.mrb[111].mxu0 }
0x118e   :  { %v5695_v2 = vpack.c.bf16 %v5433_v51, %v5430_v6 }
0x1190   :  { %7976 = vmatprep.mubr.msk.bf16.mxu0 %vm1201_vm2, %v5695_v2 }
0x1191   :  { %7977 = vmatmul.mubr.msk.bf16.vlgmr.msra.gmra.mrb[124].mxu0 %vm1201_vm2, %v5696_v37 }
0x1192   :  { %v7930_v17 = vpop.f32.mrb[128].mxu1  ;;  %7987 = vmatpush3.bf16.msra.mxu0 %v8147_v60 }
0x1193   :  { %v5491_v1 = vpop.f32.mrb[129].mxu1  ;;  %7998 = vmatprep.subr.bf16.mxu0 %v8149_v32 }
0x1194   :  { %v7931_v47 = vpop.f32.mrb[130].mxu1 }
0x1195   :  { %v5698_v41 = vpack.c.bf16 %v7931_v47, %v7930_v17  ;;  %v5494_v25 = vpop.f32.mrb[131].mxu1 }
0x1196   :  { %v5697_v53 = vpack.c.bf16 %v5494_v25, %v5491_v1 }
0x1198   :  { %7982 = vmatprep.mubr.msk.bf16.mxu1 %vm1201_vm2, %v5697_v53 }
0x1199   :  { %7983 = vmatmul.mubr.msk.bf16.vlgmr.msra.gmra.mrb[144].mxu1 %vm1201_vm2, %v5698_v41 }
0x119a   :  { %7993 = vmatpush3.bf16.msra.mxu1 %v8148_v22 }
0x11a2   :  { %v7938_v50 = vpop.f32.mrb[112].mxu0 }
0x11a3   :  { %v5552_v40 = vpop.f32.mrb[113].mxu0 }
0x11a4   :  { %v7939_v16 = vpop.f32.mrb[114].mxu0 }
0x11a5   :  { %v5700_v12 = vpack.c.bf16 %v7939_v16, %v7938_v50  ;;  %v5555_v49 = vpop.f32.mrb[115].mxu0 }
0x11a6   :  { %v5699_v13 = vpack.c.bf16 %v5555_v49, %v5552_v40 }
0x11a8   :  { %7988 = vmatprep.mubr.msk.bf16.mxu0 %vm1201_vm2, %v5699_v13 }
0x11a9   :  { %7989 = vmatmul.mubr.msk.bf16.vlgmr.msra.gmra.mrb[128].mxu0 %vm1201_vm2, %v5700_v12 }
0x11aa   :  { %7999 = vmatpush3.bf16.msra.mxu0 %v8149_v32 }
0x11ae   :  { %v7946_v19 = vpop.f32.mrb[132].mxu1 }
0x11af   :  { %v5613_v23 = vpop.f32.mrb[133].mxu1 }
0x11b0   :  { %v7947_v52 = vpop.f32.mrb[134].mxu1 }
0x11b1   :  { %v5702_v34 = vpack.c.bf16 %v7947_v52, %v7946_v19  ;;  %v5616_v42 = vpop.f32.mrb[135].mxu1 }
0x11b2   :  { %v5701_v62 = vpack.c.bf16 %v5616_v42, %v5613_v23  ;;  %v7954_v8 = vpop.f32.mrb[116].mxu0 }
0x11b3   :  { %v5674_v58 = vpop.f32.mrb[117].mxu0 }
0x11b4   :  { %v7955_v55 = vpop.f32.mrb[118].mxu0  ;;  %7994 = vmatprep.mubr.msk.bf16.mxu1 %vm1201_vm2, %v5701_v62 }
0x11b5   :  { %v5704_v9 = vpack.c.bf16 %v7955_v55, %v7954_v8  ;;  %v5677_v4 = vpop.f32.mrb[119].mxu0  ;;  %7995 = vmatmul.mubr.msk.bf16.vlgmr.msra.gmra.mrb[148].mxu1 %vm1201_vm2, %v5702_v34 }
0x11b6   :  { %v5703_v26 = vpack.c.bf16 %v5677_v4, %v5674_v58 }
0x11b8   :  { %8000 = vmatprep.mubr.msk.bf16.mxu0 %vm1201_vm2, %v5703_v26 }
0x11b9   :  { %8001 = vmatmul.mubr.msk.bf16.vlgmr.msra.gmra.mrb[132].mxu0 %vm1201_vm2, %v5704_v9 }
0x124c   :  { %v7960_v10 = vpop.f32.mrb[136].mxu1 }
0x124d   :  { %v5768_v56 = vpop.f32.mrb[137].mxu1  ;;  %v6224_v44 = vsel %vm513_vm1, %v7960_v10, 0.0 }
0x124e   :  { %v7961_v48 = vpop.f32.mrb[138].mxu1  ;;  %v6210_v21 = vsel %vm513_vm1, %v5768_v56, 0.0 }
0x124f   :  { %v5771_v43 = vpop.f32.mrb[139].mxu1  ;;  %v6231_v59 = vsel %vm513_vm1, %v7961_v48, 0.0 }
0x1250   :  { %v6217_v60 = vsel %vm513_vm1, %v5771_v43, 0.0 }
0x1254   :  { %v7966_v45 = vpop.f32.mrb[120].mxu0 }
0x1255   :  { %v5829_v15 = vpop.f32.mrb[121].mxu0  ;;  %v6252_v24 = vsel %vm513_vm1, %v7966_v45, 0.0 }
0x1256   :  { %v7967_v11 = vpop.f32.mrb[122].mxu0  ;;  %v6238_v46 = vsel %vm513_vm1, %v5829_v15, 0.0 }
0x1257   :  { %v5832_v28 = vpop.f32.mrb[123].mxu0  ;;  %v6259_v51 = vsel %vm513_vm1, %v7967_v11, 0.0  ;;  %v10784_v11 = vld [vmem:[%s11044_s8 + $0x8] sm:$0x3f] }
0x1258   :  { %v6245_v1 = vsel %vm513_vm1, %v5832_v28, 0.0  ;;  %v11091_v28 = vsub.s32 2, %v8881_v3 }
0x125c   :  { %v7972_v0 = vpop.f32.mrb[140].mxu1 }
0x125d   :  { %v6225_v33 = vsel %vm513_vm1, %v7972_v0, 0.0  ;;  %v5890_v27 = vpop.f32.mrb[141].mxu1  ;;  %v6269_v0 = vrot.slane %v10784_v11, %v11091_v28 }
0x125e   :  { %v6226_v35 = vadd.f32 %v6225_v33, %v6224_v44  ;;  %v6211_v20 = vsel %vm513_vm1, %v5890_v27, 0.0  ;;  %v7973_v14 = vpop.f32.mrb[142].mxu1 }
0x125f   :  { %v6212_v30 = vadd.f32 %v6211_v20, %v6210_v21  ;;  %v6232_v31 = vsel %vm513_vm1, %v7973_v14, 0.0  ;;  %v5893_v29 = vpop.f32.mrb[143].mxu1 }
0x1260   :  { %v6233_v57 = vadd.f32 %v6232_v31, %v6231_v59  ;;  %v6218_v61 = vsel %vm513_vm1, %v5893_v29, 0.0 }
0x1261   :  { %v6219_v63 = vadd.f32 %v6218_v61, %v6217_v60 }
0x1264   :  { %v7978_v39 = vpop.f32.mrb[124].mxu0 }
0x1265   :  { %v6253_v5 = vsel %vm513_vm1, %v7978_v39, 0.0  ;;  %v5951_v22 = vpop.f32.mrb[125].mxu0 }
0x1266   :  { %v6254_v6 = vadd.f32 %v6253_v5, %v6252_v24  ;;  %v6239_v18 = vsel %vm513_vm1, %v5951_v22, 0.0  ;;  %v7979_v37 = vpop.f32.mrb[126].mxu0 }
0x1267   :  { %v6240_v2 = vadd.f32 %v6239_v18, %v6238_v46  ;;  %v6260_v32 = vsel %vm513_vm1, %v7979_v37, 0.0  ;;  %v5954_v17 = vpop.f32.mrb[127].mxu0 }
0x1268   :  { %v6261_v47 = vadd.f32 %v6260_v32, %v6259_v51  ;;  %v6246_v41 = vsel %vm513_vm1, %v5954_v17, 0.0 }
0x1269   :  { %v6247_v25 = vadd.f32 %v6246_v41, %v6245_v1 }
0x126c   :  { %v7984_v53 = vpop.f32.mrb[144].mxu1 }
0x126d   :  { %v6227_v50 = vsel %vm513_vm1, %v7984_v53, 0.0  ;;  %v6012_v40 = vpop.f32.mrb[145].mxu1 }
0x126e   :  { %v6228_v16 = vadd.f32 %v6227_v50, %v6226_v35  ;;  %v6213_v12 = vsel %vm513_vm1, %v6012_v40, 0.0  ;;  %v7985_v49 = vpop.f32.mrb[146].mxu1 }
0x126f   :  { %v6214_v13 = vadd.f32 %v6213_v12, %v6212_v30  ;;  %v6234_v19 = vsel %vm513_vm1, %v7985_v49, 0.0  ;;  %v6015_v23 = vpop.f32.mrb[147].mxu1  ;;  %v11093_v49 = vld [vmem:[#allocation14_spill] sm:$0xff] }
0x1270   :  { %v6235_v52 = vadd.f32 %v6234_v19, %v6233_v57  ;;  %v6220_v34 = vsel %vm513_vm1, %v6015_v23, 0.0 }
0x1271   :  { %v6221_v42 = vadd.f32 %v6220_v34, %v6219_v63 }
0x127c   :  { %v7990_v62 = vpop.f32.mrb[128].mxu0 }
0x127d   :  { %v6255_v8 = vsel %vm513_vm1, %v7990_v62, 0.0  ;;  %v6073_v58 = vpop.f32.mrb[129].mxu0  ;;  %v11095_v62 = vld [vmem:[#allocation8_spill] sm:$0xff] }
0x127e   :  { %v6256_v55 = vadd.f32 %v6255_v8, %v6254_v6  ;;  %v6241_v9 = vsel %vm513_vm1, %v6073_v58, 0.0  ;;  %v7991_v4 = vpop.f32.mrb[130].mxu0 }
0x127f   :  { %v6242_v26 = vadd.f32 %v6241_v9, %v6240_v2  ;;  %v6262_v10 = vsel %vm513_vm1, %v7991_v4, 0.0  ;;  %v6076_v56 = vpop.f32.mrb[131].mxu0 }
0x1280   :  { %v6263_v48 = vadd.f32 %v6262_v10, %v6261_v47  ;;  %v6248_v43 = vsel %vm513_vm1, %v6076_v56, 0.0 }
0x1281   :  { %v6249_v45 = vadd.f32 %v6248_v43, %v6247_v25 }
0x1288   :  { %v7996_v15 = vpop.f32.mrb[148].mxu1 }
0x1289   :  { %v6229_v44 = vsel %vm513_vm1, %v7996_v15, 0.0  ;;  %v6134_v33 = vpop.f32.mrb[149].mxu1 }
0x128a   :  { %v6230_v27 = vadd.f32 %v6229_v44, %v6228_v16  ;;  %v6215_v21 = vsel %vm513_vm1, %v6134_v33, 0.0  ;;  %v7997_v35 = vpop.f32.mrb[150].mxu1  ;;  %v11092_v16 = vld [vmem:[#allocation13_spill] sm:$0xff] }
0x128b   :  { %v6216_v20 = vadd.f32 %v6215_v21, %v6214_v13  ;;  %v6236_v14 = vsel %vm513_vm1, %v7997_v35, 0.0  ;;  %v6137_v59 = vpop.f32.mrb[151].mxu1 }
0x128c   :  { %v6272_v30 = vadd.f32 %v6269_v0, %v6230_v27  ;;  %v6237_v31 = vadd.f32 %v6236_v14, %v6235_v52  ;;  %v6222_v29 = vsel %vm513_vm1, %v6137_v59, 0.0  ;;  %v8002_v60 = vpop.f32.mrb[132].mxu0  ;;  %v11094_v52 = vld [vmem:[#allocation7_spill] sm:$0xff] }
0x128d   :  { %v6270_v57 = vadd.f32 %v6269_v0, %v6216_v20  ;;  %v6223_v61 = vadd.f32 %v6222_v29, %v6221_v42  ;;  %v6257_v63 = vsel %vm513_vm1, %v8002_v60, 0.0  ;;  %v6195_v39 = vpop.f32.mrb[133].mxu0 }
0x128e   :  { %v6258_v24 = vadd.f32 %v6257_v63, %v6256_v55  ;;  %v6243_v5 = vsel %vm513_vm1, %v6195_v39, 0.0  ;;  %v8003_v22 = vpop.f32.mrb[134].mxu0  ;;  %v10800_v2 = vadd.f32 %v6272_v30, %v9990_v38  ;;  %v6273_v1 = vadd.f32 %v6269_v0, %v6237_v31 }
0x128f   :  { %v10796_v46 = vadd.f32 %v6270_v57, %v9987_v36  ;;  %v6271_v6 = vadd.f32 %v6269_v0, %v6223_v61  ;;  %v6244_v18 = vadd.f32 %v6243_v5, %v6242_v26  ;;  %v6264_v37 = vsel %vm513_vm1, %v8003_v22, 0.0  ;;  %v6198_v51 = vpop.f32.mrb[135].mxu0 }
0x1290   :  { %v6265_v32 = vadd.f32 %v6264_v37, %v6263_v48  ;;  %v6250_v17 = vsel %vm513_vm1, %v6198_v51, 0.0  ;;  %v10811_v38 = vadd.f32 %v6273_v1, %v9998_v7  ;;  %v6276_v23 = vadd.f32 %v6269_v0, %v6258_v24 }
0x1291   :  { %v10804_v47 = vadd.f32 %v6271_v6, %v9993_v54  ;;  %v6251_v41 = vadd.f32 %v6250_v17, %v6249_v45  ;;  %v6286_v36 = vsel %vm513_vm1, %v10796_v46, 0.0  ;;  %v6274_v40 = vadd.f32 %v6269_v0, %v6244_v18 }
0x1292   :  { %6287 = vadd.xlane.f32.xlu0 %v6286_v36  ;;  %v6277_v25 = vadd.f32 %v6269_v0, %v6265_v32  ;;  %v6292_v54 = vsel %vm513_vm1, %v10800_v2, 0.0  ;;  %v6295_v7 = vsel %vm513_vm1, %v10811_v38, 0.0  ;;  %v10831_v8 = vadd.f32 %v6276_v23, %v11095_v62 }
0x1293   :  { %v6275_v53 = vadd.f32 %v6269_v0, %v6251_v41  ;;  %v6289_v50 = vsel %vm513_vm1, %v10804_v47, 0.0  ;;  %v10824_v34 = vadd.f32 %v6274_v40, %v11094_v52  ;;  %v11096_v40 = vmov 0.0  }
0x1294   :  { %6290 = vadd.xlane.f32.xlu1 %v6289_v50  ;;  %v10819_v13 = vadd.f32 %v6277_v25, %v11093_v49  ;;  %v6304_v55 = vsel %vm513_vm1, %v10831_v8, 0.0  ;;  %v8151_v50 = vld [vmem:[%s11042_s6 + $0x18] sm:$0xff]  }
0x1295   :  { %v10814_v12 = vadd.f32 %v6275_v53, %v11092_v16  ;;  %v6298_v58 = vsel %vm513_vm1, %v10824_v34, 0.0  ;;  %v8150_v53 = vld [vmem:[%s11042_s6 + $0x10] sm:$0xff]   ;;  %s6912_s6 = sshll.u32 %s8560_s26, 4  ;;  %s6913_s6 = int_to_ptr.vmem [resolvable:$true] %s6912_s6 }
0x1296   :  { %6293 = vadd.xlane.f32.xlu0 %v6292_v54  ;;  %v6307_v42 = vsel %vm513_vm1, %v10819_v13, 0.0  ;;  %8004 = vmatprep.subr.bf16.mxu1 %v8150_v53  ;;  %s8530_s3 = scalar_lea.vmem %s6913_s6, 32  ;;  %p8535_p1 = scmp.lt.s32.totalorder %s6913_s6, %s6913_s6 }
0x1297   :  { %v6301_v19 = vsel %vm513_vm1, %v10814_v12, 0.0  ;;  %8005 = vmatpush3.bf16.msra.mxu1 %v8150_v53  ;;  %p8531_p0 = scmp.ne.s32.totalorder %s6913_s6, %s8530_s3  ;;  %p8536_p2 = scmp.lt.s32.totalorder %s8530_s3, %s8530_s3 }
0x1298   :  { %6302 = vadd.xlane.f32.xlu1 %v6301_v19  ;;  %8006 = vmatprep.subr.bf16.mxu1 %v8151_v50 }
0x1299   :  { %p8537_p3 = por %p8536_p2, %p8535_p1 }
0x129a   :  { %6296 = vadd.xlane.f32.xlu0 %v6295_v7 }
0x129b   :  { %8007 = vmatpush3.bf16.msra.mxu1 %v8151_v50  ;;  %p8538_p4 = pnand %p8537_p3, %p8531_p0 }
0x129c   :  { %6308 = vadd.xlane.f32.xlu1 %v6307_v42  ;;  %8032 = vmatprep.subr.bf16.mxu1 %v11096_v40 }
0x129e   :  { %6299 = vadd.xlane.f32.xlu0 %v6298_v58 }
0x12a2   :  { %6305 = vadd.xlane.f32.xlu0 %v6304_v55 }
0x131f   :  { %v6288_v9 = vpop.xlane.xlu0 %6287 }
0x1320   :  { %v6310_v4 = vmul.f32 0.03125, %v6288_v9 }
0x1321   :  { %v6291_v26 = vpop.xlane.xlu1 %6290 }
0x1322   :  { %v10838_v10 = vsub.f32 %v10796_v46, %v6310_v4  ;;  %v6311_v56 = vmul.f32 0.03125, %v6291_v26 }
0x1323   :  { %v6294_v48 = vpop.xlane.xlu0 %6293 }
0x1324   :  { %v10841_v43 = vsub.f32 %v10804_v47, %v6311_v56  ;;  %v6312_v45 = vmul.f32 0.03125, %v6294_v48  ;;  %v6326_v15 = vmul.f32 %v10838_v10, %v10838_v10 }
0x1325   :  { %v6303_v28 = vpop.xlane.xlu1 %6302 }
0x1326   :  { %v10846_v0 = vsub.f32 %v10800_v2, %v6312_v45  ;;  %v6315_v44 = vmul.f32 0.03125, %v6303_v28  ;;  %v6334_v33 = vsel %vm513_vm1, %v6326_v15, 0.0  ;;  %v6327_v27 = vmul.f32 %v10841_v43, %v10841_v43 }
0x1327   :  { %6335 = vadd.xlane.f32.xlu0 %v6334_v33  ;;  %v6297_v21 = vpop.xlane.xlu0 %6296  ;;  %v11097_v45 = vsub.s32 3, %v8881_v3 }
0x1328   :  { %v6313_v35 = vmul.f32 0.03125, %v6297_v21  ;;  %v6337_v20 = vsel %vm513_vm1, %v6327_v27, 0.0  ;;  %v6328_v14 = vmul.f32 %v10846_v0, %v10846_v0  ;;  %v10855_v30 = vsub.f32 %v10814_v12, %v6315_v44 }
0x1329   :  { %6338 = vadd.xlane.f32.xlu1 %v6337_v20  ;;  %v6309_v59 = vpop.xlane.xlu1 %6308  ;;  %v6393_v15 = vrot.slane %v10784_v11, %v11097_v45 }
0x132a   :  { %v10858_v31 = vsub.f32 %v10811_v38, %v6313_v35  ;;  %v6317_v29 = vmul.f32 0.03125, %v6309_v59  ;;  %v6340_v60 = vsel %vm513_vm1, %v6328_v14, 0.0  ;;  %v6331_v22 = vmul.f32 %v10855_v30, %v10855_v30 }
0x132b   :  { %6341 = vadd.xlane.f32.xlu0 %v6340_v60  ;;  %v6300_v57 = vpop.xlane.xlu0 %6299 }
0x132c   :  { %v6314_v61 = vmul.f32 0.03125, %v6300_v57  ;;  %v6329_v63 = vmul.f32 %v10858_v31, %v10858_v31  ;;  %v10864_v39 = vsub.f32 %v10819_v13, %v6317_v29  ;;  %v6349_v32 = vsel %vm513_vm1, %v6331_v22, 0.0 }
0x132d   :  { %v11098_v57 = vsub.s32 4, %v8881_v3 }
0x132e   :  { %v10867_v24 = vsub.f32 %v10824_v34, %v6314_v61  ;;  %v6343_v5 = vsel %vm513_vm1, %v6329_v63, 0.0  ;;  %v6333_v1 = vmul.f32 %v10864_v39, %v10864_v39 }
0x132f   :  { %6344 = vadd.xlane.f32.xlu1 %v6343_v5  ;;  %v6306_v6 = vpop.xlane.xlu0 %6305  ;;  %v6405_v61 = vrot.slane %v10784_v11, %v11098_v57 }
0x1330   :  { %v6316_v18 = vmul.f32 0.03125, %v6306_v6  ;;  %v6330_v37 = vmul.f32 %v10867_v24, %v10867_v24  ;;  %v6355_v36 = vsel %vm513_vm1, %v6333_v1, 0.0 }
0x1332   :  { %v10875_v51 = vsub.f32 %v10831_v8, %v6316_v18  ;;  %v6346_v17 = vsel %vm513_vm1, %v6330_v37, 0.0 }
0x1333   :  { %6350 = vadd.xlane.f32.xlu1 %v6349_v32  ;;  %6347 = vadd.xlane.f32.xlu0 %v6346_v17 }
0x1334   :  { %v6332_v41 = vmul.f32 %v10875_v51, %v10875_v51 }
0x1336   :  { %v6352_v25 = vsel %vm513_vm1, %v6332_v41, 0.0 }
0x1337   :  { %6356 = vadd.xlane.f32.xlu1 %v6355_v36  ;;  %6353 = vadd.xlane.f32.xlu0 %v6352_v25 }
0x13b4   :  { %v6336_v16 = vpop.xlane.xlu0 %6335 }
0x13b5   :  { %v6358_v54 = vmul.f32 0.03125, %v6336_v16 }
0x13b6   :  { %v6339_v49 = vpop.xlane.xlu1 %6338 }
0x13b7   :  { %v6366_v19 = vadd.f32 1e-05, %v6358_v54  ;;  %v6359_v23 = vmul.f32 0.03125, %v6339_v49 }
0x13b8   :  { %v6342_v52 = vpop.xlane.xlu0 %6341 }
0x13b9   :  { %8494 = vrsqrt.f32 %v6366_v19  ;;  %v6367_v7 = vadd.f32 1e-05, %v6359_v23  ;;  %v6360_v42 = vmul.f32 0.03125, %v6342_v52 }
0x13bb   :  { %8496 = vrsqrt.f32 %v6367_v7  ;;  %v6368_v62 = vadd.f32 1e-05, %v6360_v42 }
0x13bc   :  { %v6345_v58 = vpop.xlane.xlu1 %6344 }
0x13bd   :  { %8498 = vrsqrt.f32 %v6368_v62  ;;  %v6361_v55 = vmul.f32 0.03125, %v6345_v58 }
0x13bf   :  { %v6369_v9 = vadd.f32 1e-05, %v6361_v55 }
0x13c0   :  { %v6351_v4 = vpop.xlane.xlu1 %6350  ;;  %v6348_v26 = vpop.xlane.xlu0 %6347 }
0x13c1   :  { %8500 = vrsqrt.f32 %v6369_v9  ;;  %v6363_v56 = vmul.f32 0.03125, %v6351_v4  ;;  %v6362_v48 = vmul.f32 0.03125, %v6348_v26  ;;  %v8154_v26 = vld [vmem:[%s11043_s7 + $0x30] sm:$0xff]  }
0x13c3   :  { %v8495_v28 = vpop.eup %8494  ;;  %v6371_v44 = vadd.f32 1e-05, %v6363_v56  ;;  %v6370_v33 = vadd.f32 1e-05, %v6362_v48  ;;  %v8155_v56 = vld [vmem:[%s11043_s7 + $0x38] sm:$0xff]  }
0x13c4   :  { %v6382_v27 = vmul.f32 %v8495_v28, %v10838_v10  ;;  %v6357_v21 = vpop.xlane.xlu1 %6356  ;;  %v6354_v35 = vpop.xlane.xlu0 %6353  ;;  %v7192_v48 = vld [vmem:[%s11045_s9 + $0x1] ss:$0 sm:$0xff] }
0x13c5   :  { %v8497_v20 = vpop.eup %8496  ;;  %8502 = vrsqrt.f32 %v6371_v44  ;;  %v6365_v14 = vmul.f32 0.03125, %v6357_v21  ;;  %v6364_v59 = vmul.f32 0.03125, %v6354_v35 }
0x13c6   :  { %v6383_v29 = vmul.f32 %v8497_v20, %v10841_v43  ;;  %8504 = vrsqrt.f32 %v6370_v33  ;;  %v6394_v60 = vmul.f32 %v6393_v15, %v6382_v27 }
0x13c7   :  { %v8499_v63 = vpop.eup %8498  ;;  %v6373_v5 = vadd.f32 1e-05, %v6365_v14  ;;  %v6372_v22 = vadd.f32 1e-05, %v6364_v59 }
0x13c8   :  { %v6384_v6 = vmul.f32 %v8499_v63, %v10846_v0  ;;  %v6395_v10 = vmul.f32 %v6393_v15, %v6383_v29  ;;  %v6406_v18 = vadd.f32 %v6405_v61, %v6394_v60 }
0x13c9   :  { %8506 = vrsqrt.f32 %v6373_v5 }
0x13ca   :  { %8508 = vrsqrt.f32 %v6372_v22  ;;  %v6407_v37 = vadd.f32 %v6405_v61, %v6395_v10  ;;  %v6396_v17 = vmul.f32 %v6393_v15, %v6384_v6 }
0x13cb   :  { %v8501_v32 = vpop.eup %8500 }
0x13cc   :  { %v6385_v43 = vmul.f32 %v8501_v32, %v10858_v31  ;;  %v6414_v1 = vpack.c.bf16 %v6407_v37, %v6406_v18  ;;  %v6408_v50 = vadd.f32 %v6405_v61, %v6396_v17 }
0x13ce   :  { %v6397_v41 = vmul.f32 %v6393_v15, %v6385_v43  ;;  %8008 = vmatprep.mubr.msk.bf16.mxu1 %vm513_vm1, %v6414_v1 }
0x13cf   :  { %v8503_v36 = vpop.eup %8502 }
0x13d0   :  { %v8505_v25 = vpop.eup %8504  ;;  %v6387_v53 = vmul.f32 %v8503_v36, %v10855_v30  ;;  %v6409_v16 = vadd.f32 %v6405_v61, %v6397_v41 }
0x13d1   :  { %v6386_v0 = vmul.f32 %v8505_v25, %v10867_v24 }
0x13d2   :  { %v6415_v54 = vpack.c.bf16 %v6409_v16, %v6408_v50  ;;  %v6399_v49 = vmul.f32 %v6393_v15, %v6387_v53 }
0x13d3   :  { %v8507_v19 = vpop.eup %8506  ;;  %v6398_v23 = vmul.f32 %v6393_v15, %v6386_v0 }
0x13d4   :  { %v8509_v52 = vpop.eup %8508  ;;  %v6389_v7 = vmul.f32 %v8507_v19, %v10864_v39  ;;  %8009 = vmatmul.mubr.msk.bf16.vlgmr.msra.gmra.mrb[152].mxu1 %vm513_vm1, %v6415_v54  ;;  %v6411_v31 = vadd.f32 %v6405_v61, %v6399_v49  ;;  %v8152_v39 = vld [vmem:[%s11043_s7 + $0x20] sm:$0xff]  }
0x13d5   :  { %v6388_v42 = vmul.f32 %v8509_v52, %v10875_v51  ;;  %v6410_v62 = vadd.f32 %v6405_v61, %v6398_v23  ;;  %8016 = vmatprep.subr.bf16.mxu0 %v8152_v39  ;;  %v8153_v51 = vld [vmem:[%s11043_s7 + $0x28] sm:$0xff]  }
0x13d6   :  { %v6401_v58 = vmul.f32 %v6393_v15, %v6389_v7  ;;  %8017 = vmatpush3.bf16.msra.mxu0 %v8152_v39 }
0x13d7   :  { %v6416_v55 = vpack.c.bf16 %v6411_v31, %v6410_v62  ;;  %v6400_v30 = vmul.f32 %v6393_v15, %v6388_v42  ;;  %8018 = vmatprep.subr.bf16.mxu0 %v8153_v51 }
0x13d8   :  { %v6413_v9 = vadd.f32 %v6405_v61, %v6401_v58 }
0x13d9   :  { %8012 = vmatprep.mubr.msk.bf16.mxu1 %vm513_vm1, %v6416_v55  ;;  %v6412_v24 = vadd.f32 %v6405_v61, %v6400_v30 }
0x13da   :  { %8019 = vmatpush3.bf16.msra.mxu0 %v8153_v51 }
0x13db   :  { %v6417_v4 = vpack.c.bf16 %v6413_v9, %v6412_v24  ;;  %8020 = vmatprep.subr.bf16.mxu0 %v8154_v26 }
0x13dd   :  { %8013 = vmatmul.mubr.msk.bf16.gmra.mrb[156].mxu1 %vm513_vm1, %v6417_v4 }
0x13de   :  { %8021 = vmatpush3.bf16.msra.mxu0 %v8154_v26  ;;  %8036 = vmatprep.mubr.msk.bf16.mxu1 %vm8558_vm15, %v11096_v40 }
0x13df   :  { %8022 = vmatprep.subr.bf16.mxu0 %v8155_v56 }
0x13e2   :  { %8023 = vmatpush3.bf16.msra.mxu0 %v8155_v56 }
0x14a7   :  { %v8010_v45 = vpop.f32.mrb[152].mxu1 }
0x14a8   :  { %v10925_v15 = vadd.f32 %v8010_v45, %v7192_v48  ;;  %v6489_v28 = vpop.f32.mrb[153].mxu1 }
0x14a9   :  { %v10927_v44 = vadd.f32 %v7192_v48, %v6489_v28  ;;  %v8011_v33 = vpop.f32.mrb[154].mxu1 }
0x14aa   :  { %v6530_v27 = vmul.f32 0.044715, %v10925_v15  ;;  %v10930_v21 = vadd.f32 %v8011_v33, %v7192_v48  ;;  %v6492_v35 = vpop.f32.mrb[155].mxu1 }
0x14ab   :  { %v6528_v20 = vmul.f32 0.044715, %v10927_v44  ;;  %v10933_v14 = vadd.f32 %v7192_v48, %v6492_v35 }
0x14ac   :  { %v6538_v59 = vmul.f32 %v6530_v27, %v10925_v15  ;;  %v6531_v29 = vmul.f32 0.044715, %v10930_v21 }
0x14ad   :  { %v6536_v60 = vmul.f32 %v6528_v20, %v10927_v44  ;;  %v6529_v57 = vmul.f32 0.044715, %v10933_v14 }
0x14ae   :  { %v6546_v61 = vmul.f32 %v6538_v59, %v10925_v15  ;;  %v6539_v63 = vmul.f32 %v6531_v29, %v10930_v21 }
0x14af   :  { %v6544_v5 = vmul.f32 %v6536_v60, %v10927_v44  ;;  %v6537_v22 = vmul.f32 %v6529_v57, %v10933_v14  ;;  %v6522_v57 = vmul.f32 0.5, %v10925_v15 }
0x14b0   :  { %v6554_v6 = vadd.f32 %v6546_v61, %v10925_v15  ;;  %v6547_v10 = vmul.f32 %v6539_v63, %v10930_v21  ;;  %v8014_v18 = vpop.f32.mrb[156].mxu1  ;;  %v6523_v61 = vmul.f32 0.5, %v10930_v21 }
0x14b1   :  { %v6552_v37 = vadd.f32 %v6544_v5, %v10927_v44  ;;  %v6545_v32 = vmul.f32 %v6537_v22, %v10933_v14  ;;  %v10947_v17 = vadd.f32 %v8014_v18, %v7192_v48  ;;  %v6505_v43 = vpop.f32.mrb[157].mxu1  ;;  %v6520_v5 = vmul.f32 0.5, %v10927_v44 }
0x14b2   :  { %v6562_v1 = vmul.f32 0.7978846, %v6554_v6  ;;  %v6555_v41 = vadd.f32 %v6547_v10, %v10930_v21  ;;  %v10950_v36 = vadd.f32 %v7192_v48, %v6505_v43  ;;  %v8015_v25 = vpop.f32.mrb[158].mxu1  ;;  %v6521_v22 = vmul.f32 0.5, %v10933_v14 }
0x14b3   :  { %v6560_v53 = vmul.f32 0.7978846, %v6552_v37  ;;  %v6553_v50 = vadd.f32 %v6545_v32, %v10933_v14  ;;  %v6534_v16 = vmul.f32 0.044715, %v10947_v17  ;;  %v6517_v0 = vadd.f32 %v8015_v25, %v7192_v48  ;;  %v6508_v54 = vpop.f32.mrb[159].mxu1 }
0x14b4   :  { %8510 = vtanh.f32 %v6562_v1  ;;  %v6563_v49 = vmul.f32 0.7978846, %v6555_v41  ;;  %v6532_v19 = vmul.f32 0.044715, %v10950_v36  ;;  %v6509_v23 = vadd.f32 %v7192_v48, %v6508_v54 }
0x14b5   :  { %8512 = vtanh.f32 %v6560_v53  ;;  %v6561_v52 = vmul.f32 0.7978846, %v6553_v50  ;;  %v6542_v7 = vmul.f32 %v6534_v16, %v10947_v17  ;;  %v6535_v31 = vmul.f32 0.044715, %v6517_v0 }
0x14b6   :  { %8514 = vtanh.f32 %v6563_v49  ;;  %v6540_v42 = vmul.f32 %v6532_v19, %v10950_v36  ;;  %v6533_v62 = vmul.f32 0.044715, %v6509_v23  ;;  %v6526_v44 = vmul.f32 0.5, %v10947_v17 }
0x14b7   :  { %8516 = vtanh.f32 %v6561_v52  ;;  %v6550_v58 = vmul.f32 %v6542_v7, %v10947_v17  ;;  %v6543_v55 = vmul.f32 %v6535_v31, %v6517_v0  ;;  %v6527_v14 = vmul.f32 0.5, %v6517_v0 }
0x14b8   :  { %v6548_v30 = vmul.f32 %v6540_v42, %v10950_v36  ;;  %v6541_v9 = vmul.f32 %v6533_v62, %v6509_v23  ;;  %v6524_v54 = vmul.f32 0.5, %v10950_v36  ;;  %v6525_v49 = vmul.f32 0.5, %v6509_v23 }
0x14b9   :  { %v6558_v24 = vadd.f32 %v6550_v58, %v10947_v17  ;;  %v6551_v4 = vmul.f32 %v6543_v55, %v6517_v0  ;;  %v11099_v55 = vsub.s32 5, %v8881_v3 }
0x14ba   :  { %v6556_v39 = vadd.f32 %v6548_v30, %v10950_v36  ;;  %v6549_v51 = vmul.f32 %v6541_v9, %v6509_v23 }
0x14bb   :  { %v6566_v26 = vmul.f32 0.7978846, %v6558_v24  ;;  %v6559_v56 = vadd.f32 %v6551_v4, %v6517_v0  ;;  %v6608_v17 = vrot.slane %v10784_v11, %v11099_v55  ;;  %v7215_v24 = vld [vmem:[%s11037_s1 + $0x40] sm:$0xff]  ;;  %v7217_v11 = vld [vmem:[%s11037_s1 + $0x50] sm:$0xff] }
0x14bc   :  { %v6564_v48 = vmul.f32 0.7978846, %v6556_v39  ;;  %v6557_v45 = vadd.f32 %v6549_v51, %v6509_v23 }
0x14bd   :  { %8518 = vtanh.f32 %v6566_v26  ;;  %v6567_v28 = vmul.f32 0.7978846, %v6559_v56 }
0x14be   :  { %v8511_v33 = vpop.eup %8510  ;;  %8520 = vtanh.f32 %v6564_v48  ;;  %v6565_v27 = vmul.f32 0.7978846, %v6557_v45  ;;  %v7216_v48 = vld [vmem:[%s11037_s1 + $0x48] sm:$0xff] }
0x14bf   :  { %v8513_v35 = vpop.eup %8512  ;;  %8522 = vtanh.f32 %v6567_v28  ;;  %v6578_v20 = vadd.f32 1.0, %v8511_v33 }
0x14c0   :  { %v8515_v59 = vpop.eup %8514  ;;  %8524 = vtanh.f32 %v6565_v27  ;;  %v6576_v29 = vadd.f32 1.0, %v8513_v35 }
0x14c1   :  { %v8517_v60 = vpop.eup %8516  ;;  %v6579_v63 = vadd.f32 1.0, %v8515_v59  ;;  %v6586_v10 = vmul.f32 %v6578_v20, %v6522_v57 }
0x14c2   :  { %v6577_v6 = vadd.f32 1.0, %v8517_v60  ;;  %v6584_v37 = vmul.f32 %v6576_v29, %v6520_v5 }
0x14c3   :  { %v6587_v18 = vmul.f32 %v6579_v63, %v6523_v61 }
0x14c4   :  { %v6585_v32 = vmul.f32 %v6577_v6, %v6521_v22 }
0x14c5   :  { %v6593_v43 = vpack.c.bf16 %v6587_v18, %v6586_v10 }
0x14c6   :  { %v6592_v1 = vpack.c.bf16 %v6585_v32, %v6584_v37 }
0x14c7   :  { %v8519_v41 = vpop.eup %8518 }
0x14c8   :  { %v8521_v25 = vpop.eup %8520  ;;  %8024 = vmatprep.mubr.msk.bf16.mxu0 %vm3528_vm12, %v6592_v1  ;;  %v6582_v53 = vadd.f32 1.0, %v8519_v41 }
0x14c9   :  { %v8523_v15 = vpop.eup %8522  ;;  %8025 = vmatmul.mubr.msk.bf16.vlgmr.msra.gmra.mrb[136].mxu0 %vm3528_vm12, %v6593_v43  ;;  %v6580_v21 = vadd.f32 1.0, %v8521_v25 }
0x14ca   :  { %v8525_v50 = vpop.eup %8524  ;;  %v6583_v16 = vadd.f32 1.0, %v8523_v15  ;;  %v6590_v52 = vmul.f32 %v6582_v53, %v6526_v44 }
0x14cb   :  { %v6581_v19 = vadd.f32 1.0, %v8525_v50  ;;  %v6588_v31 = vmul.f32 %v6580_v21, %v6524_v54 }
0x14cc   :  { %v6591_v7 = vmul.f32 %v6583_v16, %v6527_v14 }
0x14cd   :  { %v6589_v42 = vmul.f32 %v6581_v19, %v6525_v49 }
0x14ce   :  { %v6595_v62 = vpack.c.bf16 %v6591_v7, %v6590_v52 }
0x14cf   :  { %v6594_v58 = vpack.c.bf16 %v6589_v42, %v6588_v31 }
0x14d1   :  { %8028 = vmatprep.mubr.msk.bf16.mxu0 %vm3528_vm12, %v6594_v58 }
0x14d2   :  { %8029 = vmatmul.mubr.msk.bf16.gmra.mrb[140].mxu0 %vm3528_vm12, %v6595_v62 }
0x159c   :  { %v8026_v0 = vpop.f32.mrb[136].mxu0 }
0x159d   :  { %v6688_v30 = vadd.f32 %v8026_v0, %v6608_v17  ;;  %v6679_v9 = vpop.f32.mrb[137].mxu0 }
0x159e   :  { %v6680_v36 = vadd.f32 %v6679_v9, %v6608_v17  ;;  %v8027_v23 = vpop.f32.mrb[138].mxu0 }
0x159f   :  { %v6691_v4 = vadd.f32 %v8027_v23, %v6608_v17  ;;  %v6682_v39 = vpop.f32.mrb[139].mxu0  ;;  %v6712_v51 = vadd.f32 %v6688_v30, %v10800_v2  ;;  %v7218_v2 = vld [vmem:[%s11037_s1 + $0x58] sm:$0xff] }
0x15a0   :  { %v6710_v26 = vadd.f32 %v6680_v36, %v10796_v46  ;;  %v6683_v56 = vadd.f32 %v6682_v39, %v6608_v17 }
0x15a1   :  { %v6713_v28 = vadd.f32 %v6691_v4, %v10811_v38  ;;  %v6725_v27 = vmul.f32 %v7217_v11, %v6712_v51 }
0x15a2   :  { %v6723_v45 = vmul.f32 %v7215_v24, %v6710_v26  ;;  %v6711_v33 = vadd.f32 %v6683_v56, %v10804_v47 }
0x15a3   :  { %v6726_v59 = vmul.f32 %v7218_v2, %v6713_v28  ;;  %v6734_v38 = vsel %vm513_vm1, %v6725_v27, 0.0 }
0x15a4   :  { %v6724_v46 = vmul.f32 %v7216_v48, %v6711_v33  ;;  %v6731_v20 = vsel %vm513_vm1, %v6723_v45, 0.0  ;;  %v8157_v45 = vld [vmem:[%s11047_s11 + $0x8] sm:$0xff]  }
0x15a5   :  { %v8030_v35 = vpop.f32.mrb[140].mxu0  ;;  %v6736_v32 = vsel %vm513_vm1, %v6726_v59, 0.0  ;;  %v7220_v59 = vld [vmem:[%s11046_s10 + $0x1] ss:$0 sm:$0xff] }
0x15a6   :  { %v6732_v29 = vsel %vm513_vm1, %v6724_v46, 0.0  ;;  %v6704_v60 = vadd.f32 %v8030_v35, %v6608_v17  ;;  %v6695_v57 = vpop.f32.mrb[141].mxu0  ;;  %v7219_v46 = vld [vmem:[%s11046_s10] ss:$0 sm:$0xff] }
0x15a7   :  { %v6733_v61 = vadd.f32 %v6732_v29, %v6731_v20  ;;  %v6696_v63 = vadd.f32 %v6695_v57, %v6608_v17  ;;  %v8031_v5 = vpop.f32.mrb[142].mxu0 }
0x15a8   :  { %v6707_v47 = vadd.f32 %v8031_v5, %v6608_v17  ;;  %v6698_v22 = vpop.f32.mrb[143].mxu0  ;;  %v6716_v10 = vadd.f32 %v6704_v60, %v10831_v8 }
0x15a9   :  { %v6735_v6 = vadd.f32 %v6734_v38, %v6733_v61  ;;  %v6714_v18 = vadd.f32 %v6696_v63, %v10824_v34  ;;  %v6699_v37 = vadd.f32 %v6698_v22, %v6608_v17 }
0x15aa   :  { %v6717_v41 = vadd.f32 %v6707_v47, %v10819_v13  ;;  %v6729_v53 = vmul.f32 %v7217_v11, %v6716_v10 }
0x15ab   :  { %v6737_v43 = vadd.f32 %v6736_v32, %v6735_v6  ;;  %v6727_v1 = vmul.f32 %v7215_v24, %v6714_v18  ;;  %v6715_v25 = vadd.f32 %v6699_v37, %v10814_v12  ;;  %v8559_v18 = vmov 1966171168  }
0x15ac   :  { %v6730_v44 = vmul.f32 %v7218_v2, %v6717_v41  ;;  %v6747_v34 = vsel %vm513_vm1, %v6729_v53, 0.0  ;;  %v6881_v37 = vunpack.c.l.s4 %v8559_v18 }
0x15ad   :  { %v6728_v15 = vmul.f32 %v7216_v48, %v6715_v25  ;;  %v6738_v21 = vrot.slane %v6737_v43, 4  ;;  %v6744_v50 = vsel %vm513_vm1, %v6727_v1, 0.0  ;;  %v8156_v48 = vld [vmem:[%s11047_s11] sm:$0xff]  }
0x15ae   :  { %v6749_v49 = vsel %vm513_vm1, %v6730_v44, 0.0  ;;  %8033 = vmatpush3.bf16.msra.mxu1 %v8156_v48  ;;  %v6882_v32 = vunpack.c.0.s8 %v6881_v37 }
0x15af   :  { %v6745_v14 = vsel %vm513_vm1, %v6728_v15, 0.0  ;;  %v6739_v16 = vadd.f32 %v6738_v21, %v6737_v43  ;;  %8034 = vmatprep.subr.bf16.mxu1 %v11096_v40  ;;  %v7221_v43 = vld [vmem:[%s11046_s10 + $0x2] ss:$0 sm:$0xff] }
0x15b0   :  { %v6746_v8 = vadd.f32 %v6745_v14, %v6744_v50  ;;  %v6885_v1 = vsub.s32 %v6882_v32, %v8881_v3 }
0x15b1   :  { %v6740_v52 = vrot.slane %v6739_v16, 2 }
0x15b2   :  { %v6748_v54 = vadd.f32 %v6747_v34, %v6746_v8  ;;  %8035 = vmatpush3.bf16.msra.mxu1 %v8157_v45 }
0x15b3   :  { %v6741_v7 = vadd.f32 %v6740_v52, %v6739_v16 }
0x15b4   :  { %v6750_v19 = vadd.f32 %v6749_v49, %v6748_v54 }
0x15b5   :  { %v6742_v42 = vrot.slane %v6741_v7, 1 }
0x15b6   :  { %v6751_v13 = vrot.slane %v6750_v19, 4 }
0x15b7   :  { %v6743_v55 = vadd.f32 %v6742_v42, %v6741_v7 }
0x15b8   :  { %v6752_v12 = vadd.f32 %v6751_v13, %v6750_v19 }
0x15ba   :  { %v6753_v31 = vrot.slane %v6752_v12, 2 }
0x15bc   :  { %v6754_v62 = vadd.f32 %v6753_v31, %v6752_v12 }
0x15be   :  { %v6755_v58 = vrot.slane %v6754_v62, 1 }
0x15c0   :  { %v6756_v17 = vadd.f32 %v6755_v58, %v6754_v62 }
0x15c2   :  { %v6762_v0 = vsel %vm6761_vm13, %v6756_v17, %v6743_v55 }
0x15c3   :  { %v6765_v30 = vsel %vm6764_vm14, %v6762_v0, 0.0 }
0x15c4   :  { %6766 = vadd.xlane.f32.xlu0 %v6765_v30 }
0x1651   :  { %v6767_v9 = vpop.xlane.xlu0 %6766 }
0x1652   :  { %v6768_v36 = vmul.f32 0.03125, %v6767_v9 }
0x1654   :  { %v6770_v23 = vrot.slane %v6768_v36, 1  ;;  %v6773_v24 = vsub.f32 %v6743_v55, %v6768_v36 }
0x1656   :  { %v6774_v4 = vsub.f32 %v6756_v17, %v6770_v23  ;;  %v6775_v51 = vmul.f32 %v6773_v24, %v6773_v24 }
0x1658   :  { %v6776_v39 = vmul.f32 %v6774_v4, %v6774_v4 }
0x165a   :  { %v6779_v26 = vrot.slane %v6776_v39, 7 }
0x165c   :  { %v6780_v56 = vsel %vm6761_vm13, %v6779_v26, %v6775_v51 }
0x165d   :  { %v6782_v11 = vsel %vm6764_vm14, %v6780_v56, 0.0 }
0x165e   :  { %6783 = vadd.xlane.f32.xlu1 %v6782_v11 }
0x16eb   :  { %v6784_v28 = vpop.xlane.xlu1 %6783 }
0x16ec   :  { %v6785_v33 = vmul.f32 0.03125, %v6784_v28 }
0x16ee   :  { %v6786_v2 = vadd.f32 1e-05, %v6785_v33 }
0x16f0   :  { %8526 = vrsqrt.f32 %v6786_v2 }
0x16fa   :  { %v8527_v27 = vpop.eup %8526 }
0x16fb   :  { %v6789_v35 = vrot.slane %v8527_v27, 1  ;;  %v6792_v20 = vmul.f32 %v8527_v27, %v6773_v24 }
0x16fd   :  { %v6793_v29 = vmul.f32 %v6789_v35, %v6774_v4  ;;  %v6798_v60 = vmul.f32 %v7219_v46, %v6792_v20 }
0x16ff   :  { %v6799_v57 = vmul.f32 %v7219_v46, %v6793_v29  ;;  %v6804_v40 = vadd.f32 %v7220_v59, %v6798_v60 }
0x1701   :  { %v6805_v61 = vadd.f32 %v7220_v59, %v6799_v57  ;;  %v6806_v63 = vpack.c.bf16 %v6804_v40, %v6804_v40 }
0x1703   :  { %v6807_v5 = vpack.c.bf16 %v6805_v61, %v6805_v61  ;;  %v6819_v47 = vunpack.c.l.b16 %v6806_v63 }
0x1705   :  { %v6820_v38 = vunpack.c.l.b16 %v6807_v5 }
0x1707   :  { %v6821_v22 = vrot.slane %v6820_v38, 7 }
0x1709   :  { %v6822_v6 = vsel %vm6761_vm13, %v6821_v22, %v6819_v47 }
0x170a   :  { %v6823_v10 = vpack.c.b16 %v6822_v6, %v6822_v6 }
0x170c   :  { %8037 = vmatmul.mubr.msk.bf16.vlgmr.msra.gmra.mrb[160].mxu1 %vm513_vm1, %v6823_v10 }
0x17df   :  { %v6873_v41 = vpop.f32.mrb[160].mxu1 }
0x17e0   :  { %v6874_v25 = vadd.f32 %v7221_v43, %v6873_v41  ;;  %v8038_v53 = vpop.f32.mrb[161].mxu1 }
0x17e1   :  { %v6876_v15 = vpop.f32.mrb[162].mxu1 }
0x17e2   :  { %v6886_v21 = vrot.slane %v6874_v25, %v6885_v1  ;;  %v8039_v50 = vpop.f32.mrb[163].mxu1 }
0x17e4   :  { %v6887_v44 = vcombine.high %v6886_v21, %v6886_v21  ;;  %v6894_v14 = vrot.slane %v6886_v21, %v6885_v1 }
0x17e6   :  { %v6901_v8 = vrot.slane %v6887_v44, %v6885_v1  ;;  %6905 = vst.msk [vmem:[#allocation2] sm:$0x1] %vm6904_vm0, %v6894_v14 }
0x17e8   :  { %6906 = vst.msk [vmem:[#allocation2 + $0x1] sm:$0x1] %vm6904_vm0, %v6901_v8 }
0x17e9   :  { %8541 = shalt.err (!%p8538_p4)
}
0x17ea   :  { %s8542_s4 = scalar_lea.hbm %s11048_s12, 32 }
0x17eb   :  { %p8543_p5 = scmp.ne.s32.totalorder %s11048_s12, %s8542_s4  ;;  %p8546_p6 = scmp.lt.u32.totalorder %s8542_s4, %s11048_s12 }
0x17ed   :  { %p8548_p7 = pnand %p8546_p6, %p8543_p5 }
0x17ef   :  { %8551 = shalt.err (!%p8548_p7)
}
0x17f0   :  { %s8561_s2 = smov 16   ;;  %s8562_s30 = smov 1  }
0x17f1   :  { %6918 = dma.vmem_to_hbm [thread:$0]  %s6913_s6, 32, %s11048_s12, [#allocation3], %s8561_s2, %s8561_s2, %s8562_s30  }
0x17f2   :  { %8552 = dma.done.wait [#allocation3], 32  }
0x17f3   :  { %8553 = vsyncadd [#allocation3], 4294967264 }
0x17f4   :  { %6922 = vsyncpa [#allocation3], 1 }

</bundles_post_ra>
